<compile_context>
chip_gen: v7x
topology: tpu7x:2x2x1
jax: 0.10.0
libtpu: 0.0.40
codegen_flags: <defaults>
</compile_context>

<pallas_src>
import functools

import jax
import jax.numpy as jnp
from jax.experimental import pallas as pl
from jax.experimental.pallas import tpu as pltpu

# ---------------------------------------------------------------------------
# Scaled-down config (structurally identical to CLIP-L 24/24/576/1024 ->
# 4/4/16/64) so the example stays small.
# ---------------------------------------------------------------------------
PATCH_NUM_HEIGHT = 4
PATCH_NUM_WIDTH = 4
MAX_PATCHES = PATCH_NUM_WIDTH * PATCH_NUM_HEIGHT            # 16
HIDDEN_SIZE = 64
POSITION_EMBEDDING_LENGTH = HIDDEN_SIZE
NUM_CHANNELS = 3
IMAGE_SIZE = 32
PATCH_SIZE = 8
NUM_PATCHES = (IMAGE_SIZE // PATCH_SIZE) ** 2               # 16
SEQ_LEN = MAX_PATCHES + 1                                   # 17
SEQ_PAD = ((SEQ_LEN + 7) // 8) * 8                          # 24 (sublane mult)
NUM_HEADS = 4
HEAD_DIM = HIDDEN_SIZE // NUM_HEADS
INTERMEDIATE_SIZE = 128
NUM_LAYERS = 2
LAYER_NORM_EPS = 1e-5
ATTN_SCALE = HEAD_DIM ** -0.5


# ---------------------------------------------------------------------------
# In-kernel helpers
# ---------------------------------------------------------------------------
def _ln(x, gamma, beta, eps=LAYER_NORM_EPS):
    """Row-wise layernorm in f32.  x:(M,D), gamma/beta:(1,D)."""
    mu = jnp.mean(x, axis=-1, keepdims=True)
    var = jnp.mean(jnp.square(x - mu), axis=-1, keepdims=True)
    return (x - mu) * jax.lax.rsqrt(var + eps) * gamma + beta


# ---------------------------------------------------------------------------
# Kernel 1: patch embedding + class/pos add + pre-layernorm
# ---------------------------------------------------------------------------
def _embed_kernel(patch_ref, wpe_ref, cls_ref, pos_ref, lnp_ref, hs_ref, *, batch):
    # patch conv as one matmul: (B*NP, C*P*P) @ (C*P*P, D), bf16 -> f32 acc
    pe = jnp.dot(patch_ref[...], wpe_ref[...], preferred_element_type=jnp.float32)
    cls = cls_ref[...]                       # (1, D)
    pos = pos_ref[...]                       # (B*SEQ_PAD, D), padded rows = 0
    lnp = lnp_ref[...]                       # (2, D): gamma, beta
    g, b = lnp[0:1, :], lnp[1:2, :]
    n_pad = SEQ_PAD - SEQ_LEN
    for bi in range(batch):
        base = bi * SEQ_PAD
        rows = jnp.concatenate(
            [
                cls + pos[base:base + 1, :],
                pe[bi * NUM_PATCHES:(bi + 1) * NUM_PATCHES, :]
                + pos[base + 1:base + 1 + NUM_PATCHES, :],
                jnp.zeros((n_pad, HIDDEN_SIZE), jnp.float32),
            ],
            axis=0,
        )                                    # (SEQ_PAD, D)
        hs_ref[base:base + SEQ_PAD, :] = _ln(rows, g, b)


def embed_and_preln(patches, w_patch, class_emb, pos, pre_ln, *, batch):
    BT = batch * SEQ_PAD
    D = HIDDEN_SIZE
    return pl.pallas_call(
        functools.partial(_embed_kernel, batch=batch),
        out_shape=jax.ShapeDtypeStruct((BT, D), jnp.float32),
        grid=(1,),
        in_specs=[
            pl.BlockSpec(patches.shape, lambda i: (0, 0)),
            pl.BlockSpec(w_patch.shape, lambda i: (0, 0)),
            pl.BlockSpec((1, D), lambda i: (0, 0)),
            pl.BlockSpec((BT, D), lambda i: (0, 0)),
            pl.BlockSpec((2, D), lambda i: (0, 0)),
        ],
        out_specs=pl.BlockSpec((BT, D), lambda i: (0, 0)),
        compiler_params=pltpu.CompilerParams(dimension_semantics=("arbitrary",)),
    )(patches, w_patch, class_emb, pos, pre_ln)


# ---------------------------------------------------------------------------
# Kernel 2: fused encoder (all layers) + post-LN of the CLS token
# ---------------------------------------------------------------------------
def _encoder_kernel(hs_ref, mask_ref, ln1_ref, wqkv_ref, bqkv_ref, wo_ref, bo_ref,
                    ln2_ref, w1_ref, b1_ref, w2_ref, b2_ref, postln_ref,
                    out_ref, pooled_ref, *, batch):
    layer = pl.program_id(0)
    D = HIDDEN_SIZE

    @pl.when(layer == 0)
    def _init():
        out_ref[...] = hs_ref[...]           # hidden state resident in VMEM

    h = out_ref[...]                         # (B*SEQ_PAD, D) f32
    mask = mask_ref[...]                     # (B, SEQ_PAD) additive key mask

    # ---- self-attention block --------------------------------------------
    ln1 = ln1_ref[0]
    x = _ln(h, ln1[0:1, :], ln1[1:2, :])
    # fused Q|K|V projection: one (D, 3D) matmul, bf16 operands, f32 acc
    qkv = jnp.dot(x.astype(jnp.bfloat16), wqkv_ref[0],
                  preferred_element_type=jnp.float32) + bqkv_ref[0]
    per_batch = []
    for b in range(batch):
        base = b * SEQ_PAD
        m = mask[b:b + 1, :]                 # (1, SEQ_PAD) per-key additive
        heads = []
        for hh in range(NUM_HEADS):
            lo = hh * HEAD_DIM
            q = qkv[base:base + SEQ_PAD, lo:lo + HEAD_DIM] * ATTN_SCALE
            k = qkv[base:base + SEQ_PAD, D + lo:D + lo + HEAD_DIM]
            v = qkv[base:base + SEQ_PAD, 2 * D + lo:2 * D + lo + HEAD_DIM]
            s = jax.lax.dot_general(
                q.astype(jnp.bfloat16), k.astype(jnp.bfloat16),
                (((1,), (1,)), ((), ())), preferred_element_type=jnp.float32)
            # HF CLIPAttention adds causal_attention_mask and attention_mask;
            # both are the same tensor in this module -> mask added twice.
            s = s + m + m
            s = s - jnp.max(s, axis=-1, keepdims=True)
            p = jnp.exp(s)
            p = p * pl.reciprocal(jnp.sum(p, axis=-1, keepdims=True), approx=True)
            heads.append(jnp.dot(p.astype(jnp.bfloat16), v.astype(jnp.bfloat16),
                                 preferred_element_type=jnp.float32))
        per_batch.append(jnp.concatenate(heads, axis=1))     # (SEQ_PAD, D)
    attn = jnp.concatenate(per_batch, axis=0)                # (B*SEQ_PAD, D)
    attn = jnp.dot(attn.astype(jnp.bfloat16), wo_ref[0],
                   preferred_element_type=jnp.float32) + bo_ref[0]
    h = h + attn

    # ---- MLP block ---------------------------------------------------------
    ln2 = ln2_ref[0]
    x = _ln(h, ln2[0:1, :], ln2[1:2, :])
    x = jnp.dot(x.astype(jnp.bfloat16), w1_ref[0],
                preferred_element_type=jnp.float32) + b1_ref[0]
    x = x * (1.0 / (1.0 + jnp.exp(-1.702 * x)))              # quick_gelu
    x = jnp.dot(x.astype(jnp.bfloat16), w2_ref[0],
                preferred_element_type=jnp.float32) + b2_ref[0]
    h = h + x
    out_ref[...] = h

    # ---- pooled output: post-LN of the CLS token (last grid step wins) -----
    postln = postln_ref[...]
    cls = jnp.concatenate(
        [h[b * SEQ_PAD:b * SEQ_PAD + 1, :] for b in range(batch)], axis=0)
    pooled_ref[...] = _ln(cls, postln[0:1, :], postln[1:2, :])


def encoder_forward(hs, mask, stacked, post_ln, *, batch):
    BT = batch * SEQ_PAD
    D = HIDDEN_SIZE
    F = INTERMEDIATE_SIZE
    return pl.pallas_call(
        functools.partial(_encoder_kernel, batch=batch),
        out_shape=(jax.ShapeDtypeStruct((BT, D), jnp.float32),
                   jax.ShapeDtypeStruct((batch, D), jnp.float32)),
        grid=(NUM_LAYERS,),
        in_specs=[
            pl.BlockSpec((BT, D), lambda l: (0, 0)),            # hidden states
            pl.BlockSpec((batch, SEQ_PAD), lambda l: (0, 0)),   # key mask
            pl.BlockSpec((1, 2, D), lambda l: (l, 0, 0)),       # ln1 g/b
            pl.BlockSpec((1, D, 3 * D), lambda l: (l, 0, 0)),   # fused qkv w
            pl.BlockSpec((1, 1, 3 * D), lambda l: (l, 0, 0)),   # fused qkv b
            pl.BlockSpec((1, D, D), lambda l: (l, 0, 0)),       # o-proj w
            pl.BlockSpec((1, 1, D), lambda l: (l, 0, 0)),       # o-proj b
            pl.BlockSpec((1, 2, D), lambda l: (l, 0, 0)),       # ln2 g/b
            pl.BlockSpec((1, D, F), lambda l: (l, 0, 0)),       # fc1 w
            pl.BlockSpec((1, 1, F), lambda l: (l, 0, 0)),       # fc1 b
            pl.BlockSpec((1, F, D), lambda l: (l, 0, 0)),       # fc2 w
            pl.BlockSpec((1, 1, D), lambda l: (l, 0, 0)),       # fc2 b
            pl.BlockSpec((2, D), lambda l: (0, 0)),             # post-LN g/b
        ],
        out_specs=(pl.BlockSpec((BT, D), lambda l: (0, 0)),
                   pl.BlockSpec((batch, D), lambda l: (0, 0))),
        compiler_params=pltpu.CompilerParams(dimension_semantics=("arbitrary",)),
    )(hs, mask, stacked["ln1"], stacked["wqkv"], stacked["bqkv"],
      stacked["wo"], stacked["bo"], stacked["ln2"],
      stacked["w1"], stacked["b1"], stacked["w2"], stacked["b2"], post_ln)


# ---------------------------------------------------------------------------
# Plain-JAX glue: torch-compatible bicubic position-embedding resize,
# vectorized over the batch with a static MAX_PATCHES output shape
# (no per-sample int() / recompile; works with traced patch counts).
# ---------------------------------------------------------------------------
def _cubic_weights(t, A=-0.75):
    def cc1(x):   # |x| <= 1
        return ((A + 2.0) * x - (A + 3.0)) * x * x + 1.0

    def cc2(x):   # 1 < |x| < 2
        return ((A * x - 5.0 * A) * x + 8.0 * A) * x - 4.0 * A

    return jnp.stack([cc2(t + 1.0), cc1(t), cc1(1.0 - t), cc2(2.0 - t)], axis=-1)


def _position_embedding_single(pos_table, w_num, h_num):
    """F.interpolate(mode='bicubic', align_corners=False) of the (W,H) grid to
    (h_num, w_num), flattened row-major and zero-padded to MAX_PATCHES."""
    D = POSITION_EMBEDDING_LENGTH
    grid = pos_table[1:].reshape(PATCH_NUM_WIDTH, PATCH_NUM_HEIGHT, D)
    grid = grid.astype(jnp.float32)
    wf = w_num.astype(jnp.float32)
    hf = h_num.astype(jnp.float32)

    p = jnp.arange(MAX_PATCHES, dtype=jnp.int32)
    r = p // w_num                    # output row -> source axis 0 (width grid)
    c = p % w_num                     # output col -> source axis 1 (height grid)

    def taps(dst, out_size, in_size):
        src = (dst.astype(jnp.float32) + 0.5) * (in_size / out_size) - 0.5
        x0 = jnp.floor(src)
        t = src - x0
        idx = jnp.clip(x0[:, None].astype(jnp.int32) + jnp.arange(-1, 3)[None, :],
                       0, in_size - 1)
        return idx, _cubic_weights(t)

    yi, wy = taps(r, hf, PATCH_NUM_WIDTH)        # (MAX_PATCHES, 4)
    xi, wx = taps(c, wf, PATCH_NUM_HEIGHT)
    window = grid[yi[:, :, None], xi[:, None, :], :]          # (MP, 4, 4, D)
    vals = jnp.einsum("pa,pb,pabd->pd", wy, wx, window)       # (MP, D)
    valid = (p < w_num * h_num)[:, None]
    vals = jnp.where(valid, vals, 0.0)                        # pad rows -> 0
    cls_pos = pos_table[0:1].astype(jnp.float32)
    return jnp.concatenate([cls_pos, vals], axis=0)           # (SEQ_LEN, D)


def extract_patches(x):
    """NCHW -> (B, num_patches, C*P*P), patch order row-major over (Hp, Wp)."""
    B, C, H, W = x.shape
    P = PATCH_SIZE
    x = x.reshape(B, C, H // P, P, W // P, P)
    x = jnp.transpose(x, (0, 2, 4, 1, 3, 5))
    return x.reshape(B, (H // P) * (W // P), C * P * P)


def _stack_layers(layers):
    """Stack per-layer params into (L, ...) arrays; fuse q|k|v; bf16 weights."""
    st = lambda key: jnp.stack([lp[key] for lp in layers])
    return {
        "ln1": jnp.stack([jnp.stack([lp["ln1_g"], lp["ln1_b"]]) for lp in layers]
                         ).astype(jnp.float32),
        "wqkv": jnp.stack([jnp.concatenate([lp["q_w"], lp["k_w"], lp["v_w"]], axis=1)
                           for lp in layers]).astype(jnp.bfloat16),
        "bqkv": jnp.stack([jnp.concatenate([lp["q_b"], lp["k_b"], lp["v_b"]])[None, :]
                           for lp in layers]).astype(jnp.float32),
        "wo": st("o_w").astype(jnp.bfloat16),
        "bo": st("o_b")[:, None, :].astype(jnp.float32),
        "ln2": jnp.stack([jnp.stack([lp["ln2_g"], lp["ln2_b"]]) for lp in layers]
                         ).astype(jnp.float32),
        "w1": st("fc1_w").astype(jnp.bfloat16),
        "b1": st("fc1_b")[:, None, :].astype(jnp.float32),
        "w2": st("fc2_w").astype(jnp.bfloat16),
        "b2": st("fc2_b")[:, None, :].astype(jnp.float32),
    }


# ---------------------------------------------------------------------------
# Parameters
# ---------------------------------------------------------------------------
def init_params(key):
    ks = iter(jax.random.split(key, 8 + NUM_LAYERS * 8))
    n = lambda shape, s=0.02: jax.random.normal(next(ks), shape, jnp.float32) * s
    params = {
        "class_embedding": jax.random.normal(next(ks), (HIDDEN_SIZE,), jnp.float32),
        "patch_embedding_w": n((HIDDEN_SIZE, NUM_CHANNELS, PATCH_SIZE, PATCH_SIZE)),
        "position_embedding": n((SEQ_LEN, HIDDEN_SIZE)),
        "pre_ln_g": jnp.ones((HIDDEN_SIZE,), jnp.float32),
        "pre_ln_b": jnp.zeros((HIDDEN_SIZE,), jnp.float32),
        "post_ln_g": jnp.ones((HIDDEN_SIZE,), jnp.float32),
        "post_ln_b": jnp.zeros((HIDDEN_SIZE,), jnp.float32),
        "layers": [],
    }
    for _ in range(NUM_LAYERS):
        params["layers"].append({
            "ln1_g": jnp.ones((HIDDEN_SIZE,), jnp.float32),
            "ln1_b": jnp.zeros((HIDDEN_SIZE,), jnp.float32),
            "q_w": n((HIDDEN_SIZE, HIDDEN_SIZE)), "q_b": jnp.zeros((HIDDEN_SIZE,)),
            "k_w": n((HIDDEN_SIZE, HIDDEN_SIZE)), "k_b": jnp.zeros((HIDDEN_SIZE,)),
            "v_w": n((HIDDEN_SIZE, HIDDEN_SIZE)), "v_b": jnp.zeros((HIDDEN_SIZE,)),
            "o_w": n((HIDDEN_SIZE, HIDDEN_SIZE)), "o_b": jnp.zeros((HIDDEN_SIZE,)),
            "ln2_g": jnp.ones((HIDDEN_SIZE,), jnp.float32),
            "ln2_b": jnp.zeros((HIDDEN_SIZE,), jnp.float32),
            "fc1_w": n((HIDDEN_SIZE, INTERMEDIATE_SIZE)),
            "fc1_b": jnp.zeros((INTERMEDIATE_SIZE,)),
            "fc2_w": n((INTERMEDIATE_SIZE, HIDDEN_SIZE)),
            "fc2_b": jnp.zeros((HIDDEN_SIZE,)),
        })
    return params


# ---------------------------------------------------------------------------
# Forward pass
# ---------------------------------------------------------------------------
def adapt_clip_vision_transformer_forward(pixel_values, w_patch_num, h_patch_num,
                                          params):
    B = pixel_values.shape[0]
    D = HIDDEN_SIZE
    BT = B * SEQ_PAD

    # --- embeddings: patch conv (kernel == stride, no bias) as im2col matmul
    patches = extract_patches(pixel_values.astype(jnp.float32))        # (B,NP,CPP)
    CPP = patches.shape[-1]
    patches = patches.reshape(B * NUM_PATCHES, CPP).astype(jnp.bfloat16)
    w_patch = params["patch_embedding_w"].reshape(D, CPP).T.astype(jnp.bfloat16)

    w_arr = jnp.asarray(w_patch_num, jnp.int32)
    h_arr = jnp.asarray(h_patch_num, jnp.int32)
    pos = jax.vmap(_position_embedding_single, in_axes=(None, 0, 0))(
        params["position_embedding"], w_arr, h_arr)                    # (B,S,D)
    pos = jnp.pad(pos, ((0, 0), (0, SEQ_PAD - SEQ_LEN), (0, 0))).reshape(BT, D)

    cls = params["class_embedding"].reshape(1, D).astype(jnp.float32)
    pre_ln = jnp.stack([params["pre_ln_g"], params["pre_ln_b"]]).astype(jnp.float32)
    post_ln = jnp.stack([params["post_ln_g"], params["post_ln_b"]]).astype(jnp.float32)

    # Pallas kernel 1: patch-embed + class/pos add + pre-layernorm.
    hs = embed_and_preln(patches, w_patch, cls, pos, pre_ln, batch=B)   # (BT, D)

    # --- attention-mask bookkeeping, faithful to the torch forward:
    # mask = -inf where post-pre-LN row sums are exactly -1.0 (else 0); it is
    # added twice inside attention (attention_mask == causal_attention_mask).
    # Values are only 0 / -inf so torch's bf16 round trip is a numeric no-op.
    # TODO(synk): torch's per-element `_true` debug comparison against the
    # pre-LN (sums == 0) mask has no effect on outputs and is omitted.
    sums = hs.reshape(B, SEQ_PAD, D).sum(axis=-1)                       # (B,S_PAD)
    attn_mask = jnp.where(sums == -1.0, -jnp.inf, 0.0)
    key_is_real = (jnp.arange(SEQ_PAD) < SEQ_LEN)[None, :]
    mask = jnp.where(key_is_real, attn_mask, -jnp.inf).astype(jnp.float32)

    stacked = _stack_layers(params["layers"])

    # Pallas kernel 2: all encoder layers fused (grid over layers) + post-LN
    # of the CLS token (pooled output).
    hs_out, pooled = encoder_forward(hs, mask, stacked, post_ln, batch=B)

    last_hidden_state = hs_out.reshape(B, SEQ_PAD, D)[:, :SEQ_LEN, :]
    return last_hidden_state, pooled


# ---------------------------------------------------------------------------
if __name__ == "__main__":
    key = jax.random.PRNGKey(0)
    pkey, ikey = jax.random.split(key)
    params = init_params(pkey)
    pixel_values = jax.random.normal(
        ikey, (2, NUM_CHANNELS, IMAGE_SIZE, IMAGE_SIZE), jnp.float32)
    w_patch_num = jnp.array([4, 3], jnp.int32)
    h_patch_num = jnp.array([4, 3], jnp.int32)

    fwd = jax.jit(adapt_clip_vision_transformer_forward)
    last_hidden_state, pooled_output = fwd(pixel_values, w_patch_num,
                                           h_patch_num, params)
    jax.block_until_ready((last_hidden_state, pooled_output))

    assert last_hidden_state.shape == (2, SEQ_LEN, HIDDEN_SIZE)
    assert pooled_output.shape == (2, HIDDEN_SIZE)
    assert bool(jnp.all(jnp.isfinite(last_hidden_state)))
    assert bool(jnp.all(jnp.isfinite(pooled_output)))
    print("KERNEL_OK")
</pallas_src>

<mosaic_0001>
module attributes {stable_mosaic.version = 11 : i64} {
  func.func @_embed_kernel(%arg0: i32, %arg1: memref<32x192xbf16, #tpu.memory_space<vmem>>, %arg2: memref<192x64xbf16, #tpu.memory_space<vmem>>, %arg3: memref<1x64xf32, #tpu.memory_space<vmem>>, %arg4: memref<48x64xf32, #tpu.memory_space<vmem>>, %arg5: memref<2x64xf32, #tpu.memory_space<vmem>>, %arg6: memref<48x64xf32, #tpu.memory_space<vmem>>) attributes {dimension_semantics = [#tpu.dimension_semantics<arbitrary>], iteration_bounds = array<i64: 1>, scalar_prefetch = 0 : i64, scratch_operands = 0 : i64, tpu.core_type = #tpu.core_type<tc>, window_params = [{pipeline_mode = #tpu.pipeline_mode<synchronous>, transform_indices = @transform_0, window_bounds = array<i64: 32, 192>}, {pipeline_mode = #tpu.pipeline_mode<synchronous>, transform_indices = @transform_1, window_bounds = array<i64: 192, 64>}, {pipeline_mode = #tpu.pipeline_mode<synchronous>, transform_indices = @transform_2, window_bounds = array<i64: 1, 64>}, {pipeline_mode = #tpu.pipeline_mode<synchronous>, transform_indices = @transform_3, window_bounds = array<i64: 48, 64>}, {pipeline_mode = #tpu.pipeline_mode<synchronous>, transform_indices = @transform_4, window_bounds = array<i64: 2, 64>}, {pipeline_mode = #tpu.pipeline_mode<synchronous>, transform_indices = @transform_5, window_bounds = array<i64: 48, 64>}]} {
    %c0 = arith.constant 0 : index
    %c0_0 = arith.constant 0 : index
    %0 = vector.load %arg1[%c0, %c0_0] : memref<32x192xbf16, #tpu.memory_space<vmem>>, vector<32x192xbf16>
    %c0_1 = arith.constant 0 : index
    %c0_2 = arith.constant 0 : index
    %1 = vector.load %arg2[%c0_1, %c0_2] : memref<192x64xbf16, #tpu.memory_space<vmem>>, vector<192x64xbf16>
    %cst = arith.constant dense<0.000000e+00> : vector<32x64xf32>
    %2 = tpu.matmul %0, %1, %cst {dimension_numbers = #tpu.dot_dimension_numbers<[1], [0], [0], [1], [0, 0, 1, 1], [], []>} : vector<32x192xbf16>, vector<192x64xbf16>, vector<32x64xf32> -> vector<32x64xf32>
    %c0_3 = arith.constant 0 : index
    %c0_4 = arith.constant 0 : index
    %3 = vector.load %arg3[%c0_3, %c0_4] : memref<1x64xf32, #tpu.memory_space<vmem>>, vector<1x64xf32>
    %c0_5 = arith.constant 0 : index
    %c0_6 = arith.constant 0 : index
    %4 = vector.load %arg4[%c0_5, %c0_6] : memref<48x64xf32, #tpu.memory_space<vmem>>, vector<48x64xf32>
    %c0_7 = arith.constant 0 : index
    %c0_8 = arith.constant 0 : index
    %5 = vector.load %arg5[%c0_7, %c0_8] : memref<2x64xf32, #tpu.memory_space<vmem>>, vector<2x64xf32>
    %6 = vector.extract_strided_slice %5 {offsets = [0, 0], sizes = [1, 64], strides = [1, 1]} : vector<2x64xf32> to vector<1x64xf32>
    %7 = vector.extract_strided_slice %5 {offsets = [1, 0], sizes = [1, 64], strides = [1, 1]} : vector<2x64xf32> to vector<1x64xf32>
    %8 = vector.extract_strided_slice %4 {offsets = [0, 0], sizes = [1, 64], strides = [1, 1]} : vector<48x64xf32> to vector<1x64xf32>
    %9 = arith.addf %3, %8 : vector<1x64xf32>
    %10 = vector.extract_strided_slice %2 {offsets = [0, 0], sizes = [16, 64], strides = [1, 1]} : vector<32x64xf32> to vector<16x64xf32>
    %11 = vector.extract_strided_slice %4 {offsets = [1, 0], sizes = [16, 64], strides = [1, 1]} : vector<48x64xf32> to vector<16x64xf32>
    %12 = arith.addf %10, %11 : vector<16x64xf32>
    %cst_9 = arith.constant 0.000000e+00 : f32
    %13 = vector.broadcast %cst_9 : f32 to vector<7x64xf32>
    %14 = tpu.concatenate %9, %12, %13 in 0 : vector<1x64xf32>, vector<16x64xf32>, vector<7x64xf32> -> vector<24x64xf32>
    %cst_10 = arith.constant dense<0.000000e+00> : vector<24xf32>
    %15 = vector.multi_reduction <add>, %14, %cst_10 [1] : vector<24x64xf32> to vector<24xf32>
    %16 = vector.shape_cast %15 : vector<24xf32> to vector<24x1xf32>
    %cst_11 = arith.constant 6.400000e+01 : f32
    %17 = vector.broadcast %cst_11 : f32 to vector<24x1xf32>
    %18 = arith.divf %16, %17 : vector<24x1xf32>
    %19 = vector.broadcast %18 : vector<24x1xf32> to vector<24x64xf32>
    %20 = arith.subf %14, %19 : vector<24x64xf32>
    %21 = arith.mulf %20, %20 : vector<24x64xf32>
    %cst_12 = arith.constant dense<0.000000e+00> : vector<24xf32>
    %22 = vector.multi_reduction <add>, %21, %cst_12 [1] : vector<24x64xf32> to vector<24xf32>
    %23 = vector.shape_cast %22 : vector<24xf32> to vector<24x1xf32>
    %cst_13 = arith.constant 6.400000e+01 : f32
    %24 = vector.broadcast %cst_13 : f32 to vector<24x1xf32>
    %25 = arith.divf %23, %24 : vector<24x1xf32>
    %26 = vector.broadcast %18 : vector<24x1xf32> to vector<24x64xf32>
    %27 = arith.subf %14, %26 : vector<24x64xf32>
    %cst_14 = arith.constant 9.99999974E-6 : f32
    %28 = vector.broadcast %cst_14 : f32 to vector<24x1xf32>
    %29 = arith.addf %25, %28 : vector<24x1xf32>
    %30 = math.rsqrt %29 : vector<24x1xf32>
    %31 = vector.broadcast %30 : vector<24x1xf32> to vector<24x64xf32>
    %32 = arith.mulf %27, %31 : vector<24x64xf32>
    %33 = vector.broadcast %6 : vector<1x64xf32> to vector<24x64xf32>
    %34 = arith.mulf %32, %33 : vector<24x64xf32>
    %35 = vector.broadcast %7 : vector<1x64xf32> to vector<24x64xf32>
    %36 = arith.addf %34, %35 : vector<24x64xf32>
    %c0_15 = arith.constant 0 : index
    %c0_16 = arith.constant 0 : index
    %37 = vector.load %arg6[%c0_15, %c0_16] : memref<48x64xf32, #tpu.memory_space<vmem>>, vector<24x64xf32>
    tpu.vector_store %arg6[%c0_15, %c0_16], %36 {strides = array<i32>} : memref<48x64xf32, #tpu.memory_space<vmem>>, vector<24x64xf32>,
    %38 = vector.extract_strided_slice %4 {offsets = [24, 0], sizes = [1, 64], strides = [1, 1]} : vector<48x64xf32> to vector<1x64xf32>
    %39 = arith.addf %3, %38 : vector<1x64xf32>
    %40 = vector.extract_strided_slice %2 {offsets = [16, 0], sizes = [16, 64], strides = [1, 1]} : vector<32x64xf32> to vector<16x64xf32>
    %41 = vector.extract_strided_slice %4 {offsets = [25, 0], sizes = [16, 64], strides = [1, 1]} : vector<48x64xf32> to vector<16x64xf32>
    %42 = arith.addf %40, %41 : vector<16x64xf32>
    %cst_17 = arith.constant 0.000000e+00 : f32
    %43 = vector.broadcast %cst_17 : f32 to vector<7x64xf32>
    %44 = tpu.concatenate %39, %42, %43 in 0 : vector<1x64xf32>, vector<16x64xf32>, vector<7x64xf32> -> vector<24x64xf32>
    %cst_18 = arith.constant dense<0.000000e+00> : vector<24xf32>
    %45 = vector.multi_reduction <add>, %44, %cst_18 [1] : vector<24x64xf32> to vector<24xf32>
    %46 = vector.shape_cast %45 : vector<24xf32> to vector<24x1xf32>
    %cst_19 = arith.constant 6.400000e+01 : f32
    %47 = vector.broadcast %cst_19 : f32 to vector<24x1xf32>
    %48 = arith.divf %46, %47 : vector<24x1xf32>
    %49 = vector.broadcast %48 : vector<24x1xf32> to vector<24x64xf32>
    %50 = arith.subf %44, %49 : vector<24x64xf32>
    %51 = arith.mulf %50, %50 : vector<24x64xf32>
    %cst_20 = arith.constant dense<0.000000e+00> : vector<24xf32>
    %52 = vector.multi_reduction <add>, %51, %cst_20 [1] : vector<24x64xf32> to vector<24xf32>
    %53 = vector.shape_cast %52 : vector<24xf32> to vector<24x1xf32>
    %cst_21 = arith.constant 6.400000e+01 : f32
    %54 = vector.broadcast %cst_21 : f32 to vector<24x1xf32>
    %55 = arith.divf %53, %54 : vector<24x1xf32>
    %56 = vector.broadcast %48 : vector<24x1xf32> to vector<24x64xf32>
    %57 = arith.subf %44, %56 : vector<24x64xf32>
    %cst_22 = arith.constant 9.99999974E-6 : f32
    %58 = vector.broadcast %cst_22 : f32 to vector<24x1xf32>
    %59 = arith.addf %55, %58 : vector<24x1xf32>
    %60 = math.rsqrt %59 : vector<24x1xf32>
    %61 = vector.broadcast %60 : vector<24x1xf32> to vector<24x64xf32>
    %62 = arith.mulf %57, %61 : vector<24x64xf32>
    %63 = vector.broadcast %6 : vector<1x64xf32> to vector<24x64xf32>
    %64 = arith.mulf %62, %63 : vector<24x64xf32>
    %65 = vector.broadcast %7 : vector<1x64xf32> to vector<24x64xf32>
    %66 = arith.addf %64, %65 : vector<24x64xf32>
    %c24 = arith.constant 24 : index
    %c0_23 = arith.constant 0 : index
    %67 = vector.load %arg6[%c24, %c0_23] : memref<48x64xf32, #tpu.memory_space<vmem>>, vector<24x64xf32>
    tpu.vector_store %arg6[%c24, %c0_23], %66 {strides = array<i32>} : memref<48x64xf32, #tpu.memory_space<vmem>>, vector<24x64xf32>,
    return
  }
  func.func @transform_0(%arg0: i32) -> (i32, i32) {
    %c0_i32 = arith.constant 0 : i32
    %c0_i32_0 = arith.constant 0 : i32
    %c0_i32_1 = arith.constant 0 : i32
    return %c0_i32, %c0_i32_0 : i32, i32
  }
  func.func @transform_1(%arg0: i32) -> (i32, i32) {
    %c0_i32 = arith.constant 0 : i32
    %c0_i32_0 = arith.constant 0 : i32
    %c0_i32_1 = arith.constant 0 : i32
    return %c0_i32, %c0_i32_0 : i32, i32
  }
  func.func @transform_2(%arg0: i32) -> (i32, i32) {
    %c0_i32 = arith.constant 0 : i32
    %c0_i32_0 = arith.constant 0 : i32
    %c0_i32_1 = arith.constant 0 : i32
    return %c0_i32, %c0_i32_0 : i32, i32
  }
  func.func @transform_3(%arg0: i32) -> (i32, i32) {
    %c0_i32 = arith.constant 0 : i32
    %c0_i32_0 = arith.constant 0 : i32
    %c0_i32_1 = arith.constant 0 : i32
    return %c0_i32, %c0_i32_0 : i32, i32
  }
  func.func @transform_4(%arg0: i32) -> (i32, i32) {
    %c0_i32 = arith.constant 0 : i32
    %c0_i32_0 = arith.constant 0 : i32
    %c0_i32_1 = arith.constant 0 : i32
    return %c0_i32, %c0_i32_0 : i32, i32
  }
  func.func @transform_5(%arg0: i32) -> (i32, i32) {
    %c0_i32 = arith.constant 0 : i32
    %c0_i32_0 = arith.constant 0 : i32
    %c0_i32_1 = arith.constant 0 : i32
    return %c0_i32, %c0_i32_0 : i32, i32
  }
}

module attributes {stable_mosaic.version = 11 : i64} {
  func.func @_encoder_kernel(%arg0: i32, %arg1: memref<48x64xf32, #tpu.memory_space<vmem>>, %arg2: memref<2x24xf32, #tpu.memory_space<vmem>>, %arg3: memref<1x2x64xf32, #tpu.memory_space<vmem>>, %arg4: memref<1x64x192xbf16, #tpu.memory_space<vmem>>, %arg5: memref<1x1x192xf32, #tpu.memory_space<vmem>>, %arg6: memref<1x64x64xbf16, #tpu.memory_space<vmem>>, %arg7: memref<1x1x64xf32, #tpu.memory_space<vmem>>, %arg8: memref<1x2x64xf32, #tpu.memory_space<vmem>>, %arg9: memref<1x64x128xbf16, #tpu.memory_space<vmem>>, %arg10: memref<1x1x128xf32, #tpu.memory_space<vmem>>, %arg11: memref<1x128x64xbf16, #tpu.memory_space<vmem>>, %arg12: memref<1x1x64xf32, #tpu.memory_space<vmem>>, %arg13: memref<2x64xf32, #tpu.memory_space<vmem>>, %arg14: memref<48x64xf32, #tpu.memory_space<vmem>>, %arg15: memref<2x64xf32, #tpu.memory_space<vmem>>) attributes {dimension_semantics = [#tpu.dimension_semantics<arbitrary>], iteration_bounds = array<i64: 2>, scalar_prefetch = 0 : i64, scratch_operands = 0 : i64, tpu.core_type = #tpu.core_type<tc>, window_params = [{pipeline_mode = #tpu.pipeline_mode<synchronous>, transform_indices = @transform_0, window_bounds = array<i64: 48, 64>}, {pipeline_mode = #tpu.pipeline_mode<synchronous>, transform_indices = @transform_1, window_bounds = array<i64: 2, 24>}, {transform_indices = @transform_2, window_bounds = array<i64: 1, 2, 64>}, {transform_indices = @transform_3, window_bounds = array<i64: 1, 64, 192>}, {transform_indices = @transform_4, window_bounds = array<i64: 1, 1, 192>}, {transform_indices = @transform_5, window_bounds = array<i64: 1, 64, 64>}, {transform_indices = @transform_6, window_bounds = array<i64: 1, 1, 64>}, {transform_indices = @transform_7, window_bounds = array<i64: 1, 2, 64>}, {transform_indices = @transform_8, window_bounds = array<i64: 1, 64, 128>}, {transform_indices = @transform_9, window_bounds = array<i64: 1, 1, 128>}, {transform_indices = @transform_10, window_bounds = array<i64: 1, 128, 64>}, {transform_indices = @transform_11, window_bounds = array<i64: 1, 1, 64>}, {pipeline_mode = #tpu.pipeline_mode<synchronous>, transform_indices = @transform_12, window_bounds = array<i64: 2, 64>}, {pipeline_mode = #tpu.pipeline_mode<synchronous>, transform_indices = @transform_13, window_bounds = array<i64: 48, 64>}, {pipeline_mode = #tpu.pipeline_mode<synchronous>, transform_indices = @transform_14, window_bounds = array<i64: 2, 64>}]} {
    %c0_i32 = arith.constant 0 : i32
    %0 = arith.cmpi eq, %arg0, %c0_i32 : i32
    %1 = arith.extui %0 : i1 to i32
    %c0_i32_0 = arith.constant 0 : i32
    %2 = arith.cmpi ne, %1, %c0_i32_0 : i32
    scf.if %2 {
      %c0_101 = arith.constant 0 : index
      %c0_102 = arith.constant 0 : index
      %334 = vector.load %arg1[%c0_101, %c0_102] : memref<48x64xf32, #tpu.memory_space<vmem>>, vector<48x64xf32>
      %c0_103 = arith.constant 0 : index
      %c0_104 = arith.constant 0 : index
      %335 = vector.load %arg14[%c0_103, %c0_104] : memref<48x64xf32, #tpu.memory_space<vmem>>, vector<48x64xf32>
      tpu.vector_store %arg14[%c0_103, %c0_104], %334 {strides = array<i32>} : memref<48x64xf32, #tpu.memory_space<vmem>>, vector<48x64xf32>,
    } else {
    }
    %c0 = arith.constant 0 : index
    %c0_1 = arith.constant 0 : index
    %3 = vector.load %arg14[%c0, %c0_1] : memref<48x64xf32, #tpu.memory_space<vmem>>, vector<48x64xf32>
    %c0_2 = arith.constant 0 : index
    %c0_3 = arith.constant 0 : index
    %4 = vector.load %arg2[%c0_2, %c0_3] : memref<2x24xf32, #tpu.memory_space<vmem>>, vector<2x24xf32>
    %c0_4 = arith.constant 0 : index
    %c0_5 = arith.constant 0 : index
    %c0_6 = arith.constant 0 : index
    %5 = vector.load %arg3[%c0_4, %c0_5, %c0_6] : memref<1x2x64xf32, #tpu.memory_space<vmem>>, vector<1x2x64xf32>
    %6 = vector.shape_cast %5 : vector<1x2x64xf32> to vector<2x64xf32>
    %7 = vector.extract_strided_slice %6 {offsets = [0, 0], sizes = [1, 64], strides = [1, 1]} : vector<2x64xf32> to vector<1x64xf32>
    %8 = vector.extract_strided_slice %6 {offsets = [1, 0], sizes = [1, 64], strides = [1, 1]} : vector<2x64xf32> to vector<1x64xf32>
    %cst = arith.constant dense<0.000000e+00> : vector<48xf32>
    %9 = vector.multi_reduction <add>, %3, %cst [1] : vector<48x64xf32> to vector<48xf32>
    %10 = vector.shape_cast %9 : vector<48xf32> to vector<48x1xf32>
    %cst_7 = arith.constant 6.400000e+01 : f32
    %11 = vector.broadcast %cst_7 : f32 to vector<48x1xf32>
    %12 = arith.divf %10, %11 : vector<48x1xf32>
    %13 = vector.broadcast %12 : vector<48x1xf32> to vector<48x64xf32>
    %14 = arith.subf %3, %13 : vector<48x64xf32>
    %15 = arith.mulf %14, %14 : vector<48x64xf32>
    %cst_8 = arith.constant dense<0.000000e+00> : vector<48xf32>
    %16 = vector.multi_reduction <add>, %15, %cst_8 [1] : vector<48x64xf32> to vector<48xf32>
    %17 = vector.shape_cast %16 : vector<48xf32> to vector<48x1xf32>
    %cst_9 = arith.constant 6.400000e+01 : f32
    %18 = vector.broadcast %cst_9 : f32 to vector<48x1xf32>
    %19 = arith.divf %17, %18 : vector<48x1xf32>
    %20 = vector.broadcast %12 : vector<48x1xf32> to vector<48x64xf32>
    %21 = arith.subf %3, %20 : vector<48x64xf32>
    %cst_10 = arith.constant 9.99999974E-6 : f32
    %22 = vector.broadcast %cst_10 : f32 to vector<48x1xf32>
    %23 = arith.addf %19, %22 : vector<48x1xf32>
    %24 = math.rsqrt %23 : vector<48x1xf32>
    %25 = vector.broadcast %24 : vector<48x1xf32> to vector<48x64xf32>
    %26 = arith.mulf %21, %25 : vector<48x64xf32>
    %27 = vector.broadcast %7 : vector<1x64xf32> to vector<48x64xf32>
    %28 = arith.mulf %26, %27 : vector<48x64xf32>
    %29 = vector.broadcast %8 : vector<1x64xf32> to vector<48x64xf32>
    %30 = arith.addf %28, %29 : vector<48x64xf32>
    %31 = arith.truncf %30 : vector<48x64xf32> to vector<48x64xbf16>
    %c0_11 = arith.constant 0 : index
    %c0_12 = arith.constant 0 : index
    %c0_13 = arith.constant 0 : index
    %32 = vector.load %arg4[%c0_11, %c0_12, %c0_13] : memref<1x64x192xbf16, #tpu.memory_space<vmem>>, vector<1x64x192xbf16>
    %33 = vector.shape_cast %32 : vector<1x64x192xbf16> to vector<64x192xbf16>
    %cst_14 = arith.constant dense<0.000000e+00> : vector<48x192xf32>
    %34 = tpu.matmul %31, %33, %cst_14 {dimension_numbers = #tpu.dot_dimension_numbers<[1], [0], [0], [1], [0, 0, 1, 1], [], []>} : vector<48x64xbf16>, vector<64x192xbf16>, vector<48x192xf32> -> vector<48x192xf32>
    %c0_15 = arith.constant 0 : index
    %c0_16 = arith.constant 0 : index
    %c0_17 = arith.constant 0 : index
    %35 = vector.load %arg5[%c0_15, %c0_16, %c0_17] : memref<1x1x192xf32, #tpu.memory_space<vmem>>, vector<1x1x192xf32>
    %36 = vector.shape_cast %35 : vector<1x1x192xf32> to vector<1x192xf32>
    %37 = vector.broadcast %36 : vector<1x192xf32> to vector<48x192xf32>
    %38 = arith.addf %34, %37 : vector<48x192xf32>
    %39 = vector.extract_strided_slice %4 {offsets = [0, 0], sizes = [1, 24], strides = [1, 1]} : vector<2x24xf32> to vector<1x24xf32>
    %40 = vector.extract_strided_slice %38 {offsets = [0, 0], sizes = [24, 16], strides = [1, 1]} : vector<48x192xf32> to vector<24x16xf32>
    %cst_18 = arith.constant 2.500000e-01 : f32
    %41 = vector.broadcast %cst_18 : f32 to vector<24x16xf32>
    %42 = arith.mulf %40, %41 : vector<24x16xf32>
    %43 = vector.extract_strided_slice %38 {offsets = [0, 64], sizes = [24, 16], strides = [1, 1]} : vector<48x192xf32> to vector<24x16xf32>
    %44 = vector.extract_strided_slice %38 {offsets = [0, 128], sizes = [24, 16], strides = [1, 1]} : vector<48x192xf32> to vector<24x16xf32>
    %45 = arith.truncf %42 : vector<24x16xf32> to vector<24x16xbf16>
    %46 = arith.truncf %43 : vector<24x16xf32> to vector<24x16xbf16>
    %cst_19 = arith.constant dense<0.000000e+00> : vector<24x24xf32>
    %47 = tpu.matmul %45, %46, %cst_19 {dimension_numbers = #tpu.dot_dimension_numbers<[1], [1], [0], [0], [0, 0, 1, 0], [], []>} : vector<24x16xbf16>, vector<24x16xbf16>, vector<24x24xf32> -> vector<24x24xf32>
    %48 = vector.broadcast %39 : vector<1x24xf32> to vector<24x24xf32>
    %49 = arith.addf %47, %48 : vector<24x24xf32>
    %50 = vector.broadcast %39 : vector<1x24xf32> to vector<24x24xf32>
    %51 = arith.addf %49, %50 : vector<24x24xf32>
    %cst_20 = arith.constant dense<0xFF800000> : vector<24xf32>
    %52 = vector.multi_reduction <maximumf>, %51, %cst_20 [1] : vector<24x24xf32> to vector<24xf32>
    %53 = vector.shape_cast %52 : vector<24xf32> to vector<24x1xf32>
    %54 = vector.broadcast %53 : vector<24x1xf32> to vector<24x24xf32>
    %55 = arith.subf %51, %54 : vector<24x24xf32>
    %56 = math.exp %55 : vector<24x24xf32>
    %cst_21 = arith.constant dense<0.000000e+00> : vector<24xf32>
    %57 = vector.multi_reduction <add>, %56, %cst_21 [1] : vector<24x24xf32> to vector<24xf32>
    %58 = vector.shape_cast %57 : vector<24xf32> to vector<24x1xf32>
    %59 = tpu.reciprocal %58 {approx = true} : vector<24x1xf32> -> vector<24x1xf32>
    %60 = vector.broadcast %59 : vector<24x1xf32> to vector<24x24xf32>
    %61 = arith.mulf %56, %60 : vector<24x24xf32>
    %62 = arith.truncf %61 : vector<24x24xf32> to vector<24x24xbf16>
    %63 = arith.truncf %44 : vector<24x16xf32> to vector<24x16xbf16>
    %cst_22 = arith.constant dense<0.000000e+00> : vector<24x16xf32>
    %64 = tpu.matmul %62, %63, %cst_22 {dimension_numbers = #tpu.dot_dimension_numbers<[1], [0], [0], [1], [0, 0, 1, 1], [], []>} : vector<24x24xbf16>, vector<24x16xbf16>, vector<24x16xf32> -> vector<24x16xf32>
    %65 = vector.extract_strided_slice %38 {offsets = [0, 16], sizes = [24, 16], strides = [1, 1]} : vector<48x192xf32> to vector<24x16xf32>
    %cst_23 = arith.constant 2.500000e-01 : f32
    %66 = vector.broadcast %cst_23 : f32 to vector<24x16xf32>
    %67 = arith.mulf %65, %66 : vector<24x16xf32>
    %68 = vector.extract_strided_slice %38 {offsets = [0, 80], sizes = [24, 16], strides = [1, 1]} : vector<48x192xf32> to vector<24x16xf32>
    %69 = vector.extract_strided_slice %38 {offsets = [0, 144], sizes = [24, 16], strides = [1, 1]} : vector<48x192xf32> to vector<24x16xf32>
    %70 = arith.truncf %67 : vector<24x16xf32> to vector<24x16xbf16>
    %71 = arith.truncf %68 : vector<24x16xf32> to vector<24x16xbf16>
    %cst_24 = arith.constant dense<0.000000e+00> : vector<24x24xf32>
    %72 = tpu.matmul %70, %71, %cst_24 {dimension_numbers = #tpu.dot_dimension_numbers<[1], [1], [0], [0], [0, 0, 1, 0], [], []>} : vector<24x16xbf16>, vector<24x16xbf16>, vector<24x24xf32> -> vector<24x24xf32>
    %73 = vector.broadcast %39 : vector<1x24xf32> to vector<24x24xf32>
    %74 = arith.addf %72, %73 : vector<24x24xf32>
    %75 = vector.broadcast %39 : vector<1x24xf32> to vector<24x24xf32>
    %76 = arith.addf %74, %75 : vector<24x24xf32>
    %cst_25 = arith.constant dense<0xFF800000> : vector<24xf32>
    %77 = vector.multi_reduction <maximumf>, %76, %cst_25 [1] : vector<24x24xf32> to vector<24xf32>
    %78 = vector.shape_cast %77 : vector<24xf32> to vector<24x1xf32>
    %79 = vector.broadcast %78 : vector<24x1xf32> to vector<24x24xf32>
    %80 = arith.subf %76, %79 : vector<24x24xf32>
    %81 = math.exp %80 : vector<24x24xf32>
    %cst_26 = arith.constant dense<0.000000e+00> : vector<24xf32>
    %82 = vector.multi_reduction <add>, %81, %cst_26 [1] : vector<24x24xf32> to vector<24xf32>
    %83 = vector.shape_cast %82 : vector<24xf32> to vector<24x1xf32>
    %84 = tpu.reciprocal %83 {approx = true} : vector<24x1xf32> -> vector<24x1xf32>
    %85 = vector.broadcast %84 : vector<24x1xf32> to vector<24x24xf32>
    %86 = arith.mulf %81, %85 : vector<24x24xf32>
    %87 = arith.truncf %86 : vector<24x24xf32> to vector<24x24xbf16>
    %88 = arith.truncf %69 : vector<24x16xf32> to vector<24x16xbf16>
    %cst_27 = arith.constant dense<0.000000e+00> : vector<24x16xf32>
    %89 = tpu.matmul %87, %88, %cst_27 {dimension_numbers = #tpu.dot_dimension_numbers<[1], [0], [0], [1], [0, 0, 1, 1], [], []>} : vector<24x24xbf16>, vector<24x16xbf16>, vector<24x16xf32> -> vector<24x16xf32>
    %90 = vector.extract_strided_slice %38 {offsets = [0, 32], sizes = [24, 16], strides = [1, 1]} : vector<48x192xf32> to vector<24x16xf32>
    %cst_28 = arith.constant 2.500000e-01 : f32
    %91 = vector.broadcast %cst_28 : f32 to vector<24x16xf32>
    %92 = arith.mulf %90, %91 : vector<24x16xf32>
    %93 = vector.extract_strided_slice %38 {offsets = [0, 96], sizes = [24, 16], strides = [1, 1]} : vector<48x192xf32> to vector<24x16xf32>
    %94 = vector.extract_strided_slice %38 {offsets = [0, 160], sizes = [24, 16], strides = [1, 1]} : vector<48x192xf32> to vector<24x16xf32>
    %95 = arith.truncf %92 : vector<24x16xf32> to vector<24x16xbf16>
    %96 = arith.truncf %93 : vector<24x16xf32> to vector<24x16xbf16>
    %cst_29 = arith.constant dense<0.000000e+00> : vector<24x24xf32>
    %97 = tpu.matmul %95, %96, %cst_29 {dimension_numbers = #tpu.dot_dimension_numbers<[1], [1], [0], [0], [0, 0, 1, 0], [], []>} : vector<24x16xbf16>, vector<24x16xbf16>, vector<24x24xf32> -> vector<24x24xf32>
    %98 = vector.broadcast %39 : vector<1x24xf32> to vector<24x24xf32>
    %99 = arith.addf %97, %98 : vector<24x24xf32>
    %100 = vector.broadcast %39 : vector<1x24xf32> to vector<24x24xf32>
    %101 = arith.addf %99, %100 : vector<24x24xf32>
    %cst_30 = arith.constant dense<0xFF800000> : vector<24xf32>
    %102 = vector.multi_reduction <maximumf>, %101, %cst_30 [1] : vector<24x24xf32> to vector<24xf32>
    %103 = vector.shape_cast %102 : vector<24xf32> to vector<24x1xf32>
    %104 = vector.broadcast %103 : vector<24x1xf32> to vector<24x24xf32>
    %105 = arith.subf %101, %104 : vector<24x24xf32>
    %106 = math.exp %105 : vector<24x24xf32>
    %cst_31 = arith.constant dense<0.000000e+00> : vector<24xf32>
    %107 = vector.multi_reduction <add>, %106, %cst_31 [1] : vector<24x24xf32> to vector<24xf32>
    %108 = vector.shape_cast %107 : vector<24xf32> to vector<24x1xf32>
    %109 = tpu.reciprocal %108 {approx = true} : vector<24x1xf32> -> vector<24x1xf32>
    %110 = vector.broadcast %109 : vector<24x1xf32> to vector<24x24xf32>
    %111 = arith.mulf %106, %110 : vector<24x24xf32>
    %112 = arith.truncf %111 : vector<24x24xf32> to vector<24x24xbf16>
    %113 = arith.truncf %94 : vector<24x16xf32> to vector<24x16xbf16>
    %cst_32 = arith.constant dense<0.000000e+00> : vector<24x16xf32>
    %114 = tpu.matmul %112, %113, %cst_32 {dimension_numbers = #tpu.dot_dimension_numbers<[1], [0], [0], [1], [0, 0, 1, 1], [], []>} : vector<24x24xbf16>, vector<24x16xbf16>, vector<24x16xf32> -> vector<24x16xf32>
    %115 = vector.extract_strided_slice %38 {offsets = [0, 48], sizes = [24, 16], strides = [1, 1]} : vector<48x192xf32> to vector<24x16xf32>
    %cst_33 = arith.constant 2.500000e-01 : f32
    %116 = vector.broadcast %cst_33 : f32 to vector<24x16xf32>
    %117 = arith.mulf %115, %116 : vector<24x16xf32>
    %118 = vector.extract_strided_slice %38 {offsets = [0, 112], sizes = [24, 16], strides = [1, 1]} : vector<48x192xf32> to vector<24x16xf32>
    %119 = vector.extract_strided_slice %38 {offsets = [0, 176], sizes = [24, 16], strides = [1, 1]} : vector<48x192xf32> to vector<24x16xf32>
    %120 = arith.truncf %117 : vector<24x16xf32> to vector<24x16xbf16>
    %121 = arith.truncf %118 : vector<24x16xf32> to vector<24x16xbf16>
    %cst_34 = arith.constant dense<0.000000e+00> : vector<24x24xf32>
    %122 = tpu.matmul %120, %121, %cst_34 {dimension_numbers = #tpu.dot_dimension_numbers<[1], [1], [0], [0], [0, 0, 1, 0], [], []>} : vector<24x16xbf16>, vector<24x16xbf16>, vector<24x24xf32> -> vector<24x24xf32>
    %123 = vector.broadcast %39 : vector<1x24xf32> to vector<24x24xf32>
    %124 = arith.addf %122, %123 : vector<24x24xf32>
    %125 = vector.broadcast %39 : vector<1x24xf32> to vector<24x24xf32>
    %126 = arith.addf %124, %125 : vector<24x24xf32>
    %cst_35 = arith.constant dense<0xFF800000> : vector<24xf32>
    %127 = vector.multi_reduction <maximumf>, %126, %cst_35 [1] : vector<24x24xf32> to vector<24xf32>
    %128 = vector.shape_cast %127 : vector<24xf32> to vector<24x1xf32>
    %129 = vector.broadcast %128 : vector<24x1xf32> to vector<24x24xf32>
    %130 = arith.subf %126, %129 : vector<24x24xf32>
    %131 = math.exp %130 : vector<24x24xf32>
    %cst_36 = arith.constant dense<0.000000e+00> : vector<24xf32>
    %132 = vector.multi_reduction <add>, %131, %cst_36 [1] : vector<24x24xf32> to vector<24xf32>
    %133 = vector.shape_cast %132 : vector<24xf32> to vector<24x1xf32>
    %134 = tpu.reciprocal %133 {approx = true} : vector<24x1xf32> -> vector<24x1xf32>
    %135 = vector.broadcast %134 : vector<24x1xf32> to vector<24x24xf32>
    %136 = arith.mulf %131, %135 : vector<24x24xf32>
    %137 = arith.truncf %136 : vector<24x24xf32> to vector<24x24xbf16>
    %138 = arith.truncf %119 : vector<24x16xf32> to vector<24x16xbf16>
    %cst_37 = arith.constant dense<0.000000e+00> : vector<24x16xf32>
    %139 = tpu.matmul %137, %138, %cst_37 {dimension_numbers = #tpu.dot_dimension_numbers<[1], [0], [0], [1], [0, 0, 1, 1], [], []>} : vector<24x24xbf16>, vector<24x16xbf16>, vector<24x16xf32> -> vector<24x16xf32>
    %140 = tpu.concatenate %64, %89, %114, %139 in 1 : vector<24x16xf32>, vector<24x16xf32>, vector<24x16xf32>, vector<24x16xf32> -> vector<24x64xf32>
    %141 = vector.extract_strided_slice %4 {offsets = [1, 0], sizes = [1, 24], strides = [1, 1]} : vector<2x24xf32> to vector<1x24xf32>
    %142 = vector.extract_strided_slice %38 {offsets = [24, 0], sizes = [24, 16], strides = [1, 1]} : vector<48x192xf32> to vector<24x16xf32>
    %cst_38 = arith.constant 2.500000e-01 : f32
    %143 = vector.broadcast %cst_38 : f32 to vector<24x16xf32>
    %144 = arith.mulf %142, %143 : vector<24x16xf32>
    %145 = vector.extract_strided_slice %38 {offsets = [24, 64], sizes = [24, 16], strides = [1, 1]} : vector<48x192xf32> to vector<24x16xf32>
    %146 = vector.extract_strided_slice %38 {offsets = [24, 128], sizes = [24, 16], strides = [1, 1]} : vector<48x192xf32> to vector<24x16xf32>
    %147 = arith.truncf %144 : vector<24x16xf32> to vector<24x16xbf16>
    %148 = arith.truncf %145 : vector<24x16xf32> to vector<24x16xbf16>
    %cst_39 = arith.constant dense<0.000000e+00> : vector<24x24xf32>
    %149 = tpu.matmul %147, %148, %cst_39 {dimension_numbers = #tpu.dot_dimension_numbers<[1], [1], [0], [0], [0, 0, 1, 0], [], []>} : vector<24x16xbf16>, vector<24x16xbf16>, vector<24x24xf32> -> vector<24x24xf32>
    %150 = vector.broadcast %141 : vector<1x24xf32> to vector<24x24xf32>
    %151 = arith.addf %149, %150 : vector<24x24xf32>
    %152 = vector.broadcast %141 : vector<1x24xf32> to vector<24x24xf32>
    %153 = arith.addf %151, %152 : vector<24x24xf32>
    %cst_40 = arith.constant dense<0xFF800000> : vector<24xf32>
    %154 = vector.multi_reduction <maximumf>, %153, %cst_40 [1] : vector<24x24xf32> to vector<24xf32>
    %155 = vector.shape_cast %154 : vector<24xf32> to vector<24x1xf32>
    %156 = vector.broadcast %155 : vector<24x1xf32> to vector<24x24xf32>
    %157 = arith.subf %153, %156 : vector<24x24xf32>
    %158 = math.exp %157 : vector<24x24xf32>
    %cst_41 = arith.constant dense<0.000000e+00> : vector<24xf32>
    %159 = vector.multi_reduction <add>, %158, %cst_41 [1] : vector<24x24xf32> to vector<24xf32>
    %160 = vector.shape_cast %159 : vector<24xf32> to vector<24x1xf32>
    %161 = tpu.reciprocal %160 {approx = true} : vector<24x1xf32> -> vector<24x1xf32>
    %162 = vector.broadcast %161 : vector<24x1xf32> to vector<24x24xf32>
    %163 = arith.mulf %158, %162 : vector<24x24xf32>
    %164 = arith.truncf %163 : vector<24x24xf32> to vector<24x24xbf16>
    %165 = arith.truncf %146 : vector<24x16xf32> to vector<24x16xbf16>
    %cst_42 = arith.constant dense<0.000000e+00> : vector<24x16xf32>
    %166 = tpu.matmul %164, %165, %cst_42 {dimension_numbers = #tpu.dot_dimension_numbers<[1], [0], [0], [1], [0, 0, 1, 1], [], []>} : vector<24x24xbf16>, vector<24x16xbf16>, vector<24x16xf32> -> vector<24x16xf32>
    %167 = vector.extract_strided_slice %38 {offsets = [24, 16], sizes = [24, 16], strides = [1, 1]} : vector<48x192xf32> to vector<24x16xf32>
    %cst_43 = arith.constant 2.500000e-01 : f32
    %168 = vector.broadcast %cst_43 : f32 to vector<24x16xf32>
    %169 = arith.mulf %167, %168 : vector<24x16xf32>
    %170 = vector.extract_strided_slice %38 {offsets = [24, 80], sizes = [24, 16], strides = [1, 1]} : vector<48x192xf32> to vector<24x16xf32>
    %171 = vector.extract_strided_slice %38 {offsets = [24, 144], sizes = [24, 16], strides = [1, 1]} : vector<48x192xf32> to vector<24x16xf32>
    %172 = arith.truncf %169 : vector<24x16xf32> to vector<24x16xbf16>
    %173 = arith.truncf %170 : vector<24x16xf32> to vector<24x16xbf16>
    %cst_44 = arith.constant dense<0.000000e+00> : vector<24x24xf32>
    %174 = tpu.matmul %172, %173, %cst_44 {dimension_numbers = #tpu.dot_dimension_numbers<[1], [1], [0], [0], [0, 0, 1, 0], [], []>} : vector<24x16xbf16>, vector<24x16xbf16>, vector<24x24xf32> -> vector<24x24xf32>
    %175 = vector.broadcast %141 : vector<1x24xf32> to vector<24x24xf32>
    %176 = arith.addf %174, %175 : vector<24x24xf32>
    %177 = vector.broadcast %141 : vector<1x24xf32> to vector<24x24xf32>
    %178 = arith.addf %176, %177 : vector<24x24xf32>
    %cst_45 = arith.constant dense<0xFF800000> : vector<24xf32>
    %179 = vector.multi_reduction <maximumf>, %178, %cst_45 [1] : vector<24x24xf32> to vector<24xf32>
    %180 = vector.shape_cast %179 : vector<24xf32> to vector<24x1xf32>
    %181 = vector.broadcast %180 : vector<24x1xf32> to vector<24x24xf32>
    %182 = arith.subf %178, %181 : vector<24x24xf32>
    %183 = math.exp %182 : vector<24x24xf32>
    %cst_46 = arith.constant dense<0.000000e+00> : vector<24xf32>
    %184 = vector.multi_reduction <add>, %183, %cst_46 [1] : vector<24x24xf32> to vector<24xf32>
    %185 = vector.shape_cast %184 : vector<24xf32> to vector<24x1xf32>
    %186 = tpu.reciprocal %185 {approx = true} : vector<24x1xf32> -> vector<24x1xf32>
    %187 = vector.broadcast %186 : vector<24x1xf32> to vector<24x24xf32>
    %188 = arith.mulf %183, %187 : vector<24x24xf32>
    %189 = arith.truncf %188 : vector<24x24xf32> to vector<24x24xbf16>
    %190 = arith.truncf %171 : vector<24x16xf32> to vector<24x16xbf16>
    %cst_47 = arith.constant dense<0.000000e+00> : vector<24x16xf32>
    %191 = tpu.matmul %189, %190, %cst_47 {dimension_numbers = #tpu.dot_dimension_numbers<[1], [0], [0], [1], [0, 0, 1, 1], [], []>} : vector<24x24xbf16>, vector<24x16xbf16>, vector<24x16xf32> -> vector<24x16xf32>
    %192 = vector.extract_strided_slice %38 {offsets = [24, 32], sizes = [24, 16], strides = [1, 1]} : vector<48x192xf32> to vector<24x16xf32>
    %cst_48 = arith.constant 2.500000e-01 : f32
    %193 = vector.broadcast %cst_48 : f32 to vector<24x16xf32>
    %194 = arith.mulf %192, %193 : vector<24x16xf32>
    %195 = vector.extract_strided_slice %38 {offsets = [24, 96], sizes = [24, 16], strides = [1, 1]} : vector<48x192xf32> to vector<24x16xf32>
    %196 = vector.extract_strided_slice %38 {offsets = [24, 160], sizes = [24, 16], strides = [1, 1]} : vector<48x192xf32> to vector<24x16xf32>
    %197 = arith.truncf %194 : vector<24x16xf32> to vector<24x16xbf16>
    %198 = arith.truncf %195 : vector<24x16xf32> to vector<24x16xbf16>
    %cst_49 = arith.constant dense<0.000000e+00> : vector<24x24xf32>
    %199 = tpu.matmul %197, %198, %cst_49 {dimension_numbers = #tpu.dot_dimension_numbers<[1], [1], [0], [0], [0, 0, 1, 0], [], []>} : vector<24x16xbf16>, vector<24x16xbf16>, vector<24x24xf32> -> vector<24x24xf32>
    %200 = vector.broadcast %141 : vector<1x24xf32> to vector<24x24xf32>
    %201 = arith.addf %199, %200 : vector<24x24xf32>
    %202 = vector.broadcast %141 : vector<1x24xf32> to vector<24x24xf32>
    %203 = arith.addf %201, %202 : vector<24x24xf32>
    %cst_50 = arith.constant dense<0xFF800000> : vector<24xf32>
    %204 = vector.multi_reduction <maximumf>, %203, %cst_50 [1] : vector<24x24xf32> to vector<24xf32>
    %205 = vector.shape_cast %204 : vector<24xf32> to vector<24x1xf32>
    %206 = vector.broadcast %205 : vector<24x1xf32> to vector<24x24xf32>
    %207 = arith.subf %203, %206 : vector<24x24xf32>
    %208 = math.exp %207 : vector<24x24xf32>
    %cst_51 = arith.constant dense<0.000000e+00> : vector<24xf32>
    %209 = vector.multi_reduction <add>, %208, %cst_51 [1] : vector<24x24xf32> to vector<24xf32>
    %210 = vector.shape_cast %209 : vector<24xf32> to vector<24x1xf32>
    %211 = tpu.reciprocal %210 {approx = true} : vector<24x1xf32> -> vector<24x1xf32>
    %212 = vector.broadcast %211 : vector<24x1xf32> to vector<24x24xf32>
    %213 = arith.mulf %208, %212 : vector<24x24xf32>
    %214 = arith.truncf %213 : vector<24x24xf32> to vector<24x24xbf16>
    %215 = arith.truncf %196 : vector<24x16xf32> to vector<24x16xbf16>
    %cst_52 = arith.constant dense<0.000000e+00> : vector<24x16xf32>
    %216 = tpu.matmul %214, %215, %cst_52 {dimension_numbers = #tpu.dot_dimension_numbers<[1], [0], [0], [1], [0, 0, 1, 1], [], []>} : vector<24x24xbf16>, vector<24x16xbf16>, vector<24x16xf32> -> vector<24x16xf32>
    %217 = vector.extract_strided_slice %38 {offsets = [24, 48], sizes = [24, 16], strides = [1, 1]} : vector<48x192xf32> to vector<24x16xf32>
    %cst_53 = arith.constant 2.500000e-01 : f32
    %218 = vector.broadcast %cst_53 : f32 to vector<24x16xf32>
    %219 = arith.mulf %217, %218 : vector<24x16xf32>
    %220 = vector.extract_strided_slice %38 {offsets = [24, 112], sizes = [24, 16], strides = [1, 1]} : vector<48x192xf32> to vector<24x16xf32>
    %221 = vector.extract_strided_slice %38 {offsets = [24, 176], sizes = [24, 16], strides = [1, 1]} : vector<48x192xf32> to vector<24x16xf32>
    %222 = arith.truncf %219 : vector<24x16xf32> to vector<24x16xbf16>
    %223 = arith.truncf %220 : vector<24x16xf32> to vector<24x16xbf16>
    %cst_54 = arith.constant dense<0.000000e+00> : vector<24x24xf32>
    %224 = tpu.matmul %222, %223, %cst_54 {dimension_numbers = #tpu.dot_dimension_numbers<[1], [1], [0], [0], [0, 0, 1, 0], [], []>} : vector<24x16xbf16>, vector<24x16xbf16>, vector<24x24xf32> -> vector<24x24xf32>
    %225 = vector.broadcast %141 : vector<1x24xf32> to vector<24x24xf32>
    %226 = arith.addf %224, %225 : vector<24x24xf32>
    %227 = vector.broadcast %141 : vector<1x24xf32> to vector<24x24xf32>
    %228 = arith.addf %226, %227 : vector<24x24xf32>
    %cst_55 = arith.constant dense<0xFF800000> : vector<24xf32>
    %229 = vector.multi_reduction <maximumf>, %228, %cst_55 [1] : vector<24x24xf32> to vector<24xf32>
    %230 = vector.shape_cast %229 : vector<24xf32> to vector<24x1xf32>
    %231 = vector.broadcast %230 : vector<24x1xf32> to vector<24x24xf32>
    %232 = arith.subf %228, %231 : vector<24x24xf32>
    %233 = math.exp %232 : vector<24x24xf32>
    %cst_56 = arith.constant dense<0.000000e+00> : vector<24xf32>
    %234 = vector.multi_reduction <add>, %233, %cst_56 [1] : vector<24x24xf32> to vector<24xf32>
    %235 = vector.shape_cast %234 : vector<24xf32> to vector<24x1xf32>
    %236 = tpu.reciprocal %235 {approx = true} : vector<24x1xf32> -> vector<24x1xf32>
    %237 = vector.broadcast %236 : vector<24x1xf32> to vector<24x24xf32>
    %238 = arith.mulf %233, %237 : vector<24x24xf32>
    %239 = arith.truncf %238 : vector<24x24xf32> to vector<24x24xbf16>
    %240 = arith.truncf %221 : vector<24x16xf32> to vector<24x16xbf16>
    %cst_57 = arith.constant dense<0.000000e+00> : vector<24x16xf32>
    %241 = tpu.matmul %239, %240, %cst_57 {dimension_numbers = #tpu.dot_dimension_numbers<[1], [0], [0], [1], [0, 0, 1, 1], [], []>} : vector<24x24xbf16>, vector<24x16xbf16>, vector<24x16xf32> -> vector<24x16xf32>
    %242 = tpu.concatenate %166, %191, %216, %241 in 1 : vector<24x16xf32>, vector<24x16xf32>, vector<24x16xf32>, vector<24x16xf32> -> vector<24x64xf32>
    %243 = tpu.concatenate %140, %242 in 0 : vector<24x64xf32>, vector<24x64xf32> -> vector<48x64xf32>
    %244 = arith.truncf %243 : vector<48x64xf32> to vector<48x64xbf16>
    %c0_58 = arith.constant 0 : index
    %c0_59 = arith.constant 0 : index
    %c0_60 = arith.constant 0 : index
    %245 = vector.load %arg6[%c0_58, %c0_59, %c0_60] : memref<1x64x64xbf16, #tpu.memory_space<vmem>>, vector<1x64x64xbf16>
    %246 = vector.shape_cast %245 : vector<1x64x64xbf16> to vector<64x64xbf16>
    %cst_61 = arith.constant dense<0.000000e+00> : vector<48x64xf32>
    %247 = tpu.matmul %244, %246, %cst_61 {dimension_numbers = #tpu.dot_dimension_numbers<[1], [0], [0], [1], [0, 0, 1, 1], [], []>} : vector<48x64xbf16>, vector<64x64xbf16>, vector<48x64xf32> -> vector<48x64xf32>
    %c0_62 = arith.constant 0 : index
    %c0_63 = arith.constant 0 : index
    %c0_64 = arith.constant 0 : index
    %248 = vector.load %arg7[%c0_62, %c0_63, %c0_64] : memref<1x1x64xf32, #tpu.memory_space<vmem>>, vector<1x1x64xf32>
    %249 = vector.shape_cast %248 : vector<1x1x64xf32> to vector<1x64xf32>
    %250 = vector.broadcast %249 : vector<1x64xf32> to vector<48x64xf32>
    %251 = arith.addf %247, %250 : vector<48x64xf32>
    %252 = arith.addf %3, %251 : vector<48x64xf32>
    %c0_65 = arith.constant 0 : index
    %c0_66 = arith.constant 0 : index
    %c0_67 = arith.constant 0 : index
    %253 = vector.load %arg8[%c0_65, %c0_66, %c0_67] : memref<1x2x64xf32, #tpu.memory_space<vmem>>, vector<1x2x64xf32>
    %254 = vector.shape_cast %253 : vector<1x2x64xf32> to vector<2x64xf32>
    %255 = vector.extract_strided_slice %254 {offsets = [0, 0], sizes = [1, 64], strides = [1, 1]} : vector<2x64xf32> to vector<1x64xf32>
    %256 = vector.extract_strided_slice %254 {offsets = [1, 0], sizes = [1, 64], strides = [1, 1]} : vector<2x64xf32> to vector<1x64xf32>
    %cst_68 = arith.constant dense<0.000000e+00> : vector<48xf32>
    %257 = vector.multi_reduction <add>, %252, %cst_68 [1] : vector<48x64xf32> to vector<48xf32>
    %258 = vector.shape_cast %257 : vector<48xf32> to vector<48x1xf32>
    %cst_69 = arith.constant 6.400000e+01 : f32
    %259 = vector.broadcast %cst_69 : f32 to vector<48x1xf32>
    %260 = arith.divf %258, %259 : vector<48x1xf32>
    %261 = vector.broadcast %260 : vector<48x1xf32> to vector<48x64xf32>
    %262 = arith.subf %252, %261 : vector<48x64xf32>
    %263 = arith.mulf %262, %262 : vector<48x64xf32>
    %cst_70 = arith.constant dense<0.000000e+00> : vector<48xf32>
    %264 = vector.multi_reduction <add>, %263, %cst_70 [1] : vector<48x64xf32> to vector<48xf32>
    %265 = vector.shape_cast %264 : vector<48xf32> to vector<48x1xf32>
    %cst_71 = arith.constant 6.400000e+01 : f32
    %266 = vector.broadcast %cst_71 : f32 to vector<48x1xf32>
    %267 = arith.divf %265, %266 : vector<48x1xf32>
    %268 = vector.broadcast %260 : vector<48x1xf32> to vector<48x64xf32>
    %269 = arith.subf %252, %268 : vector<48x64xf32>
    %cst_72 = arith.constant 9.99999974E-6 : f32
    %270 = vector.broadcast %cst_72 : f32 to vector<48x1xf32>
    %271 = arith.addf %267, %270 : vector<48x1xf32>
    %272 = math.rsqrt %271 : vector<48x1xf32>
    %273 = vector.broadcast %272 : vector<48x1xf32> to vector<48x64xf32>
    %274 = arith.mulf %269, %273 : vector<48x64xf32>
    %275 = vector.broadcast %255 : vector<1x64xf32> to vector<48x64xf32>
    %276 = arith.mulf %274, %275 : vector<48x64xf32>
    %277 = vector.broadcast %256 : vector<1x64xf32> to vector<48x64xf32>
    %278 = arith.addf %276, %277 : vector<48x64xf32>
    %279 = arith.truncf %278 : vector<48x64xf32> to vector<48x64xbf16>
    %c0_73 = arith.constant 0 : index
    %c0_74 = arith.constant 0 : index
    %c0_75 = arith.constant 0 : index
    %280 = vector.load %arg9[%c0_73, %c0_74, %c0_75] : memref<1x64x128xbf16, #tpu.memory_space<vmem>>, vector<1x64x128xbf16>
    %281 = vector.shape_cast %280 : vector<1x64x128xbf16> to vector<64x128xbf16>
    %cst_76 = arith.constant dense<0.000000e+00> : vector<48x128xf32>
    %282 = tpu.matmul %279, %281, %cst_76 {dimension_numbers = #tpu.dot_dimension_numbers<[1], [0], [0], [1], [0, 0, 1, 1], [], []>} : vector<48x64xbf16>, vector<64x128xbf16>, vector<48x128xf32> -> vector<48x128xf32>
    %c0_77 = arith.constant 0 : index
    %c0_78 = arith.constant 0 : index
    %c0_79 = arith.constant 0 : index
    %283 = vector.load %arg10[%c0_77, %c0_78, %c0_79] : memref<1x1x128xf32, #tpu.memory_space<vmem>>, vector<1x1x128xf32>
    %284 = vector.shape_cast %283 : vector<1x1x128xf32> to vector<1x128xf32>
    %285 = vector.broadcast %284 : vector<1x128xf32> to vector<48x128xf32>
    %286 = arith.addf %282, %285 : vector<48x128xf32>
    %cst_80 = arith.constant -1.702000e+00 : f32
    %287 = vector.broadcast %cst_80 : f32 to vector<48x128xf32>
    %288 = arith.mulf %287, %286 : vector<48x128xf32>
    %289 = math.exp %288 : vector<48x128xf32>
    %cst_81 = arith.constant 1.000000e+00 : f32
    %290 = vector.broadcast %cst_81 : f32 to vector<48x128xf32>
    %291 = arith.addf %290, %289 : vector<48x128xf32>
    %cst_82 = arith.constant 1.000000e+00 : f32
    %292 = vector.broadcast %cst_82 : f32 to vector<48x128xf32>
    %293 = arith.divf %292, %291 : vector<48x128xf32>
    %294 = arith.mulf %286, %293 : vector<48x128xf32>
    %295 = arith.truncf %294 : vector<48x128xf32> to vector<48x128xbf16>
    %c0_83 = arith.constant 0 : index
    %c0_84 = arith.constant 0 : index
    %c0_85 = arith.constant 0 : index
    %296 = vector.load %arg11[%c0_83, %c0_84, %c0_85] : memref<1x128x64xbf16, #tpu.memory_space<vmem>>, vector<1x128x64xbf16>
    %297 = vector.shape_cast %296 : vector<1x128x64xbf16> to vector<128x64xbf16>
    %cst_86 = arith.constant dense<0.000000e+00> : vector<48x64xf32>
    %298 = tpu.matmul %295, %297, %cst_86 {dimension_numbers = #tpu.dot_dimension_numbers<[1], [0], [0], [1], [0, 0, 1, 1], [], []>} : vector<48x128xbf16>, vector<128x64xbf16>, vector<48x64xf32> -> vector<48x64xf32>
    %c0_87 = arith.constant 0 : index
    %c0_88 = arith.constant 0 : index
    %c0_89 = arith.constant 0 : index
    %299 = vector.load %arg12[%c0_87, %c0_88, %c0_89] : memref<1x1x64xf32, #tpu.memory_space<vmem>>, vector<1x1x64xf32>
    %300 = vector.shape_cast %299 : vector<1x1x64xf32> to vector<1x64xf32>
    %301 = vector.broadcast %300 : vector<1x64xf32> to vector<48x64xf32>
    %302 = arith.addf %298, %301 : vector<48x64xf32>
    %303 = arith.addf %252, %302 : vector<48x64xf32>
    %c0_90 = arith.constant 0 : index
    %c0_91 = arith.constant 0 : index
    %304 = vector.load %arg14[%c0_90, %c0_91] : memref<48x64xf32, #tpu.memory_space<vmem>>, vector<48x64xf32>
    tpu.vector_store %arg14[%c0_90, %c0_91], %303 {strides = array<i32>} : memref<48x64xf32, #tpu.memory_space<vmem>>, vector<48x64xf32>,
    %c0_92 = arith.constant 0 : index
    %c0_93 = arith.constant 0 : index
    %305 = vector.load %arg13[%c0_92, %c0_93] : memref<2x64xf32, #tpu.memory_space<vmem>>, vector<2x64xf32>
    %306 = vector.extract_strided_slice %303 {offsets = [0, 0], sizes = [1, 64], strides = [1, 1]} : vector<48x64xf32> to vector<1x64xf32>
    %307 = vector.extract_strided_slice %303 {offsets = [24, 0], sizes = [1, 64], strides = [1, 1]} : vector<48x64xf32> to vector<1x64xf32>
    %308 = tpu.concatenate %306, %307 in 0 : vector<1x64xf32>, vector<1x64xf32> -> vector<2x64xf32>
    %309 = vector.extract_strided_slice %305 {offsets = [0, 0], sizes = [1, 64], strides = [1, 1]} : vector<2x64xf32> to vector<1x64xf32>
    %310 = vector.extract_strided_slice %305 {offsets = [1, 0], sizes = [1, 64], strides = [1, 1]} : vector<2x64xf32> to vector<1x64xf32>
    %cst_94 = arith.constant dense<0.000000e+00> : vector<2xf32>
    %311 = vector.multi_reduction <add>, %308, %cst_94 [1] : vector<2x64xf32> to vector<2xf32>
    %312 = vector.shape_cast %311 : vector<2xf32> to vector<2x1xf32>
    %cst_95 = arith.constant 6.400000e+01 : f32
    %313 = vector.broadcast %cst_95 : f32 to vector<2x1xf32>
    %314 = arith.divf %312, %313 : vector<2x1xf32>
    %315 = vector.broadcast %314 : vector<2x1xf32> to vector<2x64xf32>
    %316 = arith.subf %308, %315 : vector<2x64xf32>
    %317 = arith.mulf %316, %316 : vector<2x64xf32>
    %cst_96 = arith.constant dense<0.000000e+00> : vector<2xf32>
    %318 = vector.multi_reduction <add>, %317, %cst_96 [1] : vector<2x64xf32> to vector<2xf32>
    %319 = vector.shape_cast %318 : vector<2xf32> to vector<2x1xf32>
    %cst_97 = arith.constant 6.400000e+01 : f32
    %320 = vector.broadcast %cst_97 : f32 to vector<2x1xf32>
    %321 = arith.divf %319, %320 : vector<2x1xf32>
    %322 = vector.broadcast %314 : vector<2x1xf32> to vector<2x64xf32>
    %323 = arith.subf %308, %322 : vector<2x64xf32>
    %cst_98 = arith.constant 9.99999974E-6 : f32
    %324 = vector.broadcast %cst_98 : f32 to vector<2x1xf32>
    %325 = arith.addf %321, %324 : vector<2x1xf32>
    %326 = math.rsqrt %325 : vector<2x1xf32>
    %327 = vector.broadcast %326 : vector<2x1xf32> to vector<2x64xf32>
    %328 = arith.mulf %323, %327 : vector<2x64xf32>
    %329 = vector.broadcast %309 : vector<1x64xf32> to vector<2x64xf32>
    %330 = arith.mulf %328, %329 : vector<2x64xf32>
    %331 = vector.broadcast %310 : vector<1x64xf32> to vector<2x64xf32>
    %332 = arith.addf %330, %331 : vector<2x64xf32>
    %c0_99 = arith.constant 0 : index
    %c0_100 = arith.constant 0 : index
    %333 = vector.load %arg15[%c0_99, %c0_100] : memref<2x64xf32, #tpu.memory_space<vmem>>, vector<2x64xf32>
    tpu.vector_store %arg15[%c0_99, %c0_100], %332 {strides = array<i32>} : memref<2x64xf32, #tpu.memory_space<vmem>>, vector<2x64xf32>,
    return
  }
  func.func @transform_0(%arg0: i32) -> (i32, i32) {
    %c0_i32 = arith.constant 0 : i32
    %c0_i32_0 = arith.constant 0 : i32
    %c0_i32_1 = arith.constant 0 : i32
    return %c0_i32, %c0_i32_0 : i32, i32
  }
  func.func @transform_1(%arg0: i32) -> (i32, i32) {
    %c0_i32 = arith.constant 0 : i32
    %c0_i32_0 = arith.constant 0 : i32
    %c0_i32_1 = arith.constant 0 : i32
    return %c0_i32, %c0_i32_0 : i32, i32
  }
  func.func @transform_2(%arg0: i32) -> (i32, i32, i32) {
    %c0_i32 = arith.constant 0 : i32
    %c0_i32_0 = arith.constant 0 : i32
    %c0_i32_1 = arith.constant 0 : i32
    return %arg0, %c0_i32, %c0_i32_0 : i32, i32, i32
  }
  func.func @transform_3(%arg0: i32) -> (i32, i32, i32) {
    %c0_i32 = arith.constant 0 : i32
    %c0_i32_0 = arith.constant 0 : i32
    %c0_i32_1 = arith.constant 0 : i32
    return %arg0, %c0_i32, %c0_i32_0 : i32, i32, i32
  }
  func.func @transform_4(%arg0: i32) -> (i32, i32, i32) {
    %c0_i32 = arith.constant 0 : i32
    %c0_i32_0 = arith.constant 0 : i32
    %c0_i32_1 = arith.constant 0 : i32
    return %arg0, %c0_i32, %c0_i32_0 : i32, i32, i32
  }
  func.func @transform_5(%arg0: i32) -> (i32, i32, i32) {
    %c0_i32 = arith.constant 0 : i32
    %c0_i32_0 = arith.constant 0 : i32
    %c0_i32_1 = arith.constant 0 : i32
    return %arg0, %c0_i32, %c0_i32_0 : i32, i32, i32
  }
  func.func @transform_6(%arg0: i32) -> (i32, i32, i32) {
    %c0_i32 = arith.constant 0 : i32
    %c0_i32_0 = arith.constant 0 : i32
    %c0_i32_1 = arith.constant 0 : i32
    return %arg0, %c0_i32, %c0_i32_0 : i32, i32, i32
  }
  func.func @transform_7(%arg0: i32) -> (i32, i32, i32) {
    %c0_i32 = arith.constant 0 : i32
    %c0_i32_0 = arith.constant 0 : i32
    %c0_i32_1 = arith.constant 0 : i32
    return %arg0, %c0_i32, %c0_i32_0 : i32, i32, i32
  }
  func.func @transform_8(%arg0: i32) -> (i32, i32, i32) {
    %c0_i32 = arith.constant 0 : i32
    %c0_i32_0 = arith.constant 0 : i32
    %c0_i32_1 = arith.constant 0 : i32
    return %arg0, %c0_i32, %c0_i32_0 : i32, i32, i32
  }
  func.func @transform_9(%arg0: i32) -> (i32, i32, i32) {
    %c0_i32 = arith.constant 0 : i32
    %c0_i32_0 = arith.constant 0 : i32
    %c0_i32_1 = arith.constant 0 : i32
    return %arg0, %c0_i32, %c0_i32_0 : i32, i32, i32
  }
  func.func @transform_10(%arg0: i32) -> (i32, i32, i32) {
    %c0_i32 = arith.constant 0 : i32
    %c0_i32_0 = arith.constant 0 : i32
    %c0_i32_1 = arith.constant 0 : i32
    return %arg0, %c0_i32, %c0_i32_0 : i32, i32, i32
  }
  func.func @transform_11(%arg0: i32) -> (i32, i32, i32) {
    %c0_i32 = arith.constant 0 : i32
    %c0_i32_0 = arith.constant 0 : i32
    %c0_i32_1 = arith.constant 0 : i32
    return %arg0, %c0_i32, %c0_i32_0 : i32, i32, i32
  }
  func.func @transform_12(%arg0: i32) -> (i32, i32) {
    %c0_i32 = arith.constant 0 : i32
    %c0_i32_0 = arith.constant 0 : i32
    %c0_i32_1 = arith.constant 0 : i32
    return %c0_i32, %c0_i32_0 : i32, i32
  }
  func.func @transform_13(%arg0: i32) -> (i32, i32) {
    %c0_i32 = arith.constant 0 : i32
    %c0_i32_0 = arith.constant 0 : i32
    %c0_i32_1 = arith.constant 0 : i32
    return %c0_i32, %c0_i32_0 : i32, i32
  }
  func.func @transform_14(%arg0: i32) -> (i32, i32) {
    %c0_i32 = arith.constant 0 : i32
    %c0_i32_0 = arith.constant 0 : i32
    %c0_i32_1 = arith.constant 0 : i32
    return %c0_i32, %c0_i32_0 : i32, i32
  }
}

</mosaic_0001>

<bundles_post_ra>
// kernel: adapt_clip_vision_transformer_forward.2
= control target key start
LH: loop header
LB: loop body
LE: loop exit
PB: predicated region body
PF: predicated region fallthrough
CT: control target
= control target key end

     0   :  { %v433_v0 = vmov 0   ;;  %vm139_vm0 = vcmask 523264   ;;  %vm207_vm1 = vcmask 1046528   ;;  %vm219_vm2 = vcmask 1040384   ;;  %s634_s1 = inlined_call_operand.vmem [shape: bf16[192,64], index: 1, kind: input, shape index: {}]   ;;  %s635_s0 = inlined_call_operand.vmem [shape: bf16[32,192], index: 0, kind: input, shape index: {}]   ;;  %s636_s3 = inlined_call_operand.vmem [shape: f32[48,64], index: 3, kind: input, shape index: {}]   ;;  %s637_s2 = inlined_call_operand.vmem [shape: f32[1,64], index: 2, kind: input, shape index: {}]   ;;  %s638_s4 = inlined_call_operand.vmem [shape: f32[2,64], index: 4, kind: input, shape index: {}]   ;;  %s639_s5 = inlined_call_operand.vmem [shape: f32[48,64], index: 5, kind: output, shape index: {}]  }
   0x1   :  { %146 = vmatprep.subr.bf16.mxu0 %v433_v0  ;;  %378 = vmatprep.subr.bf16.mxu1 %v433_v0  ;;  %v403_v1 = vld [vmem:[%s634_s1] sm:$0xff]   ;;  %v404_v2 = vld [vmem:[%s634_s1 + $0x8] sm:$0xff]   ;;  %v405_v3 = vld [vmem:[%s634_s1 + $0x10] sm:$0xff]  }
   0x2   :  { %147 = vmatpush1.bf16.msra.mxu0 %v403_v1  ;;  %390 = vmatpush1.bf16.msra.mxu1 %v403_v1  ;;  %v406_v4 = vld [vmem:[%s634_s1 + $0x18] sm:$0xff]   ;;  %v417_v5 = vld [vmem:[%s635_s0 + $0x4] ss:$8 sps:$4 sm:$0xff]   ;;  %v409_v9 = vld [vmem:[%s634_s1 + $0x30] sm:$0xff]  }
   0x3   :  { %148 = vmatprep.subr.bf16.mxu0 %v433_v0  ;;  %379 = vmatprep.subr.bf16.mxu1 %v433_v0  ;;  %v407_v6 = vld [vmem:[%s634_s1 + $0x20] sm:$0xff]   ;;  %v420_v7 = vld [vmem:[%s635_s0 + $0x14] ss:$8 sps:$4 sm:$0xff]   ;;  %v408_v8 = vld [vmem:[%s634_s1 + $0x28] sm:$0xff]  }
   0x4   :  { %376 = vmatprep.mubr.msk.bf16.mxu0 %vm139_vm0, %v417_v5  ;;  %377 = vmatprep.mubr.msk.bf16.mxu1 %vm139_vm0, %v420_v7  ;;  %v410_v10 = vld [vmem:[%s634_s1 + $0x38] sm:$0xff]   ;;  %v411_v11 = vld [vmem:[%s634_s1 + $0x40] sm:$0xff]   ;;  %v412_v12 = vld [vmem:[%s634_s1 + $0x48] sm:$0xff]  }
   0x5   :  { %v413_v13 = vld [vmem:[%s634_s1 + $0x50] sm:$0xff]   ;;  %v414_v14 = vld [vmem:[%s634_s1 + $0x58] sm:$0xff]   ;;  %v415_v15 = vld [vmem:[%s635_s0] ss:$8 sps:$4 sm:$0xff]  }
   0x6   :  { %149 = vmatpush1.bf16.msra.mxu0 %v404_v2  ;;  %391 = vmatpush1.bf16.msra.mxu1 %v404_v2  ;;  %v418_v16 = vld [vmem:[%s635_s0 + $0x10] ss:$8 sps:$4 sm:$0xff]   ;;  %v196_v17 = vld [vmem:[%s636_s3] sm:$0xff]  ;;  %v197_v18 = vld [vmem:[%s636_s3 + $0x8] sm:$0xff] }
   0x7   :  { %150 = vmatprep.subr.bf16.mxu0 %v433_v0  ;;  %380 = vmatprep.subr.bf16.mxu1 %v433_v0  ;;  %v199_v19 = vld [vmem:[%s636_s3 + $0x18] sm:$0xff]  ;;  %v200_v20 = vld [vmem:[%s636_s3 + $0x20] sm:$0xff]  ;;  %v198_v21 = vld [vmem:[%s636_s3 + $0x10] sm:$0xff]  ;;  %v208_v23 = vrot.slane %v196_v17, 1  ;;  %v209_v24 = vrot.slane %v197_v18, 1 }
   0x8   :  { %v201_v22 = vld [vmem:[%s636_s3 + $0x28] sm:$0xff]  ;;  %v289_v25 = vrot.slane %v199_v19, 1  ;;  %v290_v26 = vrot.slane %v200_v20, 1  ;;  %v211_v27 = vrot.slane %v198_v21, 1  ;;  %v195_v31 = vld [vmem:[%s637_s2] sm:$0x1] }
   0x9   :  { %v292_v28 = vrot.slane %v201_v22, 1  ;;  %v210_v29 = vsel %vm207_vm1, %v208_v23, %v209_v24  ;;  %v285_v40 = vadd.f32 %v199_v19, %v195_v31  ;;  %v203_v41 = vadd.f32 %v196_v17, %v195_v31 }
   0xa   :  { %151 = vmatpush1.bf16.msra.mxu0 %v405_v3  ;;  %392 = vmatpush1.bf16.msra.mxu1 %v405_v3  ;;  %v291_v30 = vsel %vm207_vm1, %v289_v25, %v290_v26  ;;  %v212_v34 = vsel %vm207_vm1, %v209_v24, %v211_v27 }
   0xb   :  { %152 = vmatprep.subr.bf16.mxu0 %v433_v0  ;;  %381 = vmatprep.subr.bf16.mxu1 %v433_v0  ;;  %v293_v35 = vsel %vm207_vm1, %v290_v26, %v292_v28 }
   0xe   :  { %153 = vmatpush1.bf16.msra.mxu0 %v406_v4  ;;  %393 = vmatpush1.bf16.msra.mxu1 %v406_v4 }
   0xf   :  { %154 = vmatprep.subr.bf16.mxu0 %v433_v0  ;;  %382 = vmatprep.subr.bf16.mxu1 %v433_v0 }
  0x12   :  { %155 = vmatpush1.bf16.msra.mxu0 %v407_v6  ;;  %394 = vmatpush1.bf16.msra.mxu1 %v407_v6 }
  0x13   :  { %156 = vmatprep.subr.bf16.mxu0 %v433_v0  ;;  %383 = vmatprep.subr.bf16.mxu1 %v433_v0 }
  0x16   :  { %157 = vmatpush1.bf16.msra.mxu0 %v408_v8  ;;  %395 = vmatpush1.bf16.msra.mxu1 %v408_v8 }
  0x17   :  { %158 = vmatprep.subr.bf16.mxu0 %v433_v0  ;;  %384 = vmatprep.subr.bf16.mxu1 %v433_v0 }
  0x1a   :  { %159 = vmatpush1.bf16.msra.mxu0 %v409_v9  ;;  %396 = vmatpush1.bf16.msra.mxu1 %v409_v9 }
  0x1b   :  { %160 = vmatprep.subr.bf16.mxu0 %v433_v0  ;;  %385 = vmatprep.subr.bf16.mxu1 %v433_v0 }
  0x1e   :  { %161 = vmatpush1.bf16.msra.mxu0 %v410_v10  ;;  %397 = vmatpush1.bf16.msra.mxu1 %v410_v10 }
  0x1f   :  { %162 = vmatprep.subr.bf16.mxu0 %v433_v0  ;;  %386 = vmatprep.subr.bf16.mxu1 %v433_v0 }
  0x22   :  { %163 = vmatpush1.bf16.msra.mxu0 %v411_v11  ;;  %398 = vmatpush1.bf16.msra.mxu1 %v411_v11 }
  0x23   :  { %164 = vmatprep.subr.bf16.mxu0 %v433_v0  ;;  %387 = vmatprep.subr.bf16.mxu1 %v433_v0 }
  0x26   :  { %165 = vmatpush1.bf16.msra.mxu0 %v412_v12  ;;  %399 = vmatpush1.bf16.msra.mxu1 %v412_v12 }
  0x27   :  { %166 = vmatprep.subr.bf16.mxu0 %v433_v0  ;;  %388 = vmatprep.subr.bf16.mxu1 %v433_v0 }
  0x2a   :  { %167 = vmatpush1.bf16.msra.mxu0 %v413_v13  ;;  %400 = vmatpush1.bf16.msra.mxu1 %v413_v13 }
  0x2b   :  { %168 = vmatprep.subr.bf16.mxu0 %v433_v0  ;;  %389 = vmatprep.subr.bf16.mxu1 %v433_v0 }
  0x2e   :  { %169 = vmatpush1.bf16.msra.mxu0 %v414_v14  ;;  %401 = vmatpush1.bf16.msra.mxu1 %v414_v14 }
  0x31   :  { %179 = vmatmul.mubr.bf16.vlgmr.msra.gmra.mrb[0].mxu0 %v415_v15  ;;  %187 = vmatmul.mubr.bf16.vlgmr.msra.gmra.mrb[0].mxu1 %v418_v16 }
 0x104   :  { %v180_v32 = vpop.f32.mrb[0].mxu0  ;;  %v188_v33 = vpop.f32.mrb[0].mxu1 }
 0x105   :  { %v215_v36 = vadd.f32 %v210_v29, %v180_v32  ;;  %v296_v37 = vadd.f32 %v291_v30, %v188_v33  ;;  %v182_v38 = vpop.f32.mrb[1].mxu0  ;;  %v190_v39 = vpop.f32.mrb[1].mxu1 }
 0x106   :  { %v183_v42 = vpop.f32.mrb[2].mxu0  ;;  %v191_v43 = vpop.f32.mrb[2].mxu1 }
 0x107   :  { %v220_v44 = vrot.slane %v215_v36, 7  ;;  %v300_v45 = vrot.slane %v296_v37, 7  ;;  %v216_v46 = vadd.f32 %v212_v34, %v183_v42  ;;  %v297_v47 = vadd.f32 %v293_v35, %v191_v43  ;;  %v185_v48 = vpop.f32.mrb[3].mxu0  ;;  %v193_v49 = vpop.f32.mrb[3].mxu1 }
 0x108   :  { %v268_v34 = vlaneseq  ;;  %v202_v49 = vld [vmem:[%s638_s4] sm:$0x3] }
 0x109   :  { %v221_v50 = vrot.slane %v216_v46, 7  ;;  %v301_v51 = vrot.slane %v297_v47, 7  ;;  %v306_v52 = vsel %vm219_vm2, %v285_v40, %v300_v45  ;;  %v226_v53 = vsel %vm219_vm2, %v203_v41, %v220_v44 }
 0x10a   :  { %v308_v54 = vsel %vm139_vm0, %v306_v52, 0.0  ;;  %v228_v55 = vsel %vm139_vm0, %v226_v53, 0.0  ;;  %v269_v41 = vshrl.u32 %v268_v34, 7 }
 0x10b   :  { %309 = vadd.xlane.f32.xlu1 %v308_v54  ;;  %229 = vadd.xlane.f32.xlu0 %v228_v55  ;;  %v227_v56 = vsel %vm219_vm2, %v221_v50, 0.0  ;;  %v222_v57 = vsel %vm219_vm2, %v220_v44, %v221_v50  ;;  %v302_v58 = vsel %vm219_vm2, %v300_v45, %v301_v51  ;;  %v307_v61 = vsel %vm219_vm2, %v301_v51, 0.0 }
 0x10c   :  { %v234_v59 = vsel %vm139_vm0, %v227_v56, 0.0  ;;  %v231_v60 = vsel %vm139_vm0, %v222_v57, 0.0  ;;  %v314_v62 = vsel %vm139_vm0, %v307_v61, 0.0  ;;  %v311_v63 = vsel %vm139_vm0, %v302_v58, 0.0 }
 0x10d   :  { %v270_v48 = vsub.s32 0, %v269_v41 }
 0x10f   :  { %235 = vadd.xlane.f32.xlu1 %v234_v59  ;;  %232 = vadd.xlane.f32.xlu0 %v231_v60 }
 0x113   :  { %315 = vadd.xlane.f32.xlu1 %v314_v62  ;;  %312 = vadd.xlane.f32.xlu0 %v311_v63 }
 0x198   :  { %v310_v0 = vpop.xlane.xlu1 %309  ;;  %v230_v1 = vpop.xlane.xlu0 %229 }
 0x199   :  { %v317_v2 = vmul.f32 0.015625, %v310_v0  ;;  %v238_v3 = vmul.f32 0.015625, %v230_v1 }
 0x19b   :  { %v571_v4 = vsub.f32 %v306_v52, %v317_v2  ;;  %v573_v5 = vsub.f32 %v226_v53, %v238_v3  ;;  %v277_v52 = vsub.s32 1, %v269_v41  ;;  %v271_v53 = vrot.slane %v202_v49, %v270_v48 }
 0x19c   :  { %v236_v6 = vpop.xlane.xlu1 %235  ;;  %v233_v7 = vpop.xlane.xlu0 %232 }
 0x19d   :  { %v240_v8 = vmul.f32 0.015625, %v236_v6  ;;  %v239_v9 = vmul.f32 0.015625, %v233_v7  ;;  %v323_v10 = vmul.f32 %v571_v4, %v571_v4  ;;  %v244_v11 = vmul.f32 %v573_v5, %v573_v5 }
 0x19f   :  { %v579_v12 = vsub.f32 %v227_v56, %v240_v8  ;;  %v581_v13 = vsub.f32 %v222_v57, %v239_v9  ;;  %v326_v14 = vsel %vm139_vm0, %v323_v10, 0.0  ;;  %v247_v15 = vsel %vm139_vm0, %v244_v11, 0.0 }
 0x1a0   :  { %327 = vadd.xlane.f32.xlu1 %v326_v14  ;;  %v316_v16 = vpop.xlane.xlu1 %315  ;;  %248 = vadd.xlane.f32.xlu0 %v247_v15  ;;  %v313_v17 = vpop.xlane.xlu0 %312  ;;  %v278_v56 = vrot.slane %v202_v49, %v277_v52 }
 0x1a1   :  { %v319_v18 = vmul.f32 0.015625, %v316_v16  ;;  %v318_v19 = vmul.f32 0.015625, %v313_v17  ;;  %v246_v20 = vmul.f32 %v579_v12, %v579_v12  ;;  %v245_v21 = vmul.f32 %v581_v13, %v581_v13 }
 0x1a3   :  { %v589_v22 = vsub.f32 %v307_v61, %v319_v18  ;;  %v591_v23 = vsub.f32 %v302_v58, %v318_v19  ;;  %v253_v24 = vsel %vm139_vm0, %v246_v20, 0.0  ;;  %v250_v25 = vsel %vm139_vm0, %v245_v21, 0.0 }
 0x1a4   :  { %254 = vadd.xlane.f32.xlu0 %v253_v24  ;;  %251 = vadd.xlane.f32.xlu1 %v250_v25 }
 0x1a5   :  { %v325_v26 = vmul.f32 %v589_v22, %v589_v22  ;;  %v324_v27 = vmul.f32 %v591_v23, %v591_v23 }
 0x1a7   :  { %v332_v28 = vsel %vm139_vm0, %v325_v26, 0.0  ;;  %v329_v29 = vsel %vm139_vm0, %v324_v27, 0.0 }
 0x1a8   :  { %333 = vadd.xlane.f32.xlu1 %v332_v28  ;;  %330 = vadd.xlane.f32.xlu0 %v329_v29 }
 0x22d   :  { %v328_v30 = vpop.xlane.xlu1 %327  ;;  %v249_v31 = vpop.xlane.xlu0 %248 }
 0x22e   :  { %v335_v32 = vmul.f32 0.015625, %v328_v30  ;;  %v256_v33 = vmul.f32 0.015625, %v249_v31 }
 0x230   :  { %v338_v35 = vadd.f32 1e-05, %v335_v32  ;;  %v259_v36 = vadd.f32 1e-05, %v256_v33 }
 0x231   :  { %v252_v37 = vpop.xlane.xlu1 %251  ;;  %v255_v38 = vpop.xlane.xlu0 %254 }
 0x232   :  { %421 = vrsqrt.f32 %v338_v35  ;;  %v257_v39 = vmul.f32 0.015625, %v252_v37  ;;  %v258_v40 = vmul.f32 0.015625, %v255_v38 }
 0x233   :  { %423 = vrsqrt.f32 %v259_v36 }
 0x234   :  { %v260_v42 = vadd.f32 1e-05, %v257_v39  ;;  %v261_v43 = vadd.f32 1e-05, %v258_v40 }
 0x235   :  { %v334_v44 = vpop.xlane.xlu1 %333  ;;  %v331_v45 = vpop.xlane.xlu0 %330 }
 0x236   :  { %425 = vrsqrt.f32 %v260_v42  ;;  %v337_v46 = vmul.f32 0.015625, %v334_v44  ;;  %v336_v47 = vmul.f32 0.015625, %v331_v45 }
 0x237   :  { %427 = vrsqrt.f32 %v261_v43 }
 0x238   :  { %v340_v50 = vadd.f32 1e-05, %v337_v46  ;;  %v339_v51 = vadd.f32 1e-05, %v336_v47 }
 0x23a   :  { %429 = vrsqrt.f32 %v340_v50 }
 0x23b   :  { %431 = vrsqrt.f32 %v339_v51 }
 0x23c   :  { %v422_v54 = vpop.eup %421 }
 0x23d   :  { %v424_v55 = vpop.eup %423  ;;  %v344_v57 = vmul.f32 %v422_v54, %v571_v4 }
 0x23e   :  { %v265_v58 = vmul.f32 %v424_v55, %v573_v5 }
 0x23f   :  { %v347_v59 = vmul.f32 %v344_v57, %v271_v53 }
 0x240   :  { %v426_v60 = vpop.eup %425  ;;  %v272_v61 = vmul.f32 %v271_v53, %v265_v58 }
 0x241   :  { %v428_v62 = vpop.eup %427  ;;  %v350_v63 = vadd.f32 %v347_v59, %v278_v56  ;;  %v266_v0 = vmul.f32 %v426_v60, %v581_v13 }
 0x242   :  { %v279_v1 = vadd.f32 %v278_v56, %v272_v61  ;;  %v267_v2 = vmul.f32 %v428_v62, %v579_v12 }
 0x243   :  { %353 = vst.msk [vmem:[%s639_s5 + $0x18] sm:$0xff] %vm139_vm0, %v350_v63  ;;  %v273_v3 = vmul.f32 %v271_v53, %v266_v0 }
 0x244   :  { %v430_v6 = vpop.eup %429  ;;  %282 = vst.msk [vmem:[%s639_s5] sm:$0xff] %vm139_vm0, %v279_v1  ;;  %v274_v4 = vmul.f32 %v271_v53, %v267_v2 }
 0x245   :  { %v432_v5 = vpop.eup %431  ;;  %v280_v7 = vadd.f32 %v278_v56, %v273_v3  ;;  %v346_v8 = vmul.f32 %v430_v6, %v589_v22 }
 0x246   :  { %v281_v9 = vadd.f32 %v278_v56, %v274_v4  ;;  %v345_v10 = vmul.f32 %v432_v5, %v591_v23 }
 0x247   :  { %283 = vst.msk [vmem:[%s639_s5 + $0x8] sm:$0xff] %vm139_vm0, %v280_v7  ;;  %v349_v11 = vmul.f32 %v346_v8, %v271_v53 }
 0x248   :  { %284 = vst.msk [vmem:[%s639_s5 + $0x10] sm:$0xff] %vm139_vm0, %v281_v9  ;;  %v348_v12 = vmul.f32 %v345_v10, %v271_v53 }
 0x249   :  { %v352_v13 = vadd.f32 %v349_v11, %v278_v56 }
 0x24a   :  { %v351_v14 = vadd.f32 %v348_v12, %v278_v56 }
 0x24b   :  { %355 = vst.msk [vmem:[%s639_s5 + $0x28] sm:$0xff] %vm139_vm0, %v352_v13 }
 0x24c   :  { %354 = vst.msk [vmem:[%s639_s5 + $0x20] sm:$0xff] %vm139_vm0, %v351_v14 }

// kernel: adapt_clip_vision_transformer_forward.3
= control target key start
LH: loop header
LB: loop body
LE: loop exit
PB: predicated region body
PF: predicated region fallthrough
CT: control target
= control target key end

     0   :  { %s4648_s0 = inlined_call_operand.vmem [shape: f32[48,64], index: 0, kind: input, shape index: {}]   ;;  %s4649_s1 = inlined_call_operand.vmem [shape: f32[2,24], index: 1, kind: input, shape index: {}]   ;;  %s4650_s2 = inlined_call_operand.vmem [shape: f32[2,2,64], index: 2, kind: input, shape index: {}]   ;;  %s4651_s3 = inlined_call_operand.vmem [shape: bf16[2,64,192], index: 3, kind: input, shape index: {}]   ;;  %s4652_s4 = inlined_call_operand.vmem [shape: f32[2,1,192], index: 4, kind: input, shape index: {}]   ;;  %s4653_s5 = inlined_call_operand.vmem [shape: bf16[2,64,64], index: 5, kind: input, shape index: {}]   ;;  %s4654_s6 = inlined_call_operand.vmem [shape: f32[2,1,64], index: 6, kind: input, shape index: {}]   ;;  %s4655_s7 = inlined_call_operand.vmem [shape: f32[2,2,64], index: 7, kind: input, shape index: {}]   ;;  %s4656_s8 = inlined_call_operand.vmem [shape: bf16[2,64,128], index: 8, kind: input, shape index: {}]   ;;  %s4657_s9 = inlined_call_operand.vmem [shape: f32[2,1,128], index: 9, kind: input, shape index: {}]   ;;  %s4658_s10 = inlined_call_operand.vmem [shape: bf16[2,128,64], index: 10, kind: input, shape index: {}]   ;;  %s4659_s11 = inlined_call_operand.vmem [shape: f32[2,1,64], index: 11, kind: input, shape index: {}]   ;;  %s4660_s12 = inlined_call_operand.vmem [shape: f32[2,64], index: 12, kind: input, shape index: {}]   ;;  %s4661_s13 = inlined_call_operand.vmem [shape: f32[48,64], index: 13, kind: output, shape index: {0}]   ;;  %s4662_s14 = inlined_call_operand.hbm [shape: f32[2,64], index: 14, kind: output, shape index: {1}]  }
   0x1   :  { %4665 = sst [smem:[#allocation6_spill]] %s4649_s1 }
   0x2   :  { %4666 = sst [smem:[#allocation7_spill]] %s4650_s2 }
   0x3   :  { %4667 = sst [smem:[#allocation8_spill]] %s4651_s3 }
   0x4   :  { %4668 = sst [smem:[#allocation9_spill]] %s4653_s5 }
   0x5   :  { %4669 = sst [smem:[#allocation10_spill]] %s4660_s12 }
   0x6   :  { %4670 = sst [smem:[#allocation11_spill]] %s4662_s14 }
   0x7   :  { %20 = vsyncpa [#allocation3], 0  ;;  %s3788_s29 = smov 0  }
   0x8 LB: > { %4671 = sst [smem:[#allocation5_spill]] %s3700_s29  ;;  %s3794_s30 = sadd.s32 4294967295, %s3700_s29   ;;  %s3700_s29 = sphi %s3788_s29, %s26_s29  }
   0x9   : > { %p3016_p0 = scmp.ge.s32.totalorder %s3700_s29, 1  ;;  %p487_p1 = scmp.lt.s32.totalorder %s3700_s29, 3 }
   0xb   : > { %p488_p2 = pnand %p3016_p0, %p487_p1 }
   0xc   : > { %p564_p3 = scmp.lt.s32.totalorder (!%p488_p2), %s3794_s30, 1  ;;  %s4673_s3 = sld [smem:[#allocation8_spill]] (!%p488_p2) }
   0xd   : > { %491 = sbr.rel (%p488_p2) target bundleno = 6256 (0x1870), region = 72  ;;  %s4674_s5 = sld [smem:[#allocation9_spill]] (!%p488_p2) }
   0xe   : > { %p3028_p4 = scmp.ne.s32.totalorder (!%p488_p2), %s3794_s30, 0 }
  0x14   : > { %s3800_s15 = scalar_select %p564_p3, %s3794_s30, 1 }
  0x15   : > { %609 = sbr.rel (%p3028_p4) target bundleno = 28 (0x1c), region = 76  ;;  %v610_v0 = vld [vmem:[%s4648_s0] sm:$0xff] (!%p3028_p4)  ;;  %vm616_vm0 = vcmask (!%p3028_p4), 523264   ;;  %v611_v1 = vld [vmem:[%s4648_s0 + $0x8] sm:$0xff] (!%p3028_p4)  ;;  %v612_v2 = vld [vmem:[%s4648_s0 + $0x10] sm:$0xff] (!%p3028_p4) }
  0x16   : > { %s3803_s16 = sshll.u32 %s3800_s15, 1  ;;  %s3101_s17 = sshll.u32 %s3800_s15, 6  ;;  %617 = vst.msk [vmem:[%s4661_s13] sm:$0xff] (!%p3028_p4), %vm616_vm0, %v610_v0  ;;  %618 = vst.msk [vmem:[%s4661_s13 + $0x8] sm:$0xff] (!%p3028_p4), %vm616_vm0, %v611_v1  ;;  %v613_v3 = vld [vmem:[%s4648_s0 + $0x18] sm:$0xff] (!%p3028_p4)  ;;  %v614_v4 = vld [vmem:[%s4648_s0 + $0x20] sm:$0xff] (!%p3028_p4) }
  0x17   : > { %s3813_s23 = scalar_lea.vmem %s4673_s3, %s3101_s17  ;;  %s3102_s27 = sshll.u32 %s3800_s15, 5  ;;  %619 = vst.msk [vmem:[%s4661_s13 + $0x10] sm:$0xff] (!%p3028_p4), %vm616_vm0, %v612_v2  ;;  %v615_v5 = vld [vmem:[%s4648_s0 + $0x28] sm:$0xff] (!%p3028_p4)  ;;  %620 = vst.msk [vmem:[%s4661_s13 + $0x18] sm:$0xff] (!%p3028_p4), %vm616_vm0, %v613_v3 }
  0x18   : > { %s3823_s14 = scalar_lea.vmem %s4674_s5, %s3102_s27  ;;  %s588_s21 = scalar_lea.vmem %s4655_s7, %s3803_s16  ;;  %621 = vst.msk [vmem:[%s4661_s13 + $0x20] sm:$0xff] (!%p3028_p4), %vm616_vm0, %v614_v4  ;;  %622 = vst.msk [vmem:[%s4661_s13 + $0x28] sm:$0xff] (!%p3028_p4), %vm616_vm0, %v615_v5 }
  0x19   : > { %s3836_s2 = scalar_lea.vmem %s4656_s8, %s3102_s27  ;;  %s596_s26 = scalar_lea.vmem %s4657_s9, %s3800_s15 }
  0x1a   : > { %s3845_s5 = scalar_lea.vmem %s4658_s10, %s3101_s17  ;;  %s604_s18 = scalar_lea.vmem %s4659_s11, %s3800_s15 }
  0x1c PF: > { %vm631_vm1 = vcmask 523264   ;;  %v3484_v38 = vld [vmem:[%s3813_s23 + $0x4] ss:$8 sps:$4 sm:$0xff]   ;;  %v3486_v39 = vld [vmem:[%s3813_s23] ss:$8 sps:$4 sm:$0xff]   ;;  %v3702_v46 = vmov 0   ;;  %v711_v52 = vlaneseq  ;;  %s4677_s24 = scalar_lea.vmem %s4652_s4, %s3803_s16  ;;  %s4679_s22 = scalar_lea.vmem %s4654_s6, %s3800_s15 }
  0x1d   : > { %v623_v6 = vld [vmem:[%s4661_s13] sm:$0xff]  ;;  %v624_v8 = vld [vmem:[%s4661_s13 + $0x8] sm:$0xff]  ;;  %803 = vmatprep.subr.bf16.mxu0 %v3484_v38  ;;  %v3487_v40 = vld [vmem:[%s3813_s23 + $0x14] ss:$8 sps:$4 sm:$0xff]   ;;  %835 = vmatprep.mubr.bf16.mxu0 %v3702_v46  ;;  %s4675_s3 = sld [smem:[#allocation7_spill]]  ;;  %vm883_vm2 = vcmask 130048  }
  0x1e   : > { %v625_v7 = vld [vmem:[%s4661_s13 + $0x10] sm:$0xff]  ;;  %v632_v9 = vsel %vm631_vm1, %v623_v6, 0.0  ;;  %v626_v11 = vld [vmem:[%s4661_s13 + $0x18] sm:$0xff]  ;;  %v635_v12 = vsel %vm631_vm1, %v624_v8, 0.0  ;;  %804 = vmatpush1.bf16.msra.mxu0 %v3486_v39  ;;  %v3490_v42 = vld [vmem:[%s3813_s23 + $0x24] ss:$8 sps:$4 sm:$0xff]  }
  0x1f   : > { %v638_v10 = vsel %vm631_vm1, %v625_v7, 0.0  ;;  %633 = vadd.xlane.f32.xlu0 %v632_v9  ;;  %v641_v13 = vsel %vm631_vm1, %v626_v11, 0.0  ;;  %v627_v32 = vld [vmem:[%s4661_s13 + $0x20] sm:$0xff]  ;;  %v628_v36 = vld [vmem:[%s4661_s13 + $0x28] sm:$0xff]  ;;  %v3489_v41 = vld [vmem:[%s3813_s23 + $0x10] ss:$8 sps:$4 sm:$0xff]   ;;  %805 = vmatprep.subr.bf16.mxu0 %v3487_v40 }
  0x20   : > { %639 = vadd.xlane.f32.xlu1 %v638_v10  ;;  %v644_v35 = vsel %vm631_vm1, %v627_v32, 0.0  ;;  %v647_v37 = vsel %vm631_vm1, %v628_v36, 0.0  ;;  %v3492_v43 = vld [vmem:[%s3813_s23 + $0x20] ss:$8 sps:$4 sm:$0xff]   ;;  %v3493_v44 = vld [vmem:[%s3813_s23 + $0x34] ss:$8 sps:$4 sm:$0xff]  }
  0x21   : > { %v3495_v45 = vld [vmem:[%s3813_s23 + $0x30] ss:$8 sps:$4 sm:$0xff]   ;;  %v712_v59 = vshrl.u32 %v711_v52, 7  ;;  %s3703_s17 = smov 64   ;;  %s3704_s25 = smov 112   ;;  %vm991_vm3 = vcmask 1043456  }
  0x22   : > { %806 = vmatpush1.bf16.msra.mxu0 %v3489_v41  ;;  %s3705_s29 = smov 48   ;;  %s4678_s12 = sld [smem:[#allocation6_spill]]  ;;  %vm947_vm4 = vcmask 195584   ;;  %vm3711_vm5 = vmmov 0   ;;  %vm1590_vm6 = vcmask 261120   ;;  %vm1594_vm7 = vcmask 392192  }
  0x23   : > { %636 = vadd.xlane.f32.xlu0 %v635_v12  ;;  %807 = vmatprep.subr.bf16.mxu0 %v3490_v42  ;;  %v3940_v1 = vsub.s32 0, %v712_v59  ;;  %s4676_s27 = scalar_lea.vmem %s4675_s3, %s3803_s16  ;;  %v3950_v10 = vsub.s32 1, %v712_v59  ;;  %s3706_s23 = smov 32   ;;  %vm2835_vm8 = vcmask 1040384   ;;  %vm2837_vm9 = vcmask 517120  }
  0x24   : > { %642 = vadd.xlane.f32.xlu1 %v641_v13  ;;  %v630_v4 = vld [vmem:[%s4676_s27] sm:$0x3]  ;;  %s3707_s20 = smov 96   ;;  %s3708_s3 = smov 16  }
  0x25   : > { %v714_v9 = vrot.slane %v630_v4, %v3940_v1  ;;  %s3709_s27 = smov 80   ;;  %p3418_p5 = scmp.eq.s32.totalorder %s3794_s30, 1 }
  0x26   : > { %808 = vmatpush1.bf16.msra.mxu0 %v3492_v43 }
  0x27   : > { %809 = vmatprep.subr.bf16.mxu0 %v3493_v44 }
  0x2a   : > { %810 = vmatpush1.bf16.msra.mxu0 %v3495_v45  ;;  %v742_v45 = vld [vmem:[%s4677_s24] sm:$0x3] }
  0xac   : > { %v634_v14 = vpop.xlane.xlu0 %633 }
  0xad   : > { %v640_v15 = vpop.xlane.xlu1 %639  ;;  %v651_v16 = vmul.f32 0.015625, %v634_v14 }
  0xae   : > { %v653_v17 = vmul.f32 0.015625, %v640_v15 }
  0xaf   : > { %v3904_v18 = vsub.f32 %v623_v6, %v651_v16  ;;  %v724_v16 = vrot.slane %v630_v4, %v3950_v10 }
  0xb0   : > { %v3906_v19 = vsub.f32 %v625_v7, %v653_v17  ;;  %v637_v20 = vpop.xlane.xlu0 %636 }
  0xb1   : > { %v643_v21 = vpop.xlane.xlu1 %642  ;;  %v652_v22 = vmul.f32 0.015625, %v637_v20  ;;  %v663_v24 = vmul.f32 %v3904_v18, %v3904_v18 }
  0xb2   : > { %v654_v23 = vmul.f32 0.015625, %v643_v21  ;;  %v665_v25 = vmul.f32 %v3906_v19, %v3906_v19 }
  0xb3   : > { %v3912_v26 = vsub.f32 %v624_v8, %v652_v22  ;;  %v669_v28 = vsel %vm631_vm1, %v663_v24, 0.0 }
  0xb4   : > { %v3914_v27 = vsub.f32 %v626_v11, %v654_v23  ;;  %670 = vadd.xlane.f32.xlu0 %v669_v28  ;;  %v675_v29 = vsel %vm631_vm1, %v665_v25, 0.0 }
  0xb5   : > { %v664_v30 = vmul.f32 %v3912_v26, %v3912_v26 }
  0xb6   : > { %v666_v31 = vmul.f32 %v3914_v27, %v3914_v27 }
  0xb7   : > { %v672_v33 = vsel %vm631_vm1, %v664_v30, 0.0 }
  0xb8   : > { %676 = vadd.xlane.f32.xlu0 %v675_v29  ;;  %673 = vadd.xlane.f32.xlu1 %v672_v33  ;;  %v678_v34 = vsel %vm631_vm1, %v666_v31, 0.0 }
  0xbc   : > { %679 = vadd.xlane.f32.xlu1 %v678_v34  ;;  %645 = vadd.xlane.f32.xlu0 %v644_v35 }
  0xc0   : > { %648 = vadd.xlane.f32.xlu1 %v647_v37 }
 0x141   : > { %v671_v47 = vpop.xlane.xlu0 %670 }
 0x142   : > { %v687_v48 = vmul.f32 0.015625, %v671_v47 }
 0x144   : > { %v693_v49 = vadd.f32 1e-05, %v687_v48  ;;  %v3969_v48 = vrot.slane %v742_v45, %v3950_v10 }
 0x145   : > { %v674_v50 = vpop.xlane.xlu1 %673  ;;  %v677_v51 = vpop.xlane.xlu0 %676 }
 0x146   : > { %3512 = vrsqrt.f32 %v693_v49  ;;  %v688_v53 = vmul.f32 0.015625, %v674_v50  ;;  %v689_v54 = vmul.f32 0.015625, %v677_v51 }
 0x148   : > { %v694_v55 = vadd.f32 1e-05, %v688_v53  ;;  %v695_v56 = vadd.f32 1e-05, %v689_v54 }
 0x149   : > { %v680_v57 = vpop.xlane.xlu1 %679  ;;  %v646_v58 = vpop.xlane.xlu0 %645 }
 0x14a   : > { %3514 = vrsqrt.f32 %v694_v55  ;;  %v690_v60 = vmul.f32 0.015625, %v680_v57  ;;  %v655_v61 = vmul.f32 0.015625, %v646_v58 }
 0x14b   : > { %3516 = vrsqrt.f32 %v695_v56 }
 0x14c   : > { %v696_v62 = vadd.f32 1e-05, %v690_v60  ;;  %v661_v63 = vsub.f32 %v627_v32, %v655_v61 }
 0x14d   : > { %v649_v0 = vpop.xlane.xlu1 %648 }
 0x14e   : > { %3518 = vrsqrt.f32 %v696_v62  ;;  %v656_v2 = vmul.f32 0.015625, %v649_v0  ;;  %v667_v3 = vmul.f32 %v661_v63, %v661_v63 }
 0x150   : > { %v3513_v5 = vpop.eup %3512  ;;  %v662_v6 = vsub.f32 %v628_v36, %v656_v2  ;;  %v681_v7 = vsel %vm631_vm1, %v667_v3, 0.0 }
 0x151   : > { %682 = vadd.xlane.f32.xlu0 %v681_v7  ;;  %v705_v8 = vmul.f32 %v3513_v5, %v3904_v18 }
 0x152   : > { %v668_v11 = vmul.f32 %v662_v6, %v662_v6 }
 0x153   : > { %v715_v15 = vmul.f32 %v714_v9, %v705_v8 }
 0x154   : > { %v3515_v12 = vpop.eup %3514  ;;  %v684_v13 = vsel %vm631_vm1, %v668_v11, 0.0 }
 0x155   : > { %685 = vadd.xlane.f32.xlu1 %v684_v13  ;;  %v706_v14 = vmul.f32 %v3515_v12, %v3912_v26  ;;  %v3517_v17 = vpop.eup %3516  ;;  %v725_v22 = vadd.f32 %v724_v16, %v715_v15 }
 0x156   : > { %v707_v18 = vmul.f32 %v3517_v17, %v3906_v19 }
 0x157   : > { %v716_v20 = vmul.f32 %v714_v9, %v706_v14 }
 0x158   : > { %v3519_v21 = vpop.eup %3518  ;;  %v717_v29 = vmul.f32 %v714_v9, %v707_v18 }
 0x159   : > { %v726_v23 = vadd.f32 %v724_v16, %v716_v20  ;;  %v708_v24 = vmul.f32 %v3519_v21, %v3914_v27 }
 0x15a   : > { %v727_v26 = vadd.f32 %v724_v16, %v717_v29 }
 0x15b   : > { %v731_v25 = vpack.c.bf16 %v726_v23, %v725_v22  ;;  %v718_v28 = vmul.f32 %v714_v9, %v708_v24 }
 0x15d   : > { %3037 = vmatmul.mubr.msk.bf16.vlgmr.msra.gmra.mrb[0].mxu0 %vm631_vm1, %v731_v25  ;;  %v728_v30 = vadd.f32 %v724_v16, %v718_v28 }
 0x15e   : > { %845 = vmatprep.mubr.bf16.mxu0 %v3702_v46 }
 0x15f   : > { %v732_v31 = vpack.c.bf16 %v728_v30, %v727_v26  ;;  %v4036_v30 = vld [vmem:[%s4678_s12] sm:$0x3] }
 0x160   : > { %v4040_v26 = vrot.slane %v4036_v30, %v3940_v1 }
 0x165   : > { %3038 = vmatmul.mubr.msk.bf16.gmra.mrb[4].mxu0 %vm631_vm1, %v732_v31 }
 0x166   : > { %855 = vmatprep.mubr.bf16.mxu0 %v3702_v46  ;;  %v3966_v46 = vrot.slane %v742_v45, %v3940_v1 }
 0x1de   : > { %v683_v32 = vpop.xlane.xlu0 %682 }
 0x1df   : > { %v691_v33 = vmul.f32 0.015625, %v683_v32 }
 0x1e1   : > { %v697_v34 = vadd.f32 1e-05, %v691_v33 }
 0x1e2   : > { %v686_v35 = vpop.xlane.xlu1 %685 }
 0x1e3   : > { %v692_v19 = vmul.f32 0.015625, %v686_v35  ;;  %3520 = vrsqrt.f32 %v697_v34 }
 0x1e5   : > { %v698_v27 = vadd.f32 1e-05, %v692_v19 }
 0x1e7   : > { %3522 = vrsqrt.f32 %v698_v27 }
 0x1ed   : > { %v3521_v36 = vpop.eup %3520 }
 0x1ee   : > { %v709_v37 = vmul.f32 %v3521_v36, %v661_v63 }
 0x1f0   : > { %v719_v38 = vmul.f32 %v714_v9, %v709_v37 }
 0x1f1   : > { %v3523_v39 = vpop.eup %3522 }
 0x1f2   : > { %v710_v40 = vmul.f32 %v3523_v39, %v662_v6  ;;  %v729_v42 = vadd.f32 %v724_v16, %v719_v38 }
 0x1f4   : > { %v720_v41 = vmul.f32 %v714_v9, %v710_v40 }
 0x1f6   : > { %v730_v43 = vadd.f32 %v724_v16, %v720_v41 }
 0x1f8   : > { %v733_v44 = vpack.c.bf16 %v730_v43, %v729_v42 }
 0x1fa   : > { %3039 = vmatmul.mubr.msk.bf16.gmra.mrb[8].mxu0 %vm631_vm1, %v733_v44 }
 0x230   : > { %v837_v47 = vpop.f32.mrb[0].mxu0 }
 0x231   : > { %v838_v49 = vadd.f32 %v837_v47, %v3966_v46  ;;  %v839_v50 = vpop.f32.mrb[1].mxu0 }
 0x232   : > { %v841_v51 = vpop.f32.mrb[2].mxu0  ;;  %v840_v54 = vadd.f32 %v839_v50, %v3969_v48 }
 0x233   : > { %v842_v52 = vadd.f32 %v841_v51, %v3966_v46  ;;  %v843_v53 = vpop.f32.mrb[3].mxu0  ;;  %v866_v56 = vmul.f32 0.25, %v838_v49 }
 0x234   : > { %v844_v55 = vadd.f32 %v843_v53, %v3969_v48 }
 0x235   : > { %v867_v57 = vmul.f32 0.25, %v842_v52  ;;  %v3975_v58 = vpack.c.bf16 %v842_v52, %v838_v49 }
 0x236   : > { %v3977_v59 = vpack.c.bf16 %v844_v55, %v840_v54 }
 0x237   : > { %v3979_v60 = vpack.c.bf16 %v867_v57, %v866_v56  ;;  %879 = vrot.lane.b32.xlu0 %v3975_v58, %s3703_s17 }
 0x238   : > { %v847_v61 = vpop.f32.mrb[4].mxu0  ;;  %3202 = vmatprep.subr.bf16.mxu1 %v3977_v59 }
 0x239   : > { %v848_v62 = vadd.f32 %v847_v61, %v3966_v46  ;;  %v849_v63 = vpop.f32.mrb[5].mxu0  ;;  %3198 = vmatprep.mubr.msk.bf16.mxu0 %vm883_vm2, %v3979_v60  ;;  %3203 = vmatpush3.bf16.msra.mxu1 %v3977_v59 }
 0x23a   : > { %v850_v0 = vadd.f32 %v849_v63, %v3969_v48  ;;  %v3989_v2 = vpop.f32.mrb[6].mxu0 }
 0x23b   : > { %v3991_v3 = vpack.c.bf16 %v848_v62, %v848_v62  ;;  %v853_v4 = vpop.f32.mrb[7].mxu0  ;;  %1045 = vrot.lane.b32.xlu0 %v3979_v60, %s3704_s25  ;;  %v868_v7 = vmul.f32 0.25, %v848_v62 }
 0x23c   : > { %v3995_v5 = vpack.c.bf16 %v850_v0, %v850_v0  ;;  %v854_v18 = vadd.f32 %v853_v4, %v3969_v48 }
 0x23d   : > { %881 = vrot.lane.b32.xlu1 %v3991_v3, %s3703_s17  ;;  %v4007_v8 = vpack.c.bf16 %v868_v7, %v868_v7 }
 0x23e   : > { %3392 = vmatprep.subr.msk.bf16.mxu1 %vm991_vm3, %v3995_v5  ;;  %v993_v6 = vsel %vm991_vm3, %v3995_v5, 0 }
 0x23f   : > { %3205 = vmatpush3.bf16.msra.mxu1 %v993_v6 }
 0x241   : > { %1049 = vrot.lane.b32.xlu1 %v3975_v58, %s3705_s29 }
 0x245   : > { %1051 = vrot.lane.b32.xlu1 %v3991_v3, %s3705_s29 }
 0x249   : > { %1047 = vrot.lane.b32.xlu1 %v4007_v8, %s3704_s25 }
 0x2a9   : > { %v880_v9 = vpop.permute.xlu0 %879 }
 0x2aa   : > { %3390 = vmatprep.subr.msk.bf16.mxu0 %vm883_vm2, %v880_v9  ;;  %v891_v11 = vsel %vm883_vm2, %v880_v9, 0 }
 0x2ab   : > { %3195 = vmatpush3.bf16.xpose.msra.mxu0 %v891_v11 }
 0x2ad   : > { %v1046_v15 = vpop.permute.xlu0 %1045 }
 0x2af   : > { %v882_v12 = vpop.permute.xlu1 %881 }
 0x2b0   : > { %3391 = vmatprep.subr.msk.bf16.mxu0 %vm883_vm2, %v882_v12  ;;  %v894_v13 = vsel %vm883_vm2, %v882_v12, 0 }
 0x2b3   : > { %v1050_v14 = vpop.permute.xlu1 %1049  ;;  %3197 = vmatpush3.bf16.xpose.msra.mxu0 %v894_v13 }
 0x2b4   : > { %3393 = vmatprep.subr.msk.bf16.mxu0 %vm883_vm2, %v1050_v14  ;;  %v1060_v16 = vsel %vm883_vm2, %v1050_v14, 0 }
 0x2b7   : > { %v1052_v17 = vpop.permute.xlu1 %1051 }
 0x2b8   : > { %v1063_v20 = vsel %vm883_vm2, %v1052_v17, 0 }
 0x2ba   : > { %3199 = vmatmul.mubr.msk.bf16.vlgmr.msra.gmra.mrb[12].mxu0 %vm883_vm2, %v4007_v8 }
 0x2bb   : > { %3211 = vmatpush3.bf16.xpose.msra.mxu0 %v1060_v16  ;;  %3214 = vmatprep.mubr.msk.bf16.mxu0 %vm883_vm2, %v1046_v15  ;;  %v1048_v21 = vpop.permute.xlu1 %1047 }
 0x2bc   : > { %3394 = vmatprep.subr.msk.bf16.mxu0 %vm883_vm2, %v1052_v17 }
 0x2c3   : > { %3213 = vmatpush3.bf16.xpose.msra.mxu0 %v1063_v20 }
 0x2ca   : > { %3215 = vmatmul.mubr.msk.bf16.vlgmr.msra.gmra.mrb[16].mxu0 %vm883_vm2, %v1048_v21 }
 0x2cd   : > { %v4023_v22 = vpop.f32.mrb[8].mxu0 }
 0x2ce   : > { %v859_v23 = vpop.f32.mrb[9].mxu0 }
 0x2cf   : > { %v860_v24 = vadd.f32 %v859_v23, %v3969_v48  ;;  %v4027_v25 = vpop.f32.mrb[10].mxu0 }
 0x2d0   : > { %v4029_v28 = vpop.f32.mrb[11].mxu0 }
 0x2d1   : > { %v4031_v29 = vpack.c.bf16 %v860_v24, %v854_v18 }
 0x38d   : > { %v3200_v31 = vpop.f32.mrb[12].mxu0 }
 0x38e   : > { %v930_v32 = vpop.f32.mrb[13].mxu0  ;;  %v939_v33 = vadd.f32 %v3200_v31, %v4040_v26 }
 0x38f   : > { %v931_v34 = vadd.f32 %v930_v32, %v4040_v26  ;;  %v3201_v35 = vpop.f32.mrb[14].mxu0 }
 0x390   : > { %v933_v19 = vpop.f32.mrb[15].mxu0  ;;  %v946_v39 = vadd.f32 %v939_v33, %v4040_v26 }
 0x391   : > { %v934_v27 = vadd.f32 %v933_v19, %v4040_v26  ;;  %v944_v36 = vadd.f32 %v931_v34, %v4040_v26 }
 0x392   : > { %v954_v41 = vsel %vm947_vm4, %v946_v39, -inf }
 0x393   : > { %v948_v37 = vsel %vm947_vm4, %v944_v36, -inf  ;;  %v945_v38 = vadd.f32 %v934_v27, %v4040_v26 }
 0x394   : > { %949 = vmax.xlane.f32.xlu0 %v948_v37 }
 0x395   : > { %v951_v40 = vsel %vm947_vm4, %v945_v38, -inf }
 0x396   : > { %952 = vmax.xlane.f32.xlu1 %v951_v40 }
 0x398   : > { %955 = vmax.xlane.f32.xlu0 %v954_v41 }
 0x39d   : > { %v3216_v42 = vpop.f32.mrb[16].mxu0 }
 0x39e   : > { %v1108_v43 = vadd.f32 %v3216_v42, %v4040_v26  ;;  %v1099_v44 = vpop.f32.mrb[17].mxu0 }
 0x39f   : > { %v1100_v45 = vadd.f32 %v1099_v44, %v4040_v26  ;;  %v3217_v47 = vpop.f32.mrb[18].mxu0 }
 0x3a0   : > { %v1102_v49 = vpop.f32.mrb[19].mxu0  ;;  %v1115_v50 = vadd.f32 %v1108_v43, %v4040_v26 }
 0x3a1   : > { %v1103_v51 = vadd.f32 %v1102_v49, %v4040_v26  ;;  %v1113_v52 = vadd.f32 %v1100_v45, %v4040_v26 }
 0x3a2   : > { %v1122_v53 = vsel %vm947_vm4, %v1115_v50, -inf }
 0x3a3   : > { %1123 = vmax.xlane.f32.xlu1 %v1122_v53  ;;  %v1116_v54 = vsel %vm947_vm4, %v1113_v52, -inf  ;;  %v1114_v55 = vadd.f32 %v1103_v51, %v4040_v26 }
 0x3a4   : > { %1117 = vmax.xlane.f32.xlu0 %v1116_v54 }
 0x3a5   : > { %v1119_v56 = vsel %vm947_vm4, %v1114_v55, -inf }
 0x3a8   : > { %1120 = vmax.xlane.f32.xlu0 %v1119_v56 }
 0x421   : > { %v950_v57 = vpop.xlane.xlu0 %949 }
 0x422   : > { %v957_v62 = vsub.f32 %v944_v36, %v950_v57 }
 0x423   : > { %v953_v61 = vpop.xlane.xlu1 %952 }
 0x424   : > { %v958_v63 = vsub.f32 %v945_v38, %v953_v61  ;;  %v960_v7 = vmul.f32 1.442695, %v957_v62 }
 0x425   : > { %v956_v0 = vpop.xlane.xlu0 %955 }
 0x426   : > { %v962_v4 = vmul.f32 1.442695, %v958_v63  ;;  %v959_v6 = vsub.f32 %v946_v39, %v956_v0 }
 0x428   : > { %3524 = vpow2.f32 %v962_v4  ;;  %v964_v9 = vmul.f32 1.442695, %v959_v6 }
 0x42a   : > { %3526 = vpow2.f32 %v964_v9 }
 0x42b   : > { %3528 = vpow2.f32 %v960_v7 }
 0x430   : > { %v1124_v11 = vpop.xlane.xlu1 %1123 }
 0x431   : > { %v1127_v12 = vsub.f32 %v1115_v50, %v1124_v11  ;;  %v1118_v13 = vpop.xlane.xlu0 %1117 }
 0x432   : > { %v3525_v14 = vpop.eup %3524  ;;  %v1125_v15 = vsub.f32 %v1113_v52, %v1118_v13 }
 0x433   : > { %v1132_v16 = vmul.f32 1.442695, %v1127_v12  ;;  %v969_v17 = vsel %vm947_vm4, %v3525_v14, 0.0 }
 0x434   : > { %v3527_v20 = vpop.eup %3526  ;;  %v1128_v21 = vmul.f32 1.442695, %v1125_v15  ;;  %970 = vadd.xlane.f32.xlu1 %v969_v17 }
 0x435   : > { %3530 = vpow2.f32 %v1132_v16  ;;  %v1121_v23 = vpop.xlane.xlu0 %1120  ;;  %v972_v18 = vsel %vm947_vm4, %v3527_v20, 0.0  ;;  %v3529_v24 = vpop.eup %3528 }
 0x436   : > { %v1126_v31 = vsub.f32 %v1114_v55, %v1121_v23  ;;  %973 = vadd.xlane.f32.xlu0 %v972_v18  ;;  %3532 = vpow2.f32 %v1128_v21  ;;  %v966_v33 = vsel %vm947_vm4, %v3529_v24, 0.0 }
 0x438   : > { %v1130_v32 = vmul.f32 1.442695, %v1126_v31 }
 0x43a   : > { %3534 = vpow2.f32 %v1130_v32  ;;  %967 = vadd.xlane.f32.xlu0 %v966_v33 }
 0x43f   : > { %v3531_v34 = vpop.eup %3530 }
 0x440   : > { %v1140_v35 = vsel %vm947_vm4, %v3531_v34, 0.0  ;;  %v3533_v19 = vpop.eup %3532 }
 0x441   : > { %1141 = vadd.xlane.f32.xlu1 %v1140_v35  ;;  %v1134_v36 = vsel %vm947_vm4, %v3533_v19, 0.0 }
 0x444   : > { %v3535_v27 = vpop.eup %3534 }
 0x445   : > { %1135 = vadd.xlane.f32.xlu1 %v1134_v36  ;;  %v1137_v37 = vsel %vm947_vm4, %v3535_v27, 0.0 }
 0x446   : > { %1138 = vadd.xlane.f32.xlu0 %v1137_v37 }
 0x456   : > { %1155 = vrot.lane.b32.xlu1 %v3995_v5, %s3704_s25 }
 0x45a   : > { %1219 = vrot.lane.b32.xlu1 %v3975_v58, %s3706_s23 }
 0x45c   : > { %1153 = vrot.lane.b32.xlu0 %v3977_v59, %s3704_s25 }
 0x45e   : > { %1221 = vrot.lane.b32.xlu1 %v3991_v3, %s3706_s23 }
 0x460   : > { %1215 = vrot.lane.b32.xlu0 %v3979_v60, %s3707_s20 }
 0x462   : > { %1217 = vrot.lane.b32.xlu1 %v4007_v8, %s3707_s20 }
 0x4c1   : > { %v971_v38 = vpop.xlane.xlu1 %970 }
 0x4c3   : > { %v974_v39 = vpop.xlane.xlu0 %973 }
 0x4c4   : > { %3536 = vrcp.f32 %v974_v39 }
 0x4c5   : > { %3538 = vrcp.f32 %v971_v38 }
 0x4c7   : > { %v968_v40 = vpop.xlane.xlu0 %967 }
 0x4c8   : > { %3540 = vrcp.f32 %v968_v40 }
 0x4ce   : > { %v1142_v41 = vpop.xlane.xlu1 %1141  ;;  %v3537_v42 = vpop.eup %3536 }
 0x4cf   : > { %v3539_v43 = vpop.eup %3538  ;;  %3542 = vrcp.f32 %v1142_v41  ;;  %v980_v47 = vmul.f32 %v3537_v42, %v3527_v20 }
 0x4d0   : > { %v979_v51 = vmul.f32 %v3539_v43, %v3525_v14 }
 0x4d1   : > { %v982_v53 = vpack.c.bf16 %v980_v47, %v980_v47 }
 0x4d2   : > { %v3541_v44 = vpop.eup %3540  ;;  %v1136_v45 = vpop.xlane.xlu1 %1135 }
 0x4d3   : > { %3544 = vrcp.f32 %v1136_v45  ;;  %v1139_v49 = vpop.xlane.xlu0 %1138  ;;  %v978_v50 = vmul.f32 %v3541_v44, %v3529_v24 }
 0x4d4   : > { %3546 = vrcp.f32 %v1139_v49 }
 0x4d5   : > { %v981_v52 = vpack.c.bf16 %v979_v51, %v978_v50 }
 0x4d6   : > { %v1156_v54 = vpop.permute.xlu1 %1155 }
 0x4d7   : > { %3206 = vmatprep.mubr.msk.bf16.mxu1 %vm947_vm4, %v981_v52  ;;  %v1154_v55 = vpop.permute.xlu0 %1153  ;;  %v1165_v57 = vsel %vm991_vm3, %v1156_v54, 0 }
 0x4d8   : > { %3207 = vmatmul.mubr.msk.bf16.vlgmr.msra.gmra.mrb[0].mxu1 %vm947_vm4, %v982_v53  ;;  %3218 = vmatprep.subr.bf16.mxu1 %v1154_v55 }
 0x4d9   : > { %3219 = vmatpush3.bf16.msra.mxu1 %v1154_v55  ;;  %v3543_v56 = vpop.eup %3542 }
 0x4da   : > { %3395 = vmatprep.subr.msk.bf16.mxu1 %vm991_vm3, %v1156_v54  ;;  %v1220_v62 = vpop.permute.xlu1 %1219  ;;  %v1148_v0 = vmul.f32 %v3543_v56, %v3531_v34 }
 0x4db   : > { %v1216_v11 = vpop.permute.xlu0 %1215  ;;  %v1230_v12 = vsel %vm883_vm2, %v1220_v62, 0 }
 0x4dc   : > { %v1150_v9 = vpack.c.bf16 %v1148_v0, %v1148_v0 }
 0x4dd   : > { %v3545_v61 = vpop.eup %3544  ;;  %3221 = vmatpush3.bf16.msra.mxu1 %v1165_v57 }
 0x4de   : > { %v3547_v63 = vpop.eup %3546  ;;  %3396 = vmatprep.subr.msk.bf16.mxu1 %vm883_vm2, %v1220_v62  ;;  %v1146_v4 = vmul.f32 %v3545_v61, %v3533_v19  ;;  %v1222_v13 = vpop.permute.xlu1 %1221 }
 0x4df   : > { %v1147_v6 = vmul.f32 %v3547_v63, %v3535_v27  ;;  %v1233_v14 = vsel %vm883_vm2, %v1222_v13, 0 }
 0x4e1   : > { %v1149_v7 = vpack.c.bf16 %v1147_v6, %v1146_v4 }
 0x4e2   : > { %v1218_v15 = vpop.permute.xlu1 %1217 }
 0x4e3   : > { %3222 = vmatprep.mubr.msk.bf16.mxu1 %vm947_vm4, %v1149_v7 }
 0x4e4   : > { %3223 = vmatmul.mubr.msk.bf16.vlgmr.msra.gmra.mrb[4].mxu1 %vm947_vm4, %v1150_v9 }
 0x4e5   : > { %3230 = vmatprep.mubr.msk.bf16.mxu1 %vm883_vm2, %v1216_v11 }
 0x4e6   : > { %3227 = vmatpush3.bf16.xpose.msra.mxu1 %v1230_v12 }
 0x4e7   : > { %3397 = vmatprep.subr.msk.bf16.mxu1 %vm883_vm2, %v1222_v13 }
 0x4ee   : > { %3229 = vmatpush3.bf16.xpose.msra.mxu1 %v1233_v14 }
 0x4f5   : > { %3231 = vmatmul.mubr.msk.bf16.vlgmr.msra.gmra.mrb[8].mxu1 %vm883_vm2, %v1218_v15 }
 0x5ab   : > { %v4090_v16 = vpop.f32.mrb[0].mxu1 }
 0x5ac   : > { %v4092_v17 = vpop.f32.mrb[1].mxu1 }
 0x5ad   : > { %v3209_v20 = vpop.f32.mrb[2].mxu1 }
 0x5ae   : > { %v4094_v21 = vpop.f32.mrb[3].mxu1 }
 0x5b7   : > { %v4096_v23 = vpop.f32.mrb[4].mxu1 }
 0x5b8   : > { %v4098_v18 = vpop.f32.mrb[5].mxu1 }
 0x5b9   : > { %v3225_v24 = vpop.f32.mrb[6].mxu1 }
 0x5ba   : > { %v4100_v31 = vpop.f32.mrb[7].mxu1 }
 0x5bb   : > { %v3439_v32 = vpack.i.bf16 %v4100_v31, %v4098_v18  ;;  %v3710_v18 = vmov 0.0  }
 0x5c8   : > { %v3232_v33 = vpop.f32.mrb[8].mxu1 }
 0x5c9   : > { %v1269_v34 = vpop.f32.mrb[9].mxu1  ;;  %v1278_v35 = vadd.f32 %v3232_v33, %v4040_v26 }
 0x5ca   : > { %v1270_v19 = vadd.f32 %v1269_v34, %v4040_v26  ;;  %v3233_v27 = vpop.f32.mrb[10].mxu1 }
 0x5cb   : > { %v1272_v36 = vpop.f32.mrb[11].mxu1  ;;  %v1285_v41 = vadd.f32 %v1278_v35, %v4040_v26 }
 0x5cc   : > { %v1273_v37 = vadd.f32 %v1272_v36, %v4040_v26  ;;  %v1283_v38 = vadd.f32 %v1270_v19, %v4040_v26  ;;  %v864_v19 = vadd.f32 %v4029_v28, %v3969_v48 }
 0x5cd   : > { %v1292_v43 = vsel %vm947_vm4, %v1285_v41, -inf }
 0x5ce   : > { %v1286_v39 = vsel %vm947_vm4, %v1283_v38, -inf  ;;  %v1284_v40 = vadd.f32 %v1273_v37, %v4040_v26  ;;  %v4140_v36 = vpack.c.bf16 %v864_v19, %v864_v19 }
 0x5cf   : > { %1287 = vmax.xlane.f32.xlu0 %v1286_v39 }
 0x5d0   : > { %v1289_v42 = vsel %vm947_vm4, %v1284_v40, -inf  ;;  %v1722_v37 = vsel %vm991_vm3, %v4140_v36, 0 }
 0x5d1   : > { %1290 = vmax.xlane.f32.xlu1 %v1289_v42 }
 0x5d3   : > { %1293 = vmax.xlane.f32.xlu0 %v1292_v43 }
 0x65c   : > { %v1288_v44 = vpop.xlane.xlu0 %1287 }
 0x65d   : > { %v1295_v45 = vsub.f32 %v1283_v38, %v1288_v44 }
 0x65e   : > { %v1291_v47 = vpop.xlane.xlu1 %1290 }
 0x65f   : > { %v1298_v49 = vmul.f32 1.442695, %v1295_v45  ;;  %v1296_v50 = vsub.f32 %v1284_v40, %v1291_v47 }
 0x660   : > { %v1294_v51 = vpop.xlane.xlu0 %1293 }
 0x661   : > { %3548 = vpow2.f32 %v1298_v49  ;;  %v1300_v52 = vmul.f32 1.442695, %v1296_v50  ;;  %v1297_v53 = vsub.f32 %v1285_v41, %v1294_v51 }
 0x663   : > { %3550 = vpow2.f32 %v1300_v52  ;;  %v1302_v54 = vmul.f32 1.442695, %v1297_v53 }
 0x665   : > { %3552 = vpow2.f32 %v1302_v54 }
 0x66b   : > { %v3549_v55 = vpop.eup %3548 }
 0x66c   : > { %v1304_v56 = vsel %vm947_vm4, %v3549_v55, 0.0 }
 0x66d   : > { %v3551_v57 = vpop.eup %3550  ;;  %1305 = vadd.xlane.f32.xlu0 %v1304_v56 }
 0x66e   : > { %v1307_v62 = vsel %vm947_vm4, %v3551_v57, 0.0 }
 0x66f   : > { %v3553_v61 = vpop.eup %3552 }
 0x670   : > { %v1310_v63 = vsel %vm947_vm4, %v3553_v61, 0.0 }
 0x671   : > { %1308 = vadd.xlane.f32.xlu0 %v1307_v62  ;;  %1311 = vadd.xlane.f32.xlu1 %v1310_v63 }
 0x682   : > { %1323 = vrot.lane.b32.xlu1 %v3995_v5, %s3707_s20 }
 0x686   : > { %1387 = vrot.lane.b32.xlu1 %v3975_v58, %s3708_s3 }
 0x687   : > { %1321 = vrot.lane.b32.xlu0 %v3977_v59, %s3707_s20 }
 0x68a   : > { %1389 = vrot.lane.b32.xlu1 %v3991_v3, %s3708_s3 }
 0x68b   : > { %1383 = vrot.lane.b32.xlu0 %v3979_v60, %s3709_s27 }
 0x68e   : > { %1385 = vrot.lane.b32.xlu1 %v4007_v8, %s3709_s27 }
 0x6fa   : > { %v1306_v0 = vpop.xlane.xlu0 %1305 }
 0x6fb   : > { %3554 = vrcp.f32 %v1306_v0 }
 0x6fe   : > { %v1312_v4 = vpop.xlane.xlu1 %1311  ;;  %v1309_v6 = vpop.xlane.xlu0 %1308 }
 0x6ff   : > { %3556 = vrcp.f32 %v1312_v4 }
 0x700   : > { %3558 = vrcp.f32 %v1309_v6 }
 0x702   : > { %v1324_v58 = vpop.permute.xlu1 %1323  ;;  %v1322_v7 = vpop.permute.xlu0 %1321 }
 0x703   : > { %3234 = vmatprep.subr.bf16.mxu0 %v1322_v7  ;;  %v1333_v3 = vsel %vm991_vm3, %v1324_v58, 0 }
 0x704   : > { %3235 = vmatpush3.bf16.msra.mxu0 %v1322_v7 }
 0x705   : > { %3398 = vmatprep.subr.msk.bf16.mxu0 %vm991_vm3, %v1324_v58  ;;  %v3555_v9 = vpop.eup %3554 }
 0x706   : > { %v1388_v11 = vpop.permute.xlu1 %1387  ;;  %v1316_v13 = vmul.f32 %v3555_v9, %v3549_v55  ;;  %v1384_v33 = vpop.permute.xlu0 %1383 }
 0x707   : > { %v1398_v24 = vsel %vm883_vm2, %v1388_v11, 0 }
 0x708   : > { %3237 = vmatpush3.bf16.msra.mxu0 %v1333_v3 }
 0x709   : > { %v3557_v60 = vpop.eup %3556  ;;  %3399 = vmatprep.subr.msk.bf16.mxu0 %vm883_vm2, %v1388_v11 }
 0x70a   : > { %v3559_v8 = vpop.eup %3558  ;;  %v1318_v12 = vmul.f32 %v3557_v60, %v3553_v61  ;;  %v1390_v34 = vpop.permute.xlu1 %1389 }
 0x70b   : > { %v1317_v14 = vmul.f32 %v3559_v8, %v3551_v57  ;;  %v1401_v35 = vsel %vm883_vm2, %v1390_v34, 0  ;;  %v858_v8 = vadd.f32 %v4023_v22, %v3966_v46 }
 0x70c   : > { %v1320_v15 = vpack.c.bf16 %v1318_v12, %v1318_v12  ;;  %v852_v12 = vadd.f32 %v3989_v2, %v3966_v46 }
 0x70d   : > { %v1319_v20 = vpack.c.bf16 %v1317_v14, %v1316_v13  ;;  %v862_v14 = vadd.f32 %v4027_v25, %v3966_v46  ;;  %v1599_v19 = vmul.f32 0.25, %v858_v8 }
 0x70e   : > { %v1386_v27 = vpop.permute.xlu1 %1385  ;;  %v4174_v13 = vpack.c.bf16 %v858_v8, %v852_v12 }
 0x70f   : > { %3238 = vmatprep.mubr.msk.bf16.mxu0 %vm947_vm4, %v1319_v20 }
 0x710   : > { %3239 = vmatmul.mubr.msk.bf16.vlgmr.msra.gmra.mrb[20].mxu0 %vm947_vm4, %v1320_v15  ;;  %v4182_v15 = vpack.c.bf16 %v862_v14, %v862_v14 }
 0x711   : > { %3246 = vmatprep.mubr.msk.bf16.mxu0 %vm883_vm2, %v1384_v33  ;;  %3243 = vmatpush3.bf16.xpose.msra.mxu0 %v1398_v24 }
 0x712   : > { %3400 = vmatprep.subr.msk.bf16.mxu0 %vm883_vm2, %v1390_v34 }
 0x719   : > { %3245 = vmatpush3.bf16.xpose.msra.mxu0 %v1401_v35 }
 0x71a   : > { %3266 = vmatprep.subr.bf16.mxu0 %v4031_v29 }
 0x720   : > { %3247 = vmatmul.mubr.msk.bf16.vlgmr.msra.gmra.mrb[24].mxu0 %vm883_vm2, %v1386_v27 }
 0x721   : > { %3267 = vmatpush3.bf16.msra.mxu0 %v4031_v29 }
 0x722   : > { %3404 = vmatprep.subr.msk.bf16.mxu0 %vm991_vm3, %v4140_v36 }
 0x725   : > { %3269 = vmatpush3.bf16.msra.mxu0 %v1722_v37 }
 0x7e3   : > { %v4148_v38 = vpop.f32.mrb[20].mxu0 }
 0x7e4   : > { %v4150_v39 = vpop.f32.mrb[21].mxu0 }
 0x7e5   : > { %v3241_v40 = vpop.f32.mrb[22].mxu0 }
 0x7e6   : > { %v4152_v48 = vpop.f32.mrb[23].mxu0 }
 0x7e7   : > { %v3444_v28 = vpack.i.bf16 %v4152_v48, %v4150_v39 }
 0x7f3   : > { %v3248_v41 = vpop.f32.mrb[24].mxu0 }
 0x7f4   : > { %v1437_v42 = vpop.f32.mrb[25].mxu0  ;;  %v1446_v43 = vadd.f32 %v3248_v41, %v4040_v26  ;;  %v1598_v41 = vmul.f32 0.25, %v852_v12 }
 0x7f5   : > { %v1438_v44 = vadd.f32 %v1437_v42, %v4040_v26  ;;  %v3249_v45 = vpop.f32.mrb[26].mxu0 }
 0x7f6   : > { %v1440_v47 = vpop.f32.mrb[27].mxu0  ;;  %v1453_v53 = vadd.f32 %v1446_v43, %v4040_v26  ;;  %v4189_v43 = vpack.c.bf16 %v1599_v19, %v1598_v41 }
 0x7f7   : > { %v1441_v49 = vadd.f32 %v1440_v47, %v4040_v26  ;;  %v1451_v50 = vadd.f32 %v1438_v44, %v4040_v26 }
 0x7f8   : > { %v1460_v55 = vsel %vm947_vm4, %v1453_v53, -inf }
 0x7f9   : > { %v1454_v51 = vsel %vm947_vm4, %v1451_v50, -inf  ;;  %v1452_v52 = vadd.f32 %v1441_v49, %v4040_v26  ;;  %v1600_v49 = vmul.f32 0.25, %v862_v14 }
 0x7fa   : > { %1455 = vmax.xlane.f32.xlu0 %v1454_v51 }
 0x7fb   : > { %v1457_v54 = vsel %vm947_vm4, %v1452_v52, -inf }
 0x7fc   : > { %1458 = vmax.xlane.f32.xlu1 %v1457_v54 }
 0x7fe   : > { %1461 = vmax.xlane.f32.xlu0 %v1460_v55 }
 0x887   : > { %v1456_v56 = vpop.xlane.xlu0 %1455 }
 0x888   : > { %v1463_v57 = vsub.f32 %v1451_v50, %v1456_v56  ;;  %v4198_v50 = vpack.c.bf16 %v1600_v49, %v1600_v49  ;;  %v4212_v56 = vrot.slane %v4036_v30, %v3950_v10 }
 0x889   : > { %v1459_v61 = vpop.xlane.xlu1 %1458 }
 0x88a   : > { %v1466_v62 = vmul.f32 1.442695, %v1463_v57  ;;  %v1464_v63 = vsub.f32 %v1452_v52, %v1459_v61 }
 0x88b   : > { %v1462_v0 = vpop.xlane.xlu0 %1461 }
 0x88c   : > { %3560 = vpow2.f32 %v1466_v62  ;;  %v1468_v4 = vmul.f32 1.442695, %v1464_v63  ;;  %v1465_v6 = vsub.f32 %v1453_v53, %v1462_v0 }
 0x88e   : > { %3562 = vpow2.f32 %v1468_v4  ;;  %v1470_v58 = vmul.f32 1.442695, %v1465_v6 }
 0x890   : > { %3564 = vpow2.f32 %v1470_v58 }
 0x896   : > { %v3561_v26 = vpop.eup %3560 }
 0x897   : > { %v1472_v7 = vsel %vm947_vm4, %v3561_v26, 0.0 }
 0x898   : > { %v3563_v3 = vpop.eup %3562  ;;  %1473 = vadd.xlane.f32.xlu0 %v1472_v7 }
 0x899   : > { %v1475_v11 = vsel %vm947_vm4, %v3563_v3, 0.0 }
 0x89a   : > { %v3565_v9 = vpop.eup %3564 }
 0x89b   : > { %v1478_v60 = vsel %vm947_vm4, %v3565_v9, 0.0 }
 0x89c   : > { %1476 = vadd.xlane.f32.xlu0 %v1475_v11  ;;  %1479 = vadd.xlane.f32.xlu1 %v1478_v60 }
 0x8ad   : > { %1491 = vrot.lane.b32.xlu1 %v3995_v5, %s3709_s27 }
 0x8b1   : > { %1611 = vrot.lane.b32.xlu1 %v4174_v13, %s3703_s17 }
 0x8b2   : > { %1489 = vrot.lane.b32.xlu0 %v3977_v59, %s3709_s27 }
 0x8b5   : > { %1613 = vrot.lane.b32.xlu1 %v4182_v15, %s3703_s17 }
 0x925   : > { %v1474_v2 = vpop.xlane.xlu0 %1473 }
 0x926   : > { %3566 = vrcp.f32 %v1474_v2 }
 0x929   : > { %v1480_v22 = vpop.xlane.xlu1 %1479  ;;  %v1477_v5 = vpop.xlane.xlu0 %1476 }
 0x92a   : > { %3568 = vrcp.f32 %v1480_v22 }
 0x92b   : > { %3570 = vrcp.f32 %v1477_v5 }
 0x92d   : > { %v1492_v20 = vpop.permute.xlu1 %1491  ;;  %v1490_v24 = vpop.permute.xlu0 %1489 }
 0x92e   : > { %3250 = vmatprep.subr.bf16.mxu1 %v1490_v24  ;;  %v1501_v46 = vsel %vm991_vm3, %v1492_v20, 0 }
 0x92f   : > { %3251 = vmatpush3.bf16.msra.mxu1 %v1490_v24 }
 0x930   : > { %3401 = vmatprep.subr.msk.bf16.mxu1 %vm991_vm3, %v1492_v20  ;;  %v3567_v59 = vpop.eup %3566 }
 0x931   : > { %v1612_v25 = vpop.permute.xlu1 %1611  ;;  %v1484_v27 = vmul.f32 %v3567_v59, %v3561_v26 }
 0x932   : > { %v1622_v44 = vsel %vm883_vm2, %v1612_v25, 0 }
 0x933   : > { %3253 = vmatpush3.bf16.msra.mxu1 %v1501_v46 }
 0x934   : > { %v3569_v33 = vpop.eup %3568  ;;  %3402 = vmatprep.subr.msk.bf16.mxu1 %vm883_vm2, %v1612_v25 }
 0x935   : > { %v3571_v34 = vpop.eup %3570  ;;  %v1486_v35 = vmul.f32 %v3569_v33, %v3565_v9  ;;  %v1614_v45 = vpop.permute.xlu1 %1613 }
 0x936   : > { %v1485_v37 = vmul.f32 %v3571_v34, %v3563_v3  ;;  %v1625_v47 = vsel %vm883_vm2, %v1614_v45, 0 }
 0x937   : > { %v1488_v40 = vpack.c.bf16 %v1486_v35, %v1486_v35 }
 0x938   : > { %v1487_v42 = vpack.c.bf16 %v1485_v37, %v1484_v27 }
 0x93a   : > { %3254 = vmatprep.mubr.msk.bf16.mxu1 %vm947_vm4, %v1487_v42 }
 0x93b   : > { %3255 = vmatmul.mubr.msk.bf16.vlgmr.msra.gmra.mrb[12].mxu1 %vm947_vm4, %v1488_v40 }
 0x93c   : > { %3262 = vmatprep.mubr.msk.bf16.mxu1 %vm883_vm2, %v4189_v43  ;;  %3259 = vmatpush3.bf16.xpose.msra.mxu1 %v1622_v44 }
 0x93d   : > { %3403 = vmatprep.subr.msk.bf16.mxu1 %vm883_vm2, %v1614_v45 }
 0x944   : > { %3261 = vmatpush3.bf16.xpose.msra.mxu1 %v1625_v47 }
 0x94b   : > { %3263 = vmatmul.mubr.msk.bf16.vlgmr.msra.gmra.mrb[16].mxu1 %vm883_vm2, %v4198_v50 }
 0xa0e   : > { %v4202_v51 = vpop.f32.mrb[12].mxu1 }
 0xa0f   : > { %v4204_v52 = vpop.f32.mrb[13].mxu1 }
 0xa10   : > { %v3257_v53 = vpop.f32.mrb[14].mxu1 }
 0xa11   : > { %v4206_v54 = vpop.f32.mrb[15].mxu1 }
 0xa12   : > { %v3449_v55 = vpack.i.bf16 %v4206_v54, %v4204_v52 }
 0xa1e   : > { %v3264_v57 = vpop.f32.mrb[16].mxu1 }
 0xa1f   : > { %v1661_v61 = vpop.f32.mrb[17].mxu1  ;;  %v1670_v62 = vadd.f32 %v3264_v57, %v4212_v56 }
 0xa20   : > { %v1662_v63 = vadd.f32 %v1661_v61, %v4212_v56  ;;  %v3265_v0 = vpop.f32.mrb[18].mxu1 }
 0xa21   : > { %v1664_v4 = vpop.f32.mrb[19].mxu1  ;;  %v1677_v3 = vadd.f32 %v1670_v62, %v4212_v56 }
 0xa22   : > { %v1665_v6 = vadd.f32 %v1664_v4, %v4212_v56  ;;  %v1675_v58 = vadd.f32 %v1662_v63, %v4212_v56 }
 0xa23   : > { %v1684_v9 = vsel %vm947_vm4, %v1677_v3, -inf }
 0xa24   : > { %v1678_v26 = vsel %vm947_vm4, %v1675_v58, -inf  ;;  %v1676_v7 = vadd.f32 %v1665_v6, %v4212_v56 }
 0xa25   : > { %1679 = vmax.xlane.f32.xlu0 %v1678_v26 }
 0xa26   : > { %v1681_v30 = vsel %vm947_vm4, %v1676_v7, -inf }
 0xa27   : > { %1682 = vmax.xlane.f32.xlu1 %v1681_v30 }
 0xa29   : > { %1685 = vmax.xlane.f32.xlu0 %v1684_v9 }
 0xab2   : > { %v1680_v11 = vpop.xlane.xlu0 %1679 }
 0xab3   : > { %v1687_v60 = vsub.f32 %v1675_v58, %v1680_v11 }
 0xab4   : > { %v1683_v8 = vpop.xlane.xlu1 %1682 }
 0xab5   : > { %v1690_v12 = vmul.f32 1.442695, %v1687_v60  ;;  %v1688_v14 = vsub.f32 %v1676_v7, %v1683_v8 }
 0xab6   : > { %v1686_v2 = vpop.xlane.xlu0 %1685 }
 0xab7   : > { %3572 = vpow2.f32 %v1690_v12  ;;  %v1692_v22 = vmul.f32 1.442695, %v1688_v14  ;;  %v1689_v5 = vsub.f32 %v1677_v3, %v1686_v2 }
 0xab9   : > { %3574 = vpow2.f32 %v1692_v22  ;;  %v1694_v20 = vmul.f32 1.442695, %v1689_v5 }
 0xabb   : > { %3576 = vpow2.f32 %v1694_v20 }
 0xac1   : > { %v3573_v24 = vpop.eup %3572 }
 0xac2   : > { %v1696_v46 = vsel %vm947_vm4, %v3573_v24, 0.0 }
 0xac3   : > { %v3575_v59 = vpop.eup %3574  ;;  %1697 = vadd.xlane.f32.xlu0 %v1696_v46 }
 0xac4   : > { %v1699_v33 = vsel %vm947_vm4, %v3575_v59, 0.0 }
 0xac5   : > { %v3577_v25 = vpop.eup %3576 }
 0xac6   : > { %v1702_v34 = vsel %vm947_vm4, %v3577_v25, 0.0 }
 0xac7   : > { %1700 = vadd.xlane.f32.xlu0 %v1699_v33  ;;  %1703 = vadd.xlane.f32.xlu1 %v1702_v34 }
 0xad8   : > { %1780 = vrot.lane.b32.xlu1 %v4182_v15, %s3705_s29 }
 0xadc   : > { %1774 = vrot.lane.b32.xlu1 %v4189_v43, %s3704_s25 }
 0xadd   : > { %1778 = vrot.lane.b32.xlu0 %v4174_v13, %s3705_s29 }
 0xae0   : > { %1776 = vrot.lane.b32.xlu1 %v4198_v50, %s3704_s25 }
 0xb50   : > { %v1698_v35 = vpop.xlane.xlu0 %1697 }
 0xb51   : > { %3578 = vrcp.f32 %v1698_v35 }
 0xb54   : > { %v1704_v19 = vpop.xlane.xlu1 %1703  ;;  %v1701_v27 = vpop.xlane.xlu0 %1700 }
 0xb55   : > { %3580 = vrcp.f32 %v1704_v19 }
 0xb56   : > { %3582 = vrcp.f32 %v1701_v27 }
 0xb58   : > { %v1779_v37 = vpop.permute.xlu0 %1778  ;;  %v1781_v45 = vpop.permute.xlu1 %1780 }
 0xb59   : > { %3405 = vmatprep.subr.msk.bf16.mxu0 %vm883_vm2, %v1779_v37  ;;  %v1789_v61 = vsel %vm883_vm2, %v1779_v37, 0  ;;  %v1792_v63 = vsel %vm883_vm2, %v1781_v45, 0 }
 0xb5b   : > { %v3579_v40 = vpop.eup %3578 }
 0xb5c   : > { %v1708_v47 = vmul.f32 %v3579_v40, %v3573_v24  ;;  %v1775_v62 = vpop.permute.xlu1 %1774 }
 0xb5f   : > { %v3581_v41 = vpop.eup %3580 }
 0xb60   : > { %v3583_v42 = vpop.eup %3582  ;;  %v1710_v44 = vmul.f32 %v3581_v41, %v3577_v25  ;;  %v1777_v0 = vpop.permute.xlu1 %1776 }
 0xb61   : > { %v1709_v49 = vmul.f32 %v3583_v42, %v3575_v59 }
 0xb62   : > { %v1712_v53 = vpack.c.bf16 %v1710_v44, %v1710_v44 }
 0xb63   : > { %v1711_v57 = vpack.c.bf16 %v1709_v49, %v1708_v47 }
 0xb65   : > { %3270 = vmatprep.mubr.msk.bf16.mxu0 %vm947_vm4, %v1711_v57 }
 0xb66   : > { %3271 = vmatmul.mubr.msk.bf16.vlgmr.msra.gmra.mrb[28].mxu0 %vm947_vm4, %v1712_v53 }
 0xb67   : > { %3275 = vmatpush3.bf16.xpose.msra.mxu0 %v1789_v61  ;;  %3278 = vmatprep.mubr.msk.bf16.mxu0 %vm883_vm2, %v1775_v62 }
 0xb68   : > { %3406 = vmatprep.subr.msk.bf16.mxu0 %vm883_vm2, %v1781_v45 }
 0xb6f   : > { %3277 = vmatpush3.bf16.xpose.msra.mxu0 %v1792_v63 }
 0xb76   : > { %3279 = vmatmul.mubr.msk.bf16.vlgmr.msra.gmra.mrb[32].mxu0 %vm883_vm2, %v1777_v0 }
 0xc39   : > { %v4242_v4 = vpop.f32.mrb[28].mxu0 }
 0xc3a   : > { %v4244_v6 = vpop.f32.mrb[29].mxu0 }
 0xc3b   : > { %v3273_v58 = vpop.f32.mrb[30].mxu0 }
 0xc3c   : > { %v4246_v26 = vpop.f32.mrb[31].mxu0 }
 0xc49   : > { %v3280_v7 = vpop.f32.mrb[32].mxu0 }
 0xc4a   : > { %v1828_v3 = vpop.f32.mrb[33].mxu0  ;;  %v1837_v30 = vadd.f32 %v3280_v7, %v4212_v56 }
 0xc4b   : > { %v1829_v9 = vadd.f32 %v1828_v3, %v4212_v56  ;;  %v3281_v11 = vpop.f32.mrb[34].mxu0 }
 0xc4c   : > { %v1831_v60 = vpop.f32.mrb[35].mxu0  ;;  %v1844_v22 = vadd.f32 %v1837_v30, %v4212_v56 }
 0xc4d   : > { %v1832_v8 = vadd.f32 %v1831_v60, %v4212_v56  ;;  %v1842_v12 = vadd.f32 %v1829_v9, %v4212_v56 }
 0xc4e   : > { %v1851_v20 = vsel %vm947_vm4, %v1844_v22, -inf }
 0xc4f   : > { %v1845_v14 = vsel %vm947_vm4, %v1842_v12, -inf  ;;  %v1843_v2 = vadd.f32 %v1832_v8, %v4212_v56 }
 0xc50   : > { %1846 = vmax.xlane.f32.xlu0 %v1845_v14 }
 0xc51   : > { %v1848_v5 = vsel %vm947_vm4, %v1843_v2, -inf }
 0xc52   : > { %1849 = vmax.xlane.f32.xlu1 %v1848_v5 }
 0xc54   : > { %1852 = vmax.xlane.f32.xlu0 %v1851_v20 }
 0xcdd   : > { %v1847_v24 = vpop.xlane.xlu0 %1846 }
 0xcde   : > { %v1854_v46 = vsub.f32 %v1842_v12, %v1847_v24 }
 0xcdf   : > { %v1850_v59 = vpop.xlane.xlu1 %1849 }
 0xce0   : > { %v1857_v25 = vmul.f32 1.442695, %v1854_v46  ;;  %v1855_v33 = vsub.f32 %v1843_v2, %v1850_v59 }
 0xce1   : > { %v1853_v34 = vpop.xlane.xlu0 %1852 }
 0xce2   : > { %3584 = vpow2.f32 %v1857_v25  ;;  %v1859_v35 = vmul.f32 1.442695, %v1855_v33  ;;  %v1856_v19 = vsub.f32 %v1844_v22, %v1853_v34 }
 0xce4   : > { %3586 = vpow2.f32 %v1859_v35  ;;  %v1861_v27 = vmul.f32 1.442695, %v1856_v19 }
 0xce6   : > { %3588 = vpow2.f32 %v1861_v27 }
 0xcec   : > { %v3585_v37 = vpop.eup %3584 }
 0xced   : > { %v1863_v40 = vsel %vm947_vm4, %v3585_v37, 0.0 }
 0xcee   : > { %v3587_v41 = vpop.eup %3586  ;;  %1864 = vadd.xlane.f32.xlu0 %v1863_v40 }
 0xcef   : > { %v1866_v44 = vsel %vm947_vm4, %v3587_v41, 0.0 }
 0xcf0   : > { %v3589_v42 = vpop.eup %3588 }
 0xcf1   : > { %v1869_v45 = vsel %vm947_vm4, %v3589_v42, 0.0 }
 0xcf2   : > { %1867 = vadd.xlane.f32.xlu0 %v1866_v44  ;;  %1870 = vadd.xlane.f32.xlu1 %v1869_v45 }
 0xd03   : > { %1884 = vrot.lane.b32.xlu1 %v4140_v36, %s3704_s25 }
 0xd07   : > { %1948 = vrot.lane.b32.xlu1 %v4174_v13, %s3706_s23 }
 0xd08   : > { %1882 = vrot.lane.b32.xlu0 %v4031_v29, %s3704_s25 }
 0xd0b   : > { %1950 = vrot.lane.b32.xlu1 %v4182_v15, %s3706_s23 }
 0xd0c   : > { %1944 = vrot.lane.b32.xlu0 %v4189_v43, %s3707_s20 }
 0xd0f   : > { %1946 = vrot.lane.b32.xlu1 %v4198_v50, %s3707_s20 }
 0xd7b   : > { %v1865_v47 = vpop.xlane.xlu0 %1864 }
 0xd7c   : > { %3590 = vrcp.f32 %v1865_v47 }
 0xd7f   : > { %v1871_v49 = vpop.xlane.xlu1 %1870  ;;  %v1868_v53 = vpop.xlane.xlu0 %1867 }
 0xd80   : > { %3592 = vrcp.f32 %v1871_v49 }
 0xd81   : > { %3594 = vrcp.f32 %v1868_v53 }
 0xd83   : > { %v1885_v57 = vpop.permute.xlu1 %1884  ;;  %v1883_v61 = vpop.permute.xlu0 %1882 }
 0xd84   : > { %3282 = vmatprep.subr.bf16.mxu1 %v1883_v61  ;;  %v1894_v62 = vsel %vm991_vm3, %v1885_v57, 0 }
 0xd85   : > { %3283 = vmatpush3.bf16.msra.mxu1 %v1883_v61 }
 0xd86   : > { %3407 = vmatprep.subr.msk.bf16.mxu1 %vm991_vm3, %v1885_v57  ;;  %v3591_v63 = vpop.eup %3590 }
 0xd87   : > { %v1949_v0 = vpop.permute.xlu1 %1948  ;;  %v1875_v30 = vmul.f32 %v3591_v63, %v3585_v37  ;;  %v1945_v12 = vpop.permute.xlu0 %1944 }
 0xd88   : > { %v1959_v8 = vsel %vm883_vm2, %v1949_v0, 0 }
 0xd89   : > { %3285 = vmatpush3.bf16.msra.mxu1 %v1894_v62 }
 0xd8a   : > { %v3593_v58 = vpop.eup %3592  ;;  %3408 = vmatprep.subr.msk.bf16.mxu1 %vm883_vm2, %v1949_v0 }
 0xd8b   : > { %v3595_v7 = vpop.eup %3594  ;;  %v1877_v3 = vmul.f32 %v3593_v58, %v3589_v42  ;;  %v1951_v14 = vpop.permute.xlu1 %1950 }
 0xd8c   : > { %v1876_v9 = vmul.f32 %v3595_v7, %v3587_v41  ;;  %v1962_v2 = vsel %vm883_vm2, %v1951_v14, 0 }
 0xd8d   : > { %v1879_v11 = vpack.c.bf16 %v1877_v3, %v1877_v3 }
 0xd8e   : > { %v1878_v60 = vpack.c.bf16 %v1876_v9, %v1875_v30 }
 0xd8f   : > { %v1947_v22 = vpop.permute.xlu1 %1946 }
 0xd90   : > { %3286 = vmatprep.mubr.msk.bf16.mxu1 %vm947_vm4, %v1878_v60 }
 0xd91   : > { %3287 = vmatmul.mubr.msk.bf16.vlgmr.msra.gmra.mrb[20].mxu1 %vm947_vm4, %v1879_v11 }
 0xd92   : > { %3294 = vmatprep.mubr.msk.bf16.mxu1 %vm883_vm2, %v1945_v12  ;;  %3291 = vmatpush3.bf16.xpose.msra.mxu1 %v1959_v8 }
 0xd93   : > { %3409 = vmatprep.subr.msk.bf16.mxu1 %vm883_vm2, %v1951_v14 }
 0xd9a   : > { %3293 = vmatpush3.bf16.xpose.msra.mxu1 %v1962_v2 }
 0xda1   : > { %3295 = vmatmul.mubr.msk.bf16.vlgmr.msra.gmra.mrb[24].mxu1 %vm883_vm2, %v1947_v22 }
 0xe64   : > { %v4282_v5 = vpop.f32.mrb[20].mxu1 }
 0xe65   : > { %v4284_v20 = vpop.f32.mrb[21].mxu1 }
 0xe66   : > { %v3454_v24 = vpack.i.bf16 %v4284_v20, %v4096_v23  ;;  %v3289_v46 = vpop.f32.mrb[22].mxu1 }
 0xe67   : > { %v4288_v59 = vpop.f32.mrb[23].mxu1 }
 0xe68   : > { %v3469_v25 = vpack.i.bf16 %v4282_v5, %v4288_v59 }
 0xe74   : > { %v3296_v33 = vpop.f32.mrb[24].mxu1 }
 0xe75   : > { %v1998_v34 = vpop.f32.mrb[25].mxu1  ;;  %v2007_v35 = vadd.f32 %v3296_v33, %v4212_v56 }
 0xe76   : > { %v1999_v19 = vadd.f32 %v1998_v34, %v4212_v56  ;;  %v3297_v27 = vpop.f32.mrb[26].mxu1 }
 0xe77   : > { %v2001_v37 = vpop.f32.mrb[27].mxu1  ;;  %v2014_v45 = vadd.f32 %v2007_v35, %v4212_v56 }
 0xe78   : > { %v2002_v40 = vadd.f32 %v2001_v37, %v4212_v56  ;;  %v2012_v41 = vadd.f32 %v1999_v19, %v4212_v56 }
 0xe79   : > { %v2021_v49 = vsel %vm947_vm4, %v2014_v45, -inf }
 0xe7a   : > { %v2015_v42 = vsel %vm947_vm4, %v2012_v41, -inf  ;;  %v2013_v44 = vadd.f32 %v2002_v40, %v4212_v56 }
 0xe7b   : > { %2016 = vmax.xlane.f32.xlu0 %v2015_v42 }
 0xe7c   : > { %v2018_v47 = vsel %vm947_vm4, %v2013_v44, -inf }
 0xe7d   : > { %2019 = vmax.xlane.f32.xlu1 %v2018_v47 }
 0xe7f   : > { %2022 = vmax.xlane.f32.xlu0 %v2021_v49 }
 0xf08   : > { %v2017_v53 = vpop.xlane.xlu0 %2016 }
 0xf09   : > { %v2024_v57 = vsub.f32 %v2012_v41, %v2017_v53 }
 0xf0a   : > { %v2020_v61 = vpop.xlane.xlu1 %2019 }
 0xf0b   : > { %v2027_v62 = vmul.f32 1.442695, %v2024_v57  ;;  %v2025_v63 = vsub.f32 %v2013_v44, %v2020_v61 }
 0xf0c   : > { %v2023_v0 = vpop.xlane.xlu0 %2022 }
 0xf0d   : > { %3596 = vpow2.f32 %v2027_v62  ;;  %v2029_v58 = vmul.f32 1.442695, %v2025_v63  ;;  %v2026_v7 = vsub.f32 %v2014_v45, %v2023_v0 }
 0xf0f   : > { %3598 = vpow2.f32 %v2029_v58  ;;  %v2031_v3 = vmul.f32 1.442695, %v2026_v7 }
 0xf11   : > { %3600 = vpow2.f32 %v2031_v3 }
 0xf17   : > { %v3597_v30 = vpop.eup %3596 }
 0xf18   : > { %v2033_v9 = vsel %vm947_vm4, %v3597_v30, 0.0 }
 0xf19   : > { %v3599_v11 = vpop.eup %3598  ;;  %2034 = vadd.xlane.f32.xlu0 %v2033_v9 }
 0xf1a   : > { %v2036_v8 = vsel %vm947_vm4, %v3599_v11, 0.0 }
 0xf1b   : > { %v3601_v60 = vpop.eup %3600 }
 0xf1c   : > { %v2039_v12 = vsel %vm947_vm4, %v3601_v60, 0.0 }
 0xf1d   : > { %2037 = vadd.xlane.f32.xlu0 %v2036_v8  ;;  %2040 = vadd.xlane.f32.xlu1 %v2039_v12 }
 0xf2e   : > { %2052 = vrot.lane.b32.xlu1 %v4140_v36, %s3707_s20 }
 0xf32   : > { %2116 = vrot.lane.b32.xlu1 %v4174_v13, %s3708_s3 }
 0xf33   : > { %2050 = vrot.lane.b32.xlu0 %v4031_v29, %s3707_s20 }
 0xf36   : > { %2118 = vrot.lane.b32.xlu1 %v4182_v15, %s3708_s3 }
 0xf37   : > { %2112 = vrot.lane.b32.xlu0 %v4189_v43, %s3709_s27 }
 0xf3a   : > { %2114 = vrot.lane.b32.xlu1 %v4198_v50, %s3709_s27 }
 0xfa6   : > { %v2035_v14 = vpop.xlane.xlu0 %2034 }
 0xfa7   : > { %3602 = vrcp.f32 %v2035_v14 }
 0xfaa   : > { %v2041_v2 = vpop.xlane.xlu1 %2040  ;;  %v2038_v22 = vpop.xlane.xlu0 %2037 }
 0xfab   : > { %3604 = vrcp.f32 %v2041_v2 }
 0xfac   : > { %3606 = vrcp.f32 %v2038_v22 }
 0xfae   : > { %v2053_v46 = vpop.permute.xlu1 %2052  ;;  %v2051_v13 = vpop.permute.xlu0 %2050 }
 0xfaf   : > { %3298 = vmatprep.subr.bf16.mxu0 %v2051_v13  ;;  %v2062_v15 = vsel %vm991_vm3, %v2053_v46, 0 }
 0xfb0   : > { %3299 = vmatpush3.bf16.msra.mxu0 %v2051_v13 }
 0xfb1   : > { %3410 = vmatprep.subr.msk.bf16.mxu0 %vm991_vm3, %v2053_v46  ;;  %v3603_v33 = vpop.eup %3602 }
 0xfb2   : > { %v2117_v34 = vpop.permute.xlu1 %2116  ;;  %v2045_v19 = vmul.f32 %v3603_v33, %v3597_v30  ;;  %v2113_v42 = vpop.permute.xlu0 %2112 }
 0xfb3   : > { %v2127_v41 = vsel %vm883_vm2, %v2117_v34, 0 }
 0xfb4   : > { %3301 = vmatpush3.bf16.msra.mxu0 %v2062_v15 }
 0xfb5   : > { %v3605_v43 = vpop.eup %3604  ;;  %3411 = vmatprep.subr.msk.bf16.mxu0 %vm883_vm2, %v2117_v34 }
 0xfb6   : > { %v3607_v50 = vpop.eup %3606  ;;  %v2047_v35 = vmul.f32 %v3605_v43, %v3601_v60  ;;  %v2119_v44 = vpop.permute.xlu1 %2118 }
 0xfb7   : > { %v2046_v27 = vmul.f32 %v3607_v50, %v3599_v11  ;;  %v2130_v45 = vsel %vm883_vm2, %v2119_v44, 0 }
 0xfb8   : > { %v2049_v37 = vpack.c.bf16 %v2047_v35, %v2047_v35 }
 0xfb9   : > { %v2048_v40 = vpack.c.bf16 %v2046_v27, %v2045_v19 }
 0xfba   : > { %v2115_v47 = vpop.permute.xlu1 %2114 }
 0xfbb   : > { %3302 = vmatprep.mubr.msk.bf16.mxu0 %vm947_vm4, %v2048_v40 }
 0xfbc   : > { %3303 = vmatmul.mubr.msk.bf16.vlgmr.msra.gmra.mrb[36].mxu0 %vm947_vm4, %v2049_v37 }
 0xfbd   : > { %3310 = vmatprep.mubr.msk.bf16.mxu0 %vm883_vm2, %v2113_v42  ;;  %3307 = vmatpush3.bf16.xpose.msra.mxu0 %v2127_v41 }
 0xfbe   : > { %3412 = vmatprep.subr.msk.bf16.mxu0 %vm883_vm2, %v2119_v44 }
 0xfc5   : > { %3309 = vmatpush3.bf16.xpose.msra.mxu0 %v2130_v45 }
 0xfc6   : > { %3342 = vmatprep.subr.bf16.mxu0 %v3710_v18 }
 0xfcc   : > { %3311 = vmatmul.mubr.msk.bf16.vlgmr.msra.gmra.mrb[40].mxu0 %vm883_vm2, %v2115_v47 }
 0xfcd   : > { %3350 = vmatprep.mubr.msk.bf16.mxu0 %vm3711_vm5, %v3710_v18 }
0x108f   : > { %v4326_v49 = vpop.f32.mrb[36].mxu0 }
0x1090   : > { %v2098_v53 = vpop.f32.mrb[37].mxu0 }
0x1091   : > { %v3459_v57 = vpack.i.bf16 %v2098_v53, %v4148_v38  ;;  %v3305_v61 = vpop.f32.mrb[38].mxu0 }
0x1092   : > { %v4329_v62 = vpop.f32.mrb[39].mxu0 }
0x1093   : > { %v3474_v63 = vpack.i.bf16 %v4326_v49, %v4329_v62 }
0x109f   : > { %v3312_v0 = vpop.f32.mrb[40].mxu0 }
0x10a0   : > { %v2166_v58 = vpop.f32.mrb[41].mxu0  ;;  %v2175_v7 = vadd.f32 %v3312_v0, %v4212_v56 }
0x10a1   : > { %v2167_v3 = vadd.f32 %v2166_v58, %v4212_v56  ;;  %v3313_v30 = vpop.f32.mrb[42].mxu0 }
0x10a2   : > { %v2169_v9 = vpop.f32.mrb[43].mxu0  ;;  %v2182_v12 = vadd.f32 %v2175_v7, %v4212_v56 }
0x10a3   : > { %v2170_v11 = vadd.f32 %v2169_v9, %v4212_v56  ;;  %v2180_v60 = vadd.f32 %v2167_v3, %v4212_v56 }
0x10a4   : > { %v2189_v2 = vsel %vm947_vm4, %v2182_v12, -inf }
0x10a5   : > { %v2183_v38 = vsel %vm947_vm4, %v2180_v60, -inf  ;;  %v2181_v8 = vadd.f32 %v2170_v11, %v4212_v56  ;;  %v3496_v11 = vld [vmem:[%s3823_s14] sm:$0xff]  }
0x10a6   : > { %2184 = vmax.xlane.f32.xlu0 %v2183_v38  ;;  %v3499_v38 = vld [vmem:[%s3823_s14 + $0x18] sm:$0xff]  }
0x10a7   : > { %v2186_v14 = vsel %vm947_vm4, %v2181_v8, -inf }
0x10a8   : > { %2187 = vmax.xlane.f32.xlu1 %v2186_v14 }
0x10aa   : > { %2190 = vmax.xlane.f32.xlu0 %v2189_v2 }
0x1133   : > { %v2185_v22 = vpop.xlane.xlu0 %2184 }
0x1134   : > { %v2192_v46 = vsub.f32 %v2180_v60, %v2185_v22 }
0x1135   : > { %v2188_v13 = vpop.xlane.xlu1 %2187 }
0x1136   : > { %v2195_v15 = vmul.f32 1.442695, %v2192_v46  ;;  %v2193_v33 = vsub.f32 %v2181_v8, %v2188_v13 }
0x1137   : > { %v2191_v34 = vpop.xlane.xlu0 %2190 }
0x1138   : > { %3608 = vpow2.f32 %v2195_v15  ;;  %v2197_v43 = vmul.f32 1.442695, %v2193_v33  ;;  %v2194_v50 = vsub.f32 %v2182_v12, %v2191_v34 }
0x113a   : > { %3610 = vpow2.f32 %v2197_v43  ;;  %v2199_v35 = vmul.f32 1.442695, %v2194_v50  ;;  %v3658_v50 = vld [vmem:[%s4661_s13 + $0x8] sm:$0xff] }
0x113c   : > { %3612 = vpow2.f32 %v2199_v35 }
0x1142   : > { %v3609_v56 = vpop.eup %3608 }
0x1143   : > { %v2201_v19 = vsel %vm947_vm4, %v3609_v56, 0.0 }
0x1144   : > { %v3611_v27 = vpop.eup %3610  ;;  %2202 = vadd.xlane.f32.xlu0 %v2201_v19 }
0x1145   : > { %v2204_v40 = vsel %vm947_vm4, %v3611_v27, 0.0 }
0x1146   : > { %v3613_v37 = vpop.eup %3612 }
0x1147   : > { %v2207_v41 = vsel %vm947_vm4, %v3613_v37, 0.0 }
0x1148   : > { %2205 = vadd.xlane.f32.xlu0 %v2204_v40  ;;  %2208 = vadd.xlane.f32.xlu1 %v2207_v41 }
0x1159   : > { %2220 = vrot.lane.b32.xlu1 %v4140_v36, %s3709_s27 }
0x115d   : > { %3440 = vrot.lane.b32.xlu1 %v3439_v32, %s3708_s3 }
0x115e   : > { %2218 = vrot.lane.b32.xlu0 %v4031_v29, %s3709_s27  ;;  %s4680_s27 = sld [smem:[#allocation10_spill]] }
0x1161   : > { %3445 = vrot.lane.b32.xlu1 %v3444_v28, %s3706_s23 }
0x1162   : > { %3450 = vrot.lane.b32.xlu0 %v3449_v55, %s3705_s29 }
0x1165   : > { %3455 = vrot.lane.b32.xlu1 %v3454_v24, %s3708_s3 }
0x1166   : > { %3460 = vrot.lane.b32.xlu0 %v3459_v57, %s3706_s23 }
0x116a   : > { %3470 = vrot.lane.b32.xlu0 %v3469_v25, %s3708_s3 }
0x11d1   : > { %v2203_v29 = vpop.xlane.xlu0 %2202 }
0x11d2   : > { %3614 = vrcp.f32 %v2203_v29 }
0x11d5   : > { %v2209_v31 = vpop.xlane.xlu1 %2208  ;;  %v2206_v32 = vpop.xlane.xlu0 %2205 }
0x11d6   : > { %3616 = vrcp.f32 %v2209_v31 }
0x11d7   : > { %3618 = vrcp.f32 %v2206_v32 }
0x11d9   : > { %v2221_v23 = vpop.permute.xlu1 %2220  ;;  %v2219_v36 = vpop.permute.xlu0 %2218 }
0x11da   : > { %3314 = vmatprep.subr.bf16.mxu1 %v2219_v36  ;;  %v2230_v48 = vsel %vm991_vm3, %v2221_v23, 0 }
0x11db   : > { %3315 = vmatpush3.bf16.msra.mxu1 %v2219_v36 }
0x11dc   : > { %3413 = vmatprep.subr.msk.bf16.mxu1 %vm991_vm3, %v2221_v23  ;;  %v3615_v28 = vpop.eup %3614 }
0x11dd   : > { %v3441_v39 = vpop.permute.xlu1 %3440  ;;  %v3451_v55 = vpop.permute.xlu0 %3450  ;;  %v2213_v45 = vmul.f32 %v3615_v28, %v3609_v56 }
0x11de   : > { %v3443_v52 = vunpack.i.h.bf16 %v3441_v39  ;;  %v3442_v54 = vunpack.i.l.bf16 %v3441_v39  ;;  %v3453_v25 = vunpack.i.h.bf16 %v3451_v55  ;;  %v3452_v57 = vunpack.i.l.bf16 %v3451_v55 }
0x11df   : > { %3317 = vmatpush3.bf16.msra.mxu1 %v2230_v48 }
0x11e0   : > { %v3617_v5 = vpop.eup %3616  ;;  %3322 = vmatprep.subr.bf16.mxu1 %v3710_v18  ;;  %v1588_v47 = vsel %vm883_vm2, %v4094_v21, %v3443_v52  ;;  %v1587_v53 = vsel %vm883_vm2, %v4092_v17, %v3442_v54  ;;  %v3497_v17 = vld [vmem:[%s3823_s14 + $0x8] sm:$0xff]   ;;  %v3498_v21 = vld [vmem:[%s3823_s14 + $0x10] sm:$0xff]   ;;  %s3712_s14 = smov [#allocation2]  }
0x11e1   : > { %v3619_v20 = vpop.eup %3618  ;;  %v2215_v24 = vmul.f32 %v3617_v5, %v3613_v37  ;;  %v3446_v59 = vpop.permute.xlu1 %3445  ;;  %s2872_s19 = sshll.u32 %s3712_s14, 4  ;;  %s2873_s19 = int_to_ptr.vmem [resolvable:$true] %s2872_s19 }
0x11e2   : > { %v3448_v42 = vunpack.i.h.bf16 %v3446_v59  ;;  %v3447_v44 = vunpack.i.l.bf16 %v3446_v59  ;;  %v2214_v61 = vmul.f32 %v3619_v20, %v3611_v27  ;;  %v3461_v37 = vpop.permute.xlu0 %3460  ;;  %p3671_p9 = scmp.lt.s32.totalorder %s2873_s19, %s2873_s19 }
0x11e3   : > { %v2217_v7 = vpack.c.bf16 %v2215_v24, %v2215_v24  ;;  %v3463_v23 = vunpack.i.h.bf16 %v3461_v37  ;;  %v3462_v36 = vunpack.i.l.bf16 %v3461_v37  ;;  %v3501_v37 = vld [vmem:[%s3836_s2 + $0x8] sm:$0xff]  }
0x11e4   : > { %v1591_v0 = vsel %vm1590_vm6, %v1587_v53, %v3447_v44  ;;  %v1592_v58 = vsel %vm1590_vm6, %v1588_v47, %v3448_v42  ;;  %v2216_v9 = vpack.c.bf16 %v2214_v61, %v2213_v45 }
0x11e5   : > { %v1595_v3 = vsel %vm1594_vm7, %v1591_v0, %v3452_v57  ;;  %v1596_v30 = vsel %vm1594_vm7, %v1592_v58, %v3453_v25  ;;  %v3456_v27 = vpop.permute.xlu1 %3455 }
0x11e6   : > { %v2325_v60 = vpack.c.bf16 %v1596_v30, %v1595_v3  ;;  %3318 = vmatprep.mubr.msk.bf16.mxu1 %vm947_vm4, %v2216_v9  ;;  %v3458_v40 = vunpack.i.h.bf16 %v3456_v27  ;;  %v3457_v41 = vunpack.i.l.bf16 %v3456_v27  ;;  %v3471_v32 = vpop.permute.xlu0 %3470  ;;  %v3500_v27 = vld [vmem:[%s3836_s2] sm:$0xff]  }
0x11e7   : > { %3319 = vmatmul.mubr.msk.bf16.vlgmr.msra.gmra.mrb[28].mxu1 %vm947_vm4, %v2217_v7  ;;  %v3473_v52 = vunpack.i.h.bf16 %v3471_v32  ;;  %v3472_v54 = vunpack.i.l.bf16 %v3471_v32  ;;  %3343 = vmatpush3.bf16.msra.mxu0 %v3500_v27 }
0x11e8   : > { %3323 = vmatpush3.bf16.msra.mxu1 %v3496_v11  ;;  %3330 = vmatprep.mubr.msk.bf16.mxu1 %vm3711_vm5, %v3710_v18  ;;  %v2316_v29 = vsel %vm883_vm2, %v4244_v6, %v3458_v40  ;;  %v1589_v31 = vsel %vm883_vm2, %v4090_v16, %v3457_v41  ;;  %v3502_v40 = vld [vmem:[%s3836_s2 + $0x10] sm:$0xff]   ;;  %v3503_v41 = vld [vmem:[%s3836_s2 + $0x18] sm:$0xff]  }
0x11e9   : > { %3324 = vmatprep.subr.bf16.mxu1 %v3710_v18  ;;  %v1593_v55 = vsel %vm1590_vm6, %v1589_v31, %v3462_v36  ;;  %v2319_v5 = vsel %vm1590_vm6, %v2316_v29, %v3463_v23  ;;  %v2318_v44 = vsel %vm883_vm2, %v4242_v4, %v3473_v52  ;;  %v2317_v45 = vsel %vm883_vm2, %v4246_v26, %v3472_v54 }
0x11ea   : > { %3344 = vmatprep.subr.bf16.mxu0 %v3710_v18 }
0x11eb   : > { %3345 = vmatpush3.bf16.msra.mxu0 %v3501_v37 }
0x11ec   : > { %3325 = vmatpush3.bf16.msra.mxu1 %v3497_v17  ;;  %3346 = vmatprep.subr.bf16.mxu0 %v3710_v18 }
0x11ed   : > { %3326 = vmatprep.subr.bf16.mxu1 %v3710_v18 }
0x11ef   : > { %3347 = vmatpush3.bf16.msra.mxu0 %v3502_v40 }
0x11f0   : > { %3327 = vmatpush3.bf16.msra.mxu1 %v3498_v21  ;;  %3348 = vmatprep.subr.bf16.mxu0 %v3710_v18 }
0x11f1   : > { %3328 = vmatprep.subr.bf16.mxu1 %v3710_v18 }
0x11f3   : > { %3349 = vmatpush3.bf16.msra.mxu0 %v3503_v41 }
0x11f4   : > { %3329 = vmatpush3.bf16.msra.mxu1 %v3499_v38 }
0x11f5   : > { %3362 = vmatprep.subr.bf16.mxu1 %v3710_v18 }
0x11f7   : > { %3331 = vmatmul.mubr.msk.bf16.vlgmr.msra.gmra.mrb[32].mxu1 %vm631_vm1, %v2325_v60 }
0x11f8   : > { %3334 = vmatprep.mubr.msk.bf16.mxu1 %vm3711_vm5, %v3710_v18 }
0x12ba   : > { %v3320_v8 = vpop.f32.mrb[28].mxu1 }
0x12bb   : > { %v2266_v12 = vpop.f32.mrb[29].mxu1 }
0x12bc   : > { %v3464_v14 = vpack.i.bf16 %v2266_v12, %v4202_v51  ;;  %v3321_v2 = vpop.f32.mrb[30].mxu1  ;;  %v4411_v51 = vld [vmem:[%s4679_s22] ss:$0 sm:$0xff]  ;;  %v3660_v12 = vld [vmem:[%s4661_s13 + $0x10] sm:$0xff] }
0x12bd   : > { %v2269_v22 = vpop.f32.mrb[31].mxu1 }
0x12be   : > { %v3479_v46 = vpack.i.bf16 %v3320_v8, %v2269_v22  ;;  %3465 = vrot.lane.b32.xlu1 %v3464_v14, %s3705_s29 }
0x12c0   : > { %3480 = vrot.lane.b32.xlu0 %v3479_v46, %s3705_s29 }
0x12c2   : > { %3475 = vrot.lane.b32.xlu1 %v3474_v63, %s3706_s23  ;;  %v3659_v63 = vld [vmem:[%s4661_s13] sm:$0xff] }
0x12ca   : > { %v2410_v13 = vpop.f32.mrb[32].mxu1 }
0x12cb   : > { %v3332_v15 = vpop.f32.mrb[33].mxu1  ;;  %v2411_v49 = vadd.f32 %v4411_v51, %v2410_v13  ;;  %v3661_v13 = vld [vmem:[%s4661_s13 + $0x18] sm:$0xff] }
0x12cc   : > { %v2413_v33 = vpop.f32.mrb[34].mxu1 }
0x12cd   : > { %v3333_v34 = vpop.f32.mrb[35].mxu1  ;;  %v2414_v43 = vadd.f32 %v4411_v51, %v2413_v33  ;;  %v4425_v56 = vadd.f32 %v3659_v63, %v2411_v49 }
0x12cf   : > { %v4417_v35 = vadd.f32 %v3658_v50, %v2414_v43  ;;  %v2440_v19 = vsel %vm631_vm1, %v4425_v56, 0.0 }
0x12d1   : > { %v2443_v62 = vsel %vm631_vm1, %v4417_v35, 0.0 }
0x12df   : > { %2444 = vadd.xlane.f32.xlu0 %v2443_v62 }
0x12e6   : > { %2441 = vadd.xlane.f32.xlu1 %v2440_v19 }
0x1330   : > { %v3466_v39 = vpop.permute.xlu1 %3465 }
0x1331   : > { %v3468_v48 = vunpack.i.h.bf16 %v3466_v39  ;;  %v3467_v28 = vunpack.i.l.bf16 %v3466_v39 }
0x1332   : > { %v3481_v6 = vpop.permute.xlu0 %3480 }
0x1333   : > { %v1597_v20 = vsel %vm1594_vm7, %v1593_v55, %v3467_v28  ;;  %v2322_v24 = vsel %vm1594_vm7, %v2319_v5, %v3468_v48  ;;  %v3483_v47 = vunpack.i.h.bf16 %v3481_v6  ;;  %v3482_v53 = vunpack.i.l.bf16 %v3481_v6  ;;  %v3662_v55 = vld [vmem:[%s4661_s13 + $0x20] sm:$0xff] }
0x1334   : > { %v2326_v59 = vpack.c.bf16 %v2322_v24, %v1597_v20  ;;  %v3476_v25 = vpop.permute.xlu1 %3475 }
0x1335   : > { %v3478_v16 = vunpack.i.h.bf16 %v3476_v25  ;;  %v3477_v42 = vunpack.i.l.bf16 %v3476_v25 }
0x1336   : > { %3335 = vmatmul.mubr.msk.bf16.gmra.mrb[36].mxu1 %vm631_vm1, %v2326_v59 }
0x1337   : > { %v2320_v57 = vsel %vm1590_vm6, %v2317_v45, %v3477_v42  ;;  %v2321_v61 = vsel %vm1590_vm6, %v2318_v44, %v3478_v16  ;;  %3338 = vmatprep.mubr.msk.bf16.mxu1 %vm3711_vm5, %v3710_v18  ;;  %v3663_v42 = vld [vmem:[%s4661_s13 + $0x28] sm:$0xff] }
0x1338   : > { %v2323_v0 = vsel %vm1594_vm7, %v2320_v57, %v3482_v53  ;;  %v2324_v58 = vsel %vm1594_vm7, %v2321_v61, %v3483_v47  ;;  %v2439_v61 = vld [vmem:[%s588_s21] sm:$0x3] }
0x1339   : > { %v2327_v7 = vpack.c.bf16 %v2324_v58, %v2323_v0  ;;  %v4516_v0 = vrot.slane %v2439_v61, %v3940_v1 }
0x133e   : > { %3339 = vmatmul.mubr.msk.bf16.gmra.mrb[40].mxu1 %vm631_vm1, %v2327_v7 }
0x133f   : > { %3378 = vmatprep.mubr.msk.bf16.mxu1 %vm3711_vm5, %v3710_v18 }
0x136c   : > { %v2445_v11 = vpop.xlane.xlu0 %2444 }
0x136d   : > { %v2459_v17 = vmul.f32 0.015625, %v2445_v11 }
0x136f   : > { %v2465_v46 = vsub.f32 %v4417_v35, %v2459_v17 }
0x1371   : > { %v2471_v49 = vmul.f32 %v2465_v46, %v2465_v46 }
0x1373   : > { %v2442_v4 = vpop.xlane.xlu1 %2441  ;;  %v2479_v19 = vsel %vm631_vm1, %v2471_v49, 0.0 }
0x1374   : > { %v2458_v26 = vmul.f32 0.015625, %v2442_v4 }
0x1376   : > { %v4452_v3 = vsub.f32 %v4425_v56, %v2458_v26 }
0x1378   : > { %v2470_v30 = vmul.f32 %v4452_v3, %v4452_v3 }
0x137a   : > { %v2476_v9 = vsel %vm631_vm1, %v2470_v30, 0.0  ;;  %v4521_v30 = vrot.slane %v2439_v61, %v3950_v10 }
0x137b   : > { %2477 = vadd.xlane.f32.xlu1 %v2476_v9 }
0x1408   : > { %v2478_v29 = vpop.xlane.xlu1 %2477 }
0x1409   : > { %v2418_v60 = vpop.f32.mrb[36].mxu1  ;;  %v2494_v31 = vmul.f32 0.015625, %v2478_v29 }
0x140a   : > { %v2419_v21 = vadd.f32 %v4411_v51, %v2418_v60  ;;  %v3336_v38 = vpop.f32.mrb[37].mxu1 }
0x140b   : > { %v2421_v8 = vpop.f32.mrb[38].mxu1  ;;  %v2500_v36 = vadd.f32 1e-05, %v2494_v31  ;;  %v3506_v38 = vld [vmem:[%s3845_s5 + $0x10] sm:$0xff]  }
0x140c   : > { %v4461_v14 = vadd.f32 %v3660_v12, %v2419_v21  ;;  %v2422_v2 = vadd.f32 %v4411_v51, %v2421_v8  ;;  %v3337_v22 = vpop.f32.mrb[39].mxu1  ;;  %v3505_v21 = vld [vmem:[%s3845_s5 + $0x8] sm:$0xff]   ;;  %v3507_v8 = vld [vmem:[%s3845_s5 + $0x18] sm:$0xff]   ;;  %v3508_v12 = vld [vmem:[%s3845_s5 + $0x20] sm:$0xff]  }
0x140d   : > { %3620 = vrsqrt.f32 %v2500_v36  ;;  %v3510_v22 = vld [vmem:[%s3845_s5 + $0x30] sm:$0xff]  }
0x140e   : > { %v4468_v15 = vadd.f32 %v3661_v13, %v2422_v2  ;;  %v2446_v33 = vsel %vm631_vm1, %v4461_v14, 0.0  ;;  %v3509_v2 = vld [vmem:[%s3845_s5 + $0x28] sm:$0xff]  }
0x140f   : > { %2447 = vadd.xlane.f32.xlu0 %v2446_v33 }
0x1410   : > { %v2449_v50 = vsel %vm631_vm1, %v4468_v15, 0.0 }
0x1411   : > { %v2426_v34 = vpop.f32.mrb[40].mxu1 }
0x1412   : > { %v3340_v43 = vpop.f32.mrb[41].mxu1  ;;  %v2427_v39 = vadd.f32 %v4411_v51, %v2426_v34 }
0x1413   : > { %2450 = vadd.xlane.f32.xlu0 %v2449_v50  ;;  %v2429_v62 = vpop.f32.mrb[42].mxu1 }
0x1414   : > { %v3341_v63 = vpop.f32.mrb[43].mxu1  ;;  %v4491_v5 = vadd.f32 %v3662_v55, %v2427_v39  ;;  %v2430_v20 = vadd.f32 %v4411_v51, %v2429_v62 }
0x1416   : > { %v4503_v44 = vadd.f32 %v3663_v42, %v2430_v20  ;;  %v2452_v47 = vsel %vm631_vm1, %v4491_v5, 0.0 }
0x1417   : > { %2480 = vadd.xlane.f32.xlu0 %v2479_v19  ;;  %v3621_v57 = vpop.eup %3620 }
0x1418   : > { %v2455_v53 = vsel %vm631_vm1, %v4503_v44, 0.0  ;;  %v2512_v58 = vmul.f32 %v3621_v57, %v4452_v3  ;;  %v3504_v3 = vld [vmem:[%s3845_s5] sm:$0xff]  }
0x1419   : > { %3363 = vmatpush3.bf16.msra.mxu1 %v3504_v3 }
0x141a   : > { %v2522_v4 = vmul.f32 %v4516_v0, %v2512_v58  ;;  %3364 = vmatprep.subr.bf16.mxu1 %v3710_v18 }
0x141c   : > { %v2532_v11 = vadd.f32 %v4521_v30, %v2522_v4 }
0x141d   : > { %3365 = vmatpush3.bf16.msra.mxu1 %v3505_v21 }
0x141e   : > { %3366 = vmatprep.subr.bf16.mxu1 %v3710_v18 }
0x1421   : > { %3367 = vmatpush3.bf16.msra.mxu1 %v3506_v38 }
0x1422   : > { %3368 = vmatprep.subr.bf16.mxu1 %v3710_v18 }
0x1425   : > { %3369 = vmatpush3.bf16.msra.mxu1 %v3507_v8 }
0x1426   : > { %3370 = vmatprep.subr.bf16.mxu1 %v3710_v18 }
0x1429   : > { %3371 = vmatpush3.bf16.msra.mxu1 %v3508_v12 }
0x142a   : > { %3372 = vmatprep.subr.bf16.mxu1 %v3710_v18 }
0x142d   : > { %3373 = vmatpush3.bf16.msra.mxu1 %v3509_v2 }
0x142e   : > { %3374 = vmatprep.subr.bf16.mxu1 %v3710_v18 }
0x1431   : > { %3375 = vmatpush3.bf16.msra.mxu1 %v3510_v22 }
0x1432   : > { %3376 = vmatprep.subr.bf16.mxu1 %v3710_v18 }
0x149c   : > { %v2448_v32 = vpop.xlane.xlu0 %2447 }
0x149d   : > { %v2460_v23 = vmul.f32 0.015625, %v2448_v32 }
0x149f   : > { %v4484_v48 = vsub.f32 %v4461_v14, %v2460_v23 }
0x14a0   : > { %v2451_v28 = vpop.xlane.xlu0 %2450 }
0x14a1   : > { %v2461_v52 = vmul.f32 0.015625, %v2451_v28  ;;  %v2472_v54 = vmul.f32 %v4484_v48, %v4484_v48 }
0x14a3   : > { %v4495_v24 = vsub.f32 %v4468_v15, %v2461_v52  ;;  %v2482_v6 = vsel %vm631_vm1, %v2472_v54, 0.0 }
0x14a4   : > { %2483 = vadd.xlane.f32.xlu1 %v2482_v6  ;;  %v2481_v59 = vpop.xlane.xlu0 %2480 }
0x14a5   : > { %v2495_v25 = vmul.f32 0.015625, %v2481_v59  ;;  %v2473_v16 = vmul.f32 %v4495_v24, %v4495_v24 }
0x14a7   : > { %v2501_v45 = vadd.f32 1e-05, %v2495_v25  ;;  %v2485_v51 = vsel %vm631_vm1, %v2473_v16, 0.0 }
0x14a8   : > { %2486 = vadd.xlane.f32.xlu0 %v2485_v51  ;;  %2453 = vadd.xlane.f32.xlu1 %v2452_v47 }
0x14a9   : > { %3622 = vrsqrt.f32 %v2501_v45 }
0x14ac   : > { %2456 = vadd.xlane.f32.xlu0 %v2455_v53 }
0x14b3   : > { %v3623_v7 = vpop.eup %3622 }
0x14b4   : > { %v2513_v26 = vmul.f32 %v3623_v7, %v2465_v46  ;;  %v3511_v46 = vld [vmem:[%s3845_s5 + $0x38] sm:$0xff]   ;;  %s3664_s5 = scalar_lea.vmem %s2873_s19, 32 }
0x14b5   : > { %3377 = vmatpush3.bf16.msra.mxu1 %v3511_v46  ;;  %p3665_p6 = scmp.ne.s32.totalorder %s2873_s19, %s3664_s5  ;;  %p3672_p10 = scmp.lt.s32.totalorder %s3664_s5, %s3664_s5 }
0x14b6   : > { %v2523_v9 = vmul.f32 %v4516_v0, %v2513_v26 }
0x14b7   : > { %p3666_p7 = pnand %p3665_p6, %p3418_p5  ;;  %p3673_p11 = por %p3672_p10, %p3671_p9 }
0x14b8   : > { %v2533_v60 = vadd.f32 %v4521_v30, %v2523_v9 }
0x14b9   : > { %p3667_p8 = pneg %p3666_p7 }
0x14ba   : > { %v2538_v17 = vpack.c.bf16 %v2533_v60, %v2532_v11 }
0x14bb   : > { %p3674_p12 = pnand %p3673_p11, %p3667_p8 }
0x14bc   : > { %3351 = vmatmul.mubr.msk.bf16.vlgmr.msra.gmra.mrb[44].mxu0 %vm631_vm1, %v2538_v17 }
0x14bd   : > { %3354 = vmatprep.mubr.msk.bf16.mxu0 %vm3711_vm5, %v3710_v18 }
0x1531   : > { %v2484_v13 = vpop.xlane.xlu1 %2483 }
0x1532   : > { %v2496_v33 = vmul.f32 0.015625, %v2484_v13 }
0x1534   : > { %v2502_v34 = vadd.f32 1e-05, %v2496_v33 }
0x1535   : > { %v2487_v43 = vpop.xlane.xlu0 %2486  ;;  %v2454_v50 = vpop.xlane.xlu1 %2453 }
0x1536   : > { %3624 = vrsqrt.f32 %v2502_v34  ;;  %v2497_v49 = vmul.f32 0.015625, %v2487_v43  ;;  %v2462_v62 = vmul.f32 0.015625, %v2454_v50 }
0x1538   : > { %v2503_v63 = vadd.f32 1e-05, %v2497_v49  ;;  %v2468_v19 = vsub.f32 %v4491_v5, %v2462_v62 }
0x1539   : > { %v2457_v27 = vpop.xlane.xlu0 %2456 }
0x153a   : > { %3626 = vrsqrt.f32 %v2503_v63  ;;  %v2463_v37 = vmul.f32 0.015625, %v2457_v27  ;;  %v2474_v40 = vmul.f32 %v2468_v19, %v2468_v19 }
0x153c   : > { %v2469_v41 = vsub.f32 %v4503_v44, %v2463_v37  ;;  %v2488_v29 = vsel %vm631_vm1, %v2474_v40, 0.0 }
0x153d   : > { %2489 = vadd.xlane.f32.xlu1 %v2488_v29 }
0x153e   : > { %v2475_v31 = vmul.f32 %v2469_v41, %v2469_v41 }
0x1540   : > { %v3625_v32 = vpop.eup %3624  ;;  %v2491_v23 = vsel %vm631_vm1, %v2475_v31, 0.0 }
0x1541   : > { %v2514_v36 = vmul.f32 %v3625_v32, %v4484_v48  ;;  %2492 = vadd.xlane.f32.xlu0 %v2491_v23  ;;  %v4562_v48 = vld [vmem:[%s596_s26] ss:$0 sm:$0xff] }
0x1543   : > { %v2524_v52 = vmul.f32 %v4516_v0, %v2514_v36 }
0x1544   : > { %v3627_v39 = vpop.eup %3626 }
0x1545   : > { %v2515_v28 = vmul.f32 %v3627_v39, %v4495_v24  ;;  %v2534_v55 = vadd.f32 %v4521_v30, %v2524_v52 }
0x1547   : > { %v2525_v54 = vmul.f32 %v4516_v0, %v2515_v28 }
0x1549   : > { %v2535_v20 = vadd.f32 %v4521_v30, %v2525_v54 }
0x154b   : > { %v2539_v6 = vpack.c.bf16 %v2535_v20, %v2534_v55 }
0x154d   : > { %3355 = vmatmul.mubr.msk.bf16.gmra.mrb[48].mxu0 %vm631_vm1, %v2539_v6  ;;  %v3088_v6 = vld [vmem:[%s604_s18] ss:$0 sm:$0xff] }
0x154e   : > { %3358 = vmatprep.mubr.msk.bf16.mxu0 %vm3711_vm5, %v3710_v18 }
0x158f   : > { %v2623_v24 = vpop.f32.mrb[44].mxu0 }
0x1590   : > { %v2624_v59 = vadd.f32 %v4562_v48, %v2623_v24  ;;  %v3352_v25 = vpop.f32.mrb[45].mxu0 }
0x1591   : > { %v2626_v16 = vpop.f32.mrb[46].mxu0 }
0x1592   : > { %v2646_v42 = vmul.f32 -1.702, %v2624_v59  ;;  %v2627_v45 = vadd.f32 %v4562_v48, %v2626_v16  ;;  %v3353_v51 = vpop.f32.mrb[47].mxu0 }
0x1594   : > { %v2652_v47 = vmul.f32 1.442695, %v2646_v42  ;;  %v2647_v53 = vmul.f32 -1.702, %v2627_v45 }
0x1596   : > { %3628 = vpow2.f32 %v2652_v47  ;;  %v2654_v57 = vmul.f32 1.442695, %v2647_v53 }
0x1598   : > { %3630 = vpow2.f32 %v2654_v57 }
0x15a0   : > { %v3629_v61 = vpop.eup %3628 }
0x15a1   : > { %v2664_v58 = vadd.f32 1.0, %v3629_v61 }
0x15a2   : > { %v3631_v7 = vpop.eup %3630 }
0x15a3   : > { %3632 = vrcp.f32 %v2664_v58  ;;  %v2665_v4 = vadd.f32 1.0, %v3631_v7 }
0x15a5   : > { %3634 = vrcp.f32 %v2665_v4 }
0x15ad   : > { %v3633_v26 = vpop.eup %3632 }
0x15ae   : > { %v2682_v11 = vmul.f32 %v3633_v26, %v2624_v59 }
0x15af   : > { %v3635_v9 = vpop.eup %3634 }
0x15b0   : > { %v2683_v60 = vmul.f32 %v3635_v9, %v2627_v45 }
0x15b2   : > { %v2688_v17 = vpack.c.bf16 %v2683_v60, %v2682_v11 }
0x15b4   : > { %3379 = vmatmul.mubr.bf16.vlgmr.msra.gmra.mrb[44].mxu1 %v2688_v17 }
0x15b5   : > { %3382 = vmatprep.mubr.msk.bf16.mxu1 %vm3711_vm5, %v3710_v18 }
0x15ca   : > { %v2490_v3 = vpop.xlane.xlu1 %2489 }
0x15cb   : > { %v2498_v21 = vmul.f32 0.015625, %v2490_v3 }
0x15cd   : > { %v2504_v38 = vadd.f32 1e-05, %v2498_v21 }
0x15ce   : > { %v2493_v8 = vpop.xlane.xlu0 %2492 }
0x15cf   : > { %3636 = vrsqrt.f32 %v2504_v38  ;;  %v2499_v12 = vmul.f32 0.015625, %v2493_v8 }
0x15d1   : > { %v2505_v2 = vadd.f32 1e-05, %v2499_v12 }
0x15d3   : > { %3638 = vrsqrt.f32 %v2505_v2 }
0x15d9   : > { %v3637_v22 = vpop.eup %3636 }
0x15da   : > { %v2516_v46 = vmul.f32 %v3637_v22, %v2468_v19 }
0x15dc   : > { %v2526_v34 = vmul.f32 %v4516_v0, %v2516_v46 }
0x15dd   : > { %v3639_v13 = vpop.eup %3638 }
0x15de   : > { %v2517_v33 = vmul.f32 %v3639_v13, %v2469_v41  ;;  %v2536_v50 = vadd.f32 %v4521_v30, %v2526_v34 }
0x15e0   : > { %v2527_v43 = vmul.f32 %v4516_v0, %v2517_v33 }
0x15e2   : > { %v2537_v49 = vadd.f32 %v4521_v30, %v2527_v43 }
0x15e4   : > { %v2540_v62 = vpack.c.bf16 %v2537_v49, %v2536_v50 }
0x15e6   : > { %3359 = vmatmul.mubr.msk.bf16.gmra.mrb[52].mxu0 %vm631_vm1, %v2540_v62 }
0x1620   : > { %v2631_v63 = vpop.f32.mrb[48].mxu0 }
0x1621   : > { %v2632_v27 = vadd.f32 %v4562_v48, %v2631_v63  ;;  %v3356_v37 = vpop.f32.mrb[49].mxu0 }
0x1622   : > { %v2634_v40 = vpop.f32.mrb[50].mxu0 }
0x1623   : > { %v2648_v29 = vmul.f32 -1.702, %v2632_v27  ;;  %v2635_v19 = vadd.f32 %v4562_v48, %v2634_v40  ;;  %v3357_v41 = vpop.f32.mrb[51].mxu0 }
0x1625   : > { %v2656_v31 = vmul.f32 1.442695, %v2648_v29  ;;  %v2649_v32 = vmul.f32 -1.702, %v2635_v19 }
0x1627   : > { %3640 = vpow2.f32 %v2656_v31  ;;  %v2658_v0 = vmul.f32 1.442695, %v2649_v32 }
0x1629   : > { %3642 = vpow2.f32 %v2658_v0 }
0x1631   : > { %v3641_v23 = vpop.eup %3640 }
0x1632   : > { %v2666_v30 = vadd.f32 1.0, %v3641_v23 }
0x1633   : > { %v3643_v36 = vpop.eup %3642 }
0x1634   : > { %3644 = vrcp.f32 %v2666_v30  ;;  %v2667_v39 = vadd.f32 1.0, %v3643_v36 }
0x1636   : > { %3646 = vrcp.f32 %v2667_v39  ;;  %v2831_v39 = vld [vmem:[%s4680_s27] sm:$0x3] }
0x163e   : > { %v3645_v28 = vpop.eup %3644 }
0x163f   : > { %v2684_v54 = vmul.f32 %v3645_v28, %v2632_v27 }
0x1640   : > { %v3647_v52 = vpop.eup %3646 }
0x1641   : > { %v2685_v55 = vmul.f32 %v3647_v52, %v2635_v19 }
0x1643   : > { %v2689_v20 = vpack.c.bf16 %v2685_v55, %v2684_v54  ;;  %v2859_v54 = vrot.slane %v2831_v39, %v3950_v10 }
0x1645   : > { %3383 = vmatmul.mubr.bf16.gmra.mrb[48].mxu1 %v2689_v20 }
0x1646   : > { %3386 = vmatprep.mubr.msk.bf16.mxu1 %vm3711_vm5, %v3710_v18 }
0x1687   : > { %v2796_v24 = vpop.f32.mrb[44].mxu1 }
0x1688   : > { %v2797_v59 = vadd.f32 %v3088_v6, %v2796_v24  ;;  %v3380_v25 = vpop.f32.mrb[45].mxu1 }
0x1689   : > { %v2799_v16 = vpop.f32.mrb[46].mxu1 }
0x168a   : > { %v2819_v42 = vadd.f32 %v2797_v59, %v4425_v56  ;;  %v2800_v45 = vadd.f32 %v3088_v6, %v2799_v16  ;;  %v3381_v51 = vpop.f32.mrb[47].mxu1 }
0x168c   : > { %2825 = vst.msk [vmem:[%s4661_s13] sm:$0xff] %vm631_vm1, %v2819_v42  ;;  %v2820_v18 = vadd.f32 %v2800_v45, %v4417_v35 }
0x168e   : > { %2826 = vst.msk [vmem:[%s4661_s13 + $0x8] sm:$0xff] %vm631_vm1, %v2820_v18 }
0x16b9   : > { %v2639_v47 = vpop.f32.mrb[52].mxu0 }
0x16ba   : > { %v2640_v53 = vadd.f32 %v4562_v48, %v2639_v47  ;;  %v3360_v57 = vpop.f32.mrb[53].mxu0 }
0x16bb   : > { %v2642_v61 = vpop.f32.mrb[54].mxu0 }
0x16bc   : > { %v2650_v56 = vmul.f32 -1.702, %v2640_v53  ;;  %v2643_v58 = vadd.f32 %v4562_v48, %v2642_v61  ;;  %v3361_v7 = vpop.f32.mrb[55].mxu0 }
0x16be   : > { %v2660_v4 = vmul.f32 1.442695, %v2650_v56  ;;  %v2651_v26 = vmul.f32 -1.702, %v2643_v58 }
0x16c0   : > { %3648 = vpow2.f32 %v2660_v4  ;;  %v2662_v9 = vmul.f32 1.442695, %v2651_v26 }
0x16c2   : > { %3650 = vpow2.f32 %v2662_v9 }
0x16ca   : > { %v3649_v35 = vpop.eup %3648 }
0x16cb   : > { %v2668_v11 = vadd.f32 1.0, %v3649_v35 }
0x16cc   : > { %v3651_v60 = vpop.eup %3650 }
0x16cd   : > { %3652 = vrcp.f32 %v2668_v11  ;;  %v2669_v17 = vadd.f32 1.0, %v3651_v60 }
0x16cf   : > { %3654 = vrcp.f32 %v2669_v17 }
0x16d7   : > { %v3653_v3 = vpop.eup %3652 }
0x16d8   : > { %v2686_v38 = vmul.f32 %v3653_v3, %v2640_v53 }
0x16d9   : > { %v3655_v21 = vpop.eup %3654 }
0x16da   : > { %v2687_v8 = vmul.f32 %v3655_v21, %v2643_v58 }
0x16dc   : > { %v2690_v12 = vpack.c.bf16 %v2687_v8, %v2686_v38 }
0x16de   : > { %3387 = vmatmul.mubr.bf16.gmra.mrb[52].mxu1 %v2690_v12 }
0x1718   : > { %v2804_v2 = vpop.f32.mrb[48].mxu1 }
0x1719   : > { %v2805_v48 = vadd.f32 %v3088_v6, %v2804_v2  ;;  %v3384_v22 = vpop.f32.mrb[49].mxu1 }
0x171a   : > { %v2807_v46 = vpop.f32.mrb[50].mxu1 }
0x171b   : > { %v2821_v13 = vadd.f32 %v2805_v48, %v4461_v14  ;;  %v2808_v33 = vadd.f32 %v3088_v6, %v2807_v46  ;;  %v3385_v34 = vpop.f32.mrb[51].mxu1 }
0x171d   : > { %2827 = vst.msk [vmem:[%s4661_s13 + $0x10] sm:$0xff] %vm631_vm1, %v2821_v13  ;;  %v2822_v43 = vadd.f32 %v2808_v33, %v4468_v15 }
0x171f   : > { %2828 = vst.msk [vmem:[%s4661_s13 + $0x18] sm:$0xff] %vm631_vm1, %v2822_v43  ;;  %v2833_v50 = vrot.slane %v2822_v43, 7 }
0x1721   : > { %v2836_v49 = vsel %vm2835_vm8, %v2819_v42, %v2833_v50 }
0x1722   : > { %v2838_v14 = vsel %vm2837_vm9, %v2836_v49, 0.0 }
0x1723   : > { %2839 = vadd.xlane.f32.xlu1 %v2838_v14 }
0x17b0   : > { %v2840_v62 = vpop.xlane.xlu1 %2839 }
0x17b1   : > { %v2841_v63 = vmul.f32 0.015625, %v2840_v62  ;;  %v2812_v27 = vpop.f32.mrb[52].mxu1 }
0x17b2   : > { %v2813_v37 = vadd.f32 %v3088_v6, %v2812_v27  ;;  %v3388_v40 = vpop.f32.mrb[53].mxu1 }
0x17b3   : > { %v2842_v29 = vsub.f32 %v2836_v49, %v2841_v63  ;;  %v2815_v19 = vpop.f32.mrb[54].mxu1 }
0x17b4   : > { %v2823_v15 = vadd.f32 %v2813_v37, %v4491_v5  ;;  %v2816_v41 = vadd.f32 %v3088_v6, %v2815_v19  ;;  %v3389_v31 = vpop.f32.mrb[55].mxu1 }
0x17b5   : > { %v2843_v32 = vmul.f32 %v2842_v29, %v2842_v29 }
0x17b6   : > { %2829 = vst.msk [vmem:[%s4661_s13 + $0x20] sm:$0xff] %vm631_vm1, %v2823_v15  ;;  %v2824_v0 = vadd.f32 %v2816_v41, %v4503_v44  ;;  %v2854_v44 = vrot.slane %v2831_v39, %v3940_v1 }
0x17b7   : > { %v2844_v23 = vsel %vm2837_vm9, %v2843_v32, 0.0 }
0x17b8   : > { %2830 = vst.msk [vmem:[%s4661_s13 + $0x28] sm:$0xff] %vm631_vm1, %v2824_v0  ;;  %2845 = vadd.xlane.f32.xlu0 %v2844_v23 }
0x1845   : > { %v2846_v5 = vpop.xlane.xlu0 %2845 }
0x1846   : > { %v2847_v30 = vmul.f32 0.015625, %v2846_v5 }
0x1848   : > { %v2848_v36 = vadd.f32 1e-05, %v2847_v30 }
0x184a   : > { %3656 = vrsqrt.f32 %v2848_v36 }
0x1854   : > { %v3657_v28 = vpop.eup %3656 }
0x1855   : > { %v2850_v52 = vmul.f32 %v3657_v28, %v2842_v29 }
0x1857   : > { %v2855_v55 = vmul.f32 %v2854_v44, %v2850_v52 }
0x1859   : > { %v2860_v20 = vadd.f32 %v2859_v54, %v2855_v55 }
0x185b   : > { %2861 = vst.msk [vmem:[#allocation2] sm:$0x3] %vm2837_vm9, %v2860_v20 }
0x185c   : > { %3677 = shalt.err (!%p3674_p12)
}
0x185d   : > { %s4681_s21 = sld [smem:[#allocation11_spill]] }
0x1863   : > { %s3678_s22 = scalar_lea.hbm %s4681_s21, 32 }
0x1864   : > { %p3679_p13 = scmp.ne.s32.totalorder %s4681_s21, %s3678_s22  ;;  %p3684_p2 = scmp.lt.u32.totalorder %s3678_s22, %s4681_s21 }
0x1866   : > { %p3680_p0 = pnand %p3679_p13, %p3418_p5 }
0x1868   : > { %p3681_p1 = pneg %p3680_p0 }
0x186a   : > { %p3686_p3 = pnand %p3684_p2, %p3681_p1 }
0x186c   : > { %3689 = shalt.err (!%p3686_p3)
}
0x186d   : > { %3415 = dma.vmem_to_hbm [thread:$0]  (%p3418_p5), %s2873_s19, 32, %s4681_s21, [#allocation3]  }
0x186e   : > { %3695 = dma.done.wait (%p3418_p5), [#allocation3], 32  }
0x186f   : > { %3697 = vsyncadd (%p3418_p5), [#allocation3], 4294967264 }
0x1870 PF: > { %s4682_s28 = sld [smem:[#allocation5_spill]] }
0x1876   : > { %s26_s29 = sadd.s32 1, %s4682_s28  }
0x1877   : > { %p23_p4 = scmp.ge.s32.totalorder %s26_s29, 4  }
0x1879   :  { %25 = sbr.rel (!%p23_p4) target bundleno = 8 (0x8), region = 138 }
0x1880   :  { %2888 = vsyncpa [#allocation3], 1 }
0x1881   :  { %2890 = vsyncpa [#allocation3 + $0x1], 1 }

</bundles_post_ra>
